<compile_context>
chip_gen: v7x
topology: tpu7x:2x2x1
jax: 0.10.0
libtpu: 0.0.40
codegen_flags: <defaults>
</compile_context>

<pallas_src>
import functools

import jax
import jax.numpy as jnp
from jax.experimental import pallas as pl
from jax.experimental.pallas import tpu as pltpu


def _round_up(x, m):
    return ((x + m - 1) // m) * m


def _choose_tm(m):
    """Pick an M tile: single tile (16-sublane multiple) when small, otherwise
    the candidate tile that minimizes row padding (ties -> bigger tile)."""
    if m <= 256:
        return _round_up(m, 16)
    best_tm, best_pad = None, None
    for tm in (256, 224, 192, 160, 128):
        pad = _round_up(m, tm) - m
        if best_pad is None or pad < best_pad or (pad == best_pad and tm > best_tm):
            best_tm, best_pad = tm, pad
    return best_tm


# ----------------------------------------------------------------------------
# Pallas kernels
# ----------------------------------------------------------------------------
def _mm_bias_act_kernel(x_ref, w_ref, b_ref, o_ref, *, relu):
    """out = act(x @ w + b); bf16 MXU operands, f32 accumulate + epilogue."""
    acc = jnp.dot(x_ref[...], w_ref[...], preferred_element_type=jnp.float32)
    y = acc + b_ref[...]
    if relu:
        y = jnp.maximum(y, 0.0)
    o_ref[...] = y.astype(o_ref.dtype)


def _fc_head_kernel(x_ref, w1_ref, b1_ref, w2_ref, b2_ref, o_ref):
    """Fused fc1 + ReLU + fc2; hidden activation stays on-chip."""
    h = jnp.dot(x_ref[...], w1_ref[...], preferred_element_type=jnp.float32)
    h = jnp.maximum(h + b1_ref[...], 0.0)
    out = jnp.dot(h.astype(jnp.bfloat16), w2_ref[...],
                  preferred_element_type=jnp.float32)
    o_ref[...] = out + b2_ref[...]


# ----------------------------------------------------------------------------
# Pallas wrappers
# ----------------------------------------------------------------------------
def fused_matmul_bias_act(x, wp, bp, *, relu=True, out_dtype=jnp.bfloat16):
    """act(x @ wp + bp): x (M, K<=Kp) float, wp (Kp, Np) bf16, bp (1, Np) f32."""
    M, K = x.shape
    Kp, Np = wp.shape
    assert K <= Kp
    tm = _choose_tm(M)
    Mp = _round_up(M, tm)
    tn = Np if Np <= 256 else 128
    if Mp != M or Kp != K:
        x = jnp.pad(x, ((0, Mp - M), (0, Kp - K)))
    xp = x.astype(jnp.bfloat16)

    cost = pl.CostEstimate(
        flops=2 * Mp * Kp * Np,
        transcendentals=0,
        bytes_accessed=2 * (Mp * Kp + Kp * Np) + 4 * Np
        + Mp * Np * jnp.dtype(out_dtype).itemsize,
    )
    out = pl.pallas_call(
        functools.partial(_mm_bias_act_kernel, relu=relu),
        out_shape=jax.ShapeDtypeStruct((Mp, Np), out_dtype),
        grid_spec=pltpu.PrefetchScalarGridSpec(
            num_scalar_prefetch=0,
            grid=(Mp // tm, Np // tn),
            in_specs=[
                pl.BlockSpec((tm, Kp), lambda i, j: (i, 0)),
                pl.BlockSpec((Kp, tn), lambda i, j: (0, j)),
                pl.BlockSpec((1, tn), lambda i, j: (0, j)),
            ],
            out_specs=pl.BlockSpec((tm, tn), lambda i, j: (i, j)),
        ),
        compiler_params=pltpu.CompilerParams(
            dimension_semantics=("parallel", "parallel")),
        cost_estimate=cost,
    )(xp, wp, bp)
    return out


def fused_fc_head(x, w1p, b1p, w2p, b2p):
    """relu(x @ w1 + b1) @ w2 + b2 in one pallas_call (single grid step)."""
    M, K = x.shape
    K1p, N1 = w1p.shape
    K2, N2 = w2p.shape
    assert K <= K1p and N1 == K2
    Mp = _round_up(M, 16)
    if Mp != M or K1p != K:
        x = jnp.pad(x, ((0, Mp - M), (0, K1p - K)))
    xp = x.astype(jnp.bfloat16)

    cost = pl.CostEstimate(
        flops=2 * Mp * (K1p * N1 + K2 * N2),
        transcendentals=0,
        bytes_accessed=2 * (Mp * K1p + K1p * N1 + K2 * N2)
        + 4 * (N1 + N2 + Mp * N2),
    )
    out = pl.pallas_call(
        _fc_head_kernel,
        out_shape=jax.ShapeDtypeStruct((Mp, N2), jnp.float32),
        grid_spec=pltpu.PrefetchScalarGridSpec(
            num_scalar_prefetch=0,
            grid=(1,),
            in_specs=[
                pl.BlockSpec((Mp, K1p), lambda i: (0, 0)),
                pl.BlockSpec((K1p, N1), lambda i: (0, 0)),
                pl.BlockSpec((1, N1), lambda i: (0, 0)),
                pl.BlockSpec((K2, N2), lambda i: (0, 0)),
                pl.BlockSpec((1, N2), lambda i: (0, 0)),
            ],
            out_specs=pl.BlockSpec((Mp, N2), lambda i: (0, 0)),
        ),
        compiler_params=pltpu.CompilerParams(
            dimension_semantics=("arbitrary",)),
        cost_estimate=cost,
    )(xp, w1p, b1p, w2p, b2p)
    return out


# ----------------------------------------------------------------------------
# JAX glue: NHWC patch extraction, one-time parameter preparation
# ----------------------------------------------------------------------------
def conv_block(x_nhwc, wp, bp, *, oc, k, stride):
    """Conv2d(valid) + BN(eval, folded) + ReLU via the fused Pallas matmul."""
    n, h, w, c = x_nhwc.shape
    oh = (h - k) // stride + 1
    ow = (w - k) // stride + 1
    patches = jax.lax.conv_general_dilated_patches(
        x_nhwc, filter_shape=(k, k), window_strides=(stride, stride),
        padding="VALID", dimension_numbers=("NHWC", "HWIO", "NHWC"))
    patches = patches.reshape(n * oh * ow, c * k * k)   # feature order (C,kh,kw)
    y = fused_matmul_bias_act(patches, wp, bp, relu=True,
                              out_dtype=jnp.bfloat16)
    return y[:n * oh * ow, :oc].reshape(n, oh, ow, oc)


def _fold_bn(gamma, beta, mean, var, eps=1e-5):
    scale = gamma / jnp.sqrt(var + eps)
    shift = beta - mean * scale
    return scale, shift


def _prep_conv(w, b, gamma, beta, mean, var):
    """PyTorch conv+BN(eval) -> (Kp, Np) bf16 weight (BN scale folded) + f32 bias."""
    oc, c, kh, kw = w.shape
    scale, shift = _fold_bn(gamma, beta, mean, var)
    w_flat = w.reshape(oc, c * kh * kw).T * scale[None, :]
    bias = b * scale + shift
    kdim = c * kh * kw
    kp, npad = _round_up(kdim, 128), _round_up(oc, 128)
    wp = jnp.pad(w_flat, ((0, kp - kdim), (0, npad - oc))).astype(jnp.bfloat16)
    bp = jnp.pad(bias[None, :], ((0, 0), (0, npad - oc))).astype(jnp.float32)
    return wp, bp


def _prep_fc1_nhwc(w, b, *, ch=64, hh=7, ww=7):
    """Permute fc1 columns from PyTorch (C,H,W) flatten to NHWC (H,W,C) flatten."""
    n_out, k = w.shape
    w = w.reshape(n_out, ch, hh, ww).transpose(0, 2, 3, 1).reshape(n_out, k)
    kp = _round_up(k, 128)
    w1p = jnp.pad(w.T, ((0, kp - k), (0, 0))).astype(jnp.bfloat16)
    b1p = b[None, :].astype(jnp.float32)
    return w1p, b1p


def _prep_fc2(w, b):
    n_out, k = w.shape
    npad = _round_up(n_out, 128)
    w2p = jnp.pad(w.T, ((0, 0), (0, npad - n_out))).astype(jnp.bfloat16)
    b2p = jnp.pad(b[None, :], ((0, 0), (0, npad - n_out))).astype(jnp.float32)
    return w2p, b2p


def prepare_cnn(p):
    cw1, cb1 = _prep_conv(p["w1"], p["b1"], p["g1"], p["be1"], p["m1"], p["v1"])
    cw2, cb2 = _prep_conv(p["w2"], p["b2"], p["g2"], p["be2"], p["m2"], p["v2"])
    cw3, cb3 = _prep_conv(p["w3"], p["b3"], p["g3"], p["be3"], p["m3"], p["v3"])
    fw1, fb1 = _prep_fc1_nhwc(p["fw1"], p["fb1"])
    fw2, fb2 = _prep_fc2(p["fw2"], p["fb2"])
    return dict(cw1=cw1, cb1=cb1, cw2=cw2, cb2=cb2, cw3=cw3, cb3=cb3,
                fw1=fw1, fb1=fb1, fw2=fw2, fb2=fb2)


def prepare_marionet(params):
    return {"online": prepare_cnn(params["online"]),
            "target": prepare_cnn(params["target"])}


# ----------------------------------------------------------------------------
# Parameter init (deterministic, PyTorch layouts) and forward
# ----------------------------------------------------------------------------
def init_cnn_params(key, c, output_dim):
    ks = jax.random.split(key, 22)

    def u(k, shape, s=0.05):
        return jax.random.uniform(k, shape, jnp.float32, -1.0, 1.0) * s

    p = {}
    # conv1: Conv2d(c, 32, k=8, s=4) + BN(32)
    p["w1"], p["b1"] = u(ks[0], (32, c, 8, 8)), u(ks[1], (32,))
    p["g1"], p["be1"] = 1.0 + u(ks[2], (32,), 0.1), u(ks[3], (32,), 0.1)
    p["m1"], p["v1"] = u(ks[4], (32,), 0.1), 1.0 + jnp.abs(u(ks[5], (32,), 0.1))
    # conv2: Conv2d(32, 64, k=4, s=2) + BN(64)
    p["w2"], p["b2"] = u(ks[6], (64, 32, 4, 4)), u(ks[7], (64,))
    p["g2"], p["be2"] = 1.0 + u(ks[8], (64,), 0.1), u(ks[9], (64,), 0.1)
    p["m2"], p["v2"] = u(ks[10], (64,), 0.1), 1.0 + jnp.abs(u(ks[11], (64,), 0.1))
    # conv3: Conv2d(64, 64, k=3, s=1) + BN(64)
    p["w3"], p["b3"] = u(ks[12], (64, 64, 3, 3)), u(ks[13], (64,))
    p["g3"], p["be3"] = 1.0 + u(ks[14], (64,), 0.1), u(ks[15], (64,), 0.1)
    p["m3"], p["v3"] = u(ks[16], (64,), 0.1), 1.0 + jnp.abs(u(ks[17], (64,), 0.1))
    # fc1: Linear(3136, 512), fc2: Linear(512, output_dim)
    p["fw1"], p["fb1"] = u(ks[18], (512, 3136), 0.02), u(ks[19], (512,), 0.02)
    p["fw2"], p["fb2"] = u(ks[20], (output_dim, 512), 0.02), u(ks[21], (output_dim,), 0.02)
    return p


def init_marionet(key, input_dim, output_dim):
    c, h, w = input_dim
    if h != 84:
        raise ValueError(f"Expecting input height: 84, got: {h}")
    if w != 84:
        raise ValueError(f"Expecting input width: 84, got: {w}")
    online = init_cnn_params(key, c, output_dim)
    target = dict(online)  # target.load_state_dict(online.state_dict())
    return {"online": online, "target": target}


def marionet_forward(prepared, x_nchw, model="online", output_dim=5):
    """x_nchw: (N, C, 84, 84) float32 -> (N, output_dim) float32."""
    p = prepared[model]
    x = jnp.transpose(x_nchw, (0, 2, 3, 1)).astype(jnp.bfloat16)  # NHWC, once
    x = conv_block(x, p["cw1"], p["cb1"], oc=32, k=8, stride=4)   # (N,20,20,32)
    x = conv_block(x, p["cw2"], p["cb2"], oc=64, k=4, stride=2)   # (N, 9, 9,64)
    x = conv_block(x, p["cw3"], p["cb3"], oc=64, k=3, stride=1)   # (N, 7, 7,64)
    n = x.shape[0]
    x = x.reshape(n, -1)           # NHWC flatten; fc1 columns pre-permuted
    out = fused_fc_head(x, p["fw1"], p["fb1"], p["fw2"], p["fb2"])
    return out[:n, :output_dim]


# ----------------------------------------------------------------------------
if __name__ == "__main__":
    key = jax.random.PRNGKey(0)
    k_param, k_input = jax.random.split(key)

    batch, channels, output_dim = 2, 4, 5          # (4, 84, 84) frame stack
    params = init_marionet(k_param, (channels, 84, 84), output_dim)
    prepared = prepare_marionet(params)            # one-time weight prep/fold
    x = jax.random.normal(k_input, (batch, channels, 84, 84), jnp.float32)

    fwd = jax.jit(marionet_forward, static_argnames=("model", "output_dim"))
    out_online = fwd(prepared, x, model="online", output_dim=output_dim)
    out_target = fwd(prepared, x, model="target", output_dim=output_dim)
    jax.block_until_ready((out_online, out_target))

    assert out_online.shape == (batch, output_dim)
    assert out_target.shape == (batch, output_dim)
    assert out_online.dtype == jnp.float32
    print("KERNEL_OK")
</pallas_src>

<mosaic_0001>
module attributes {stable_mosaic.version = 11 : i64} {
  func.func @_mm_bias_act_kernel(%arg0: i32, %arg1: i32, %arg2: memref<160x256xbf16, #tpu.memory_space<vmem>>, %arg3: memref<256x128xbf16, #tpu.memory_space<vmem>>, %arg4: memref<1x128xf32, #tpu.memory_space<vmem>>, %arg5: memref<160x128xbf16, #tpu.memory_space<vmem>>) attributes {dimension_semantics = [#tpu.dimension_semantics<parallel>, #tpu.dimension_semantics<parallel>], iteration_bounds = array<i64: 5, 1>, scalar_prefetch = 0 : i64, scratch_operands = 0 : i64, tpu.core_type = #tpu.core_type<tc>, window_params = [{transform_indices = @transform_0, window_bounds = array<i64: 160, 256>}, {transform_indices = @transform_1, window_bounds = array<i64: 256, 128>}, {transform_indices = @transform_2, window_bounds = array<i64: 1, 128>}, {transform_indices = @transform_3, window_bounds = array<i64: 160, 128>}]} {
    %c0 = arith.constant 0 : index
    %c0_0 = arith.constant 0 : index
    %0 = vector.load %arg2[%c0, %c0_0] : memref<160x256xbf16, #tpu.memory_space<vmem>>, vector<160x256xbf16>
    %c0_1 = arith.constant 0 : index
    %c0_2 = arith.constant 0 : index
    %1 = vector.load %arg3[%c0_1, %c0_2] : memref<256x128xbf16, #tpu.memory_space<vmem>>, vector<256x128xbf16>
    %cst = arith.constant dense<0.000000e+00> : vector<160x128xf32>
    %2 = tpu.matmul %0, %1, %cst {dimension_numbers = #tpu.dot_dimension_numbers<[1], [0], [0], [1], [0, 0, 1, 1], [], []>} : vector<160x256xbf16>, vector<256x128xbf16>, vector<160x128xf32> -> vector<160x128xf32>
    %c0_3 = arith.constant 0 : index
    %c0_4 = arith.constant 0 : index
    %3 = vector.load %arg4[%c0_3, %c0_4] : memref<1x128xf32, #tpu.memory_space<vmem>>, vector<1x128xf32>
    %4 = vector.broadcast %3 : vector<1x128xf32> to vector<160x128xf32>
    %5 = arith.addf %2, %4 : vector<160x128xf32>
    %cst_5 = arith.constant 0.000000e+00 : f32
    %6 = vector.broadcast %cst_5 : f32 to vector<160x128xf32>
    %7 = arith.maximumf %5, %6 : vector<160x128xf32>
    %8 = arith.truncf %7 : vector<160x128xf32> to vector<160x128xbf16>
    %c0_6 = arith.constant 0 : index
    %c0_7 = arith.constant 0 : index
    %9 = vector.load %arg5[%c0_6, %c0_7] : memref<160x128xbf16, #tpu.memory_space<vmem>>, vector<160x128xbf16>
    tpu.vector_store %arg5[%c0_6, %c0_7], %8 {strides = array<i32>} : memref<160x128xbf16, #tpu.memory_space<vmem>>, vector<160x128xbf16>,
    return
  }
  func.func @transform_0(%arg0: i32, %arg1: i32) -> (i32, i32) {
    %c0_i32 = arith.constant 0 : i32
    %c0_i32_0 = arith.constant 0 : i32
    return %arg0, %c0_i32 : i32, i32
  }
  func.func @transform_1(%arg0: i32, %arg1: i32) -> (i32, i32) {
    %c0_i32 = arith.constant 0 : i32
    %c0_i32_0 = arith.constant 0 : i32
    return %c0_i32, %arg1 : i32, i32
  }
  func.func @transform_2(%arg0: i32, %arg1: i32) -> (i32, i32) {
    %c0_i32 = arith.constant 0 : i32
    %c0_i32_0 = arith.constant 0 : i32
    return %c0_i32, %arg1 : i32, i32
  }
  func.func @transform_3(%arg0: i32, %arg1: i32) -> (i32, i32) {
    %c0_i32 = arith.constant 0 : i32
    return %arg0, %arg1 : i32, i32
  }
}

module attributes {stable_mosaic.version = 11 : i64} {
  func.func @_mm_bias_act_kernel(%arg0: i32, %arg1: i32, %arg2: memref<176x512xbf16, #tpu.memory_space<vmem>>, %arg3: memref<512x128xbf16, #tpu.memory_space<vmem>>, %arg4: memref<1x128xf32, #tpu.memory_space<vmem>>, %arg5: memref<176x128xbf16, #tpu.memory_space<vmem>>) attributes {dimension_semantics = [#tpu.dimension_semantics<parallel>, #tpu.dimension_semantics<parallel>], iteration_bounds = array<i64: 1, 1>, scalar_prefetch = 0 : i64, scratch_operands = 0 : i64, tpu.core_type = #tpu.core_type<tc>, window_params = [{transform_indices = @transform_0, window_bounds = array<i64: 176, 512>}, {transform_indices = @transform_1, window_bounds = array<i64: 512, 128>}, {transform_indices = @transform_2, window_bounds = array<i64: 1, 128>}, {transform_indices = @transform_3, window_bounds = array<i64: 176, 128>}]} {
    %c0 = arith.constant 0 : index
    %c0_0 = arith.constant 0 : index
    %0 = vector.load %arg2[%c0, %c0_0] : memref<176x512xbf16, #tpu.memory_space<vmem>>, vector<176x512xbf16>
    %c0_1 = arith.constant 0 : index
    %c0_2 = arith.constant 0 : index
    %1 = vector.load %arg3[%c0_1, %c0_2] : memref<512x128xbf16, #tpu.memory_space<vmem>>, vector<512x128xbf16>
    %cst = arith.constant dense<0.000000e+00> : vector<176x128xf32>
    %2 = tpu.matmul %0, %1, %cst {dimension_numbers = #tpu.dot_dimension_numbers<[1], [0], [0], [1], [0, 0, 1, 1], [], []>} : vector<176x512xbf16>, vector<512x128xbf16>, vector<176x128xf32> -> vector<176x128xf32>
    %c0_3 = arith.constant 0 : index
    %c0_4 = arith.constant 0 : index
    %3 = vector.load %arg4[%c0_3, %c0_4] : memref<1x128xf32, #tpu.memory_space<vmem>>, vector<1x128xf32>
    %4 = vector.broadcast %3 : vector<1x128xf32> to vector<176x128xf32>
    %5 = arith.addf %2, %4 : vector<176x128xf32>
    %cst_5 = arith.constant 0.000000e+00 : f32
    %6 = vector.broadcast %cst_5 : f32 to vector<176x128xf32>
    %7 = arith.maximumf %5, %6 : vector<176x128xf32>
    %8 = arith.truncf %7 : vector<176x128xf32> to vector<176x128xbf16>
    %c0_6 = arith.constant 0 : index
    %c0_7 = arith.constant 0 : index
    %9 = vector.load %arg5[%c0_6, %c0_7] : memref<176x128xbf16, #tpu.memory_space<vmem>>, vector<176x128xbf16>
    tpu.vector_store %arg5[%c0_6, %c0_7], %8 {strides = array<i32>} : memref<176x128xbf16, #tpu.memory_space<vmem>>, vector<176x128xbf16>,
    return
  }
  func.func @transform_0(%arg0: i32, %arg1: i32) -> (i32, i32) {
    %c0_i32 = arith.constant 0 : i32
    %c0_i32_0 = arith.constant 0 : i32
    return %arg0, %c0_i32 : i32, i32
  }
  func.func @transform_1(%arg0: i32, %arg1: i32) -> (i32, i32) {
    %c0_i32 = arith.constant 0 : i32
    %c0_i32_0 = arith.constant 0 : i32
    return %c0_i32, %arg1 : i32, i32
  }
  func.func @transform_2(%arg0: i32, %arg1: i32) -> (i32, i32) {
    %c0_i32 = arith.constant 0 : i32
    %c0_i32_0 = arith.constant 0 : i32
    return %c0_i32, %arg1 : i32, i32
  }
  func.func @transform_3(%arg0: i32, %arg1: i32) -> (i32, i32) {
    %c0_i32 = arith.constant 0 : i32
    return %arg0, %arg1 : i32, i32
  }
}

module attributes {stable_mosaic.version = 11 : i64} {
  func.func @_mm_bias_act_kernel(%arg0: i32, %arg1: i32, %arg2: memref<112x640xbf16, #tpu.memory_space<vmem>>, %arg3: memref<640x128xbf16, #tpu.memory_space<vmem>>, %arg4: memref<1x128xf32, #tpu.memory_space<vmem>>, %arg5: memref<112x128xbf16, #tpu.memory_space<vmem>>) attributes {dimension_semantics = [#tpu.dimension_semantics<parallel>, #tpu.dimension_semantics<parallel>], iteration_bounds = array<i64: 1, 1>, scalar_prefetch = 0 : i64, scratch_operands = 0 : i64, tpu.core_type = #tpu.core_type<tc>, window_params = [{transform_indices = @transform_0, window_bounds = array<i64: 112, 640>}, {transform_indices = @transform_1, window_bounds = array<i64: 640, 128>}, {transform_indices = @transform_2, window_bounds = array<i64: 1, 128>}, {transform_indices = @transform_3, window_bounds = array<i64: 112, 128>}]} {
    %c0 = arith.constant 0 : index
    %c0_0 = arith.constant 0 : index
    %0 = vector.load %arg2[%c0, %c0_0] : memref<112x640xbf16, #tpu.memory_space<vmem>>, vector<112x640xbf16>
    %c0_1 = arith.constant 0 : index
    %c0_2 = arith.constant 0 : index
    %1 = vector.load %arg3[%c0_1, %c0_2] : memref<640x128xbf16, #tpu.memory_space<vmem>>, vector<640x128xbf16>
    %cst = arith.constant dense<0.000000e+00> : vector<112x128xf32>
    %2 = tpu.matmul %0, %1, %cst {dimension_numbers = #tpu.dot_dimension_numbers<[1], [0], [0], [1], [0, 0, 1, 1], [], []>} : vector<112x640xbf16>, vector<640x128xbf16>, vector<112x128xf32> -> vector<112x128xf32>
    %c0_3 = arith.constant 0 : index
    %c0_4 = arith.constant 0 : index
    %3 = vector.load %arg4[%c0_3, %c0_4] : memref<1x128xf32, #tpu.memory_space<vmem>>, vector<1x128xf32>
    %4 = vector.broadcast %3 : vector<1x128xf32> to vector<112x128xf32>
    %5 = arith.addf %2, %4 : vector<112x128xf32>
    %cst_5 = arith.constant 0.000000e+00 : f32
    %6 = vector.broadcast %cst_5 : f32 to vector<112x128xf32>
    %7 = arith.maximumf %5, %6 : vector<112x128xf32>
    %8 = arith.truncf %7 : vector<112x128xf32> to vector<112x128xbf16>
    %c0_6 = arith.constant 0 : index
    %c0_7 = arith.constant 0 : index
    %9 = vector.load %arg5[%c0_6, %c0_7] : memref<112x128xbf16, #tpu.memory_space<vmem>>, vector<112x128xbf16>
    tpu.vector_store %arg5[%c0_6, %c0_7], %8 {strides = array<i32>} : memref<112x128xbf16, #tpu.memory_space<vmem>>, vector<112x128xbf16>,
    return
  }
  func.func @transform_0(%arg0: i32, %arg1: i32) -> (i32, i32) {
    %c0_i32 = arith.constant 0 : i32
    %c0_i32_0 = arith.constant 0 : i32
    return %arg0, %c0_i32 : i32, i32
  }
  func.func @transform_1(%arg0: i32, %arg1: i32) -> (i32, i32) {
    %c0_i32 = arith.constant 0 : i32
    %c0_i32_0 = arith.constant 0 : i32
    return %c0_i32, %arg1 : i32, i32
  }
  func.func @transform_2(%arg0: i32, %arg1: i32) -> (i32, i32) {
    %c0_i32 = arith.constant 0 : i32
    %c0_i32_0 = arith.constant 0 : i32
    return %c0_i32, %arg1 : i32, i32
  }
  func.func @transform_3(%arg0: i32, %arg1: i32) -> (i32, i32) {
    %c0_i32 = arith.constant 0 : i32
    return %arg0, %arg1 : i32, i32
  }
}

module attributes {stable_mosaic.version = 11 : i64} {
  func.func @_fc_head_kernel(%arg0: i32, %arg1: memref<16x3200xbf16, #tpu.memory_space<vmem>>, %arg2: memref<3200x512xbf16, #tpu.memory_space<vmem>>, %arg3: memref<1x512xf32, #tpu.memory_space<vmem>>, %arg4: memref<512x128xbf16, #tpu.memory_space<vmem>>, %arg5: memref<1x128xf32, #tpu.memory_space<vmem>>, %arg6: memref<16x128xf32, #tpu.memory_space<vmem>>) attributes {dimension_semantics = [#tpu.dimension_semantics<arbitrary>], iteration_bounds = array<i64: 1>, scalar_prefetch = 0 : i64, scratch_operands = 0 : i64, tpu.core_type = #tpu.core_type<tc>, window_params = [{pipeline_mode = #tpu.pipeline_mode<synchronous>, transform_indices = @transform_0, window_bounds = array<i64: 16, 3200>}, {pipeline_mode = #tpu.pipeline_mode<synchronous>, transform_indices = @transform_1, window_bounds = array<i64: 3200, 512>}, {pipeline_mode = #tpu.pipeline_mode<synchronous>, transform_indices = @transform_2, window_bounds = array<i64: 1, 512>}, {pipeline_mode = #tpu.pipeline_mode<synchronous>, transform_indices = @transform_3, window_bounds = array<i64: 512, 128>}, {pipeline_mode = #tpu.pipeline_mode<synchronous>, transform_indices = @transform_4, window_bounds = array<i64: 1, 128>}, {pipeline_mode = #tpu.pipeline_mode<synchronous>, transform_indices = @transform_5, window_bounds = array<i64: 16, 128>}]} {
    %c0 = arith.constant 0 : index
    %c0_0 = arith.constant 0 : index
    %0 = vector.load %arg1[%c0, %c0_0] : memref<16x3200xbf16, #tpu.memory_space<vmem>>, vector<16x3200xbf16>
    %c0_1 = arith.constant 0 : index
    %c0_2 = arith.constant 0 : index
    %1 = vector.load %arg2[%c0_1, %c0_2] : memref<3200x512xbf16, #tpu.memory_space<vmem>>, vector<3200x512xbf16>
    %cst = arith.constant dense<0.000000e+00> : vector<16x512xf32>
    %2 = tpu.matmul %0, %1, %cst {dimension_numbers = #tpu.dot_dimension_numbers<[1], [0], [0], [1], [0, 0, 1, 1], [], []>} : vector<16x3200xbf16>, vector<3200x512xbf16>, vector<16x512xf32> -> vector<16x512xf32>
    %c0_3 = arith.constant 0 : index
    %c0_4 = arith.constant 0 : index
    %3 = vector.load %arg3[%c0_3, %c0_4] : memref<1x512xf32, #tpu.memory_space<vmem>>, vector<1x512xf32>
    %4 = vector.broadcast %3 : vector<1x512xf32> to vector<16x512xf32>
    %5 = arith.addf %2, %4 : vector<16x512xf32>
    %cst_5 = arith.constant 0.000000e+00 : f32
    %6 = vector.broadcast %cst_5 : f32 to vector<16x512xf32>
    %7 = arith.maximumf %5, %6 : vector<16x512xf32>
    %8 = arith.truncf %7 : vector<16x512xf32> to vector<16x512xbf16>
    %c0_6 = arith.constant 0 : index
    %c0_7 = arith.constant 0 : index
    %9 = vector.load %arg4[%c0_6, %c0_7] : memref<512x128xbf16, #tpu.memory_space<vmem>>, vector<512x128xbf16>
    %cst_8 = arith.constant dense<0.000000e+00> : vector<16x128xf32>
    %10 = tpu.matmul %8, %9, %cst_8 {dimension_numbers = #tpu.dot_dimension_numbers<[1], [0], [0], [1], [0, 0, 1, 1], [], []>} : vector<16x512xbf16>, vector<512x128xbf16>, vector<16x128xf32> -> vector<16x128xf32>
    %c0_9 = arith.constant 0 : index
    %c0_10 = arith.constant 0 : index
    %11 = vector.load %arg5[%c0_9, %c0_10] : memref<1x128xf32, #tpu.memory_space<vmem>>, vector<1x128xf32>
    %12 = vector.broadcast %11 : vector<1x128xf32> to vector<16x128xf32>
    %13 = arith.addf %10, %12 : vector<16x128xf32>
    %c0_11 = arith.constant 0 : index
    %c0_12 = arith.constant 0 : index
    %14 = vector.load %arg6[%c0_11, %c0_12] : memref<16x128xf32, #tpu.memory_space<vmem>>, vector<16x128xf32>
    tpu.vector_store %arg6[%c0_11, %c0_12], %13 {strides = array<i32>} : memref<16x128xf32, #tpu.memory_space<vmem>>, vector<16x128xf32>,
    return
  }
  func.func @transform_0(%arg0: i32) -> (i32, i32) {
    %c0_i32 = arith.constant 0 : i32
    %c0_i32_0 = arith.constant 0 : i32
    %c0_i32_1 = arith.constant 0 : i32
    return %c0_i32, %c0_i32_0 : i32, i32
  }
  func.func @transform_1(%arg0: i32) -> (i32, i32) {
    %c0_i32 = arith.constant 0 : i32
    %c0_i32_0 = arith.constant 0 : i32
    %c0_i32_1 = arith.constant 0 : i32
    return %c0_i32, %c0_i32_0 : i32, i32
  }
  func.func @transform_2(%arg0: i32) -> (i32, i32) {
    %c0_i32 = arith.constant 0 : i32
    %c0_i32_0 = arith.constant 0 : i32
    %c0_i32_1 = arith.constant 0 : i32
    return %c0_i32, %c0_i32_0 : i32, i32
  }
  func.func @transform_3(%arg0: i32) -> (i32, i32) {
    %c0_i32 = arith.constant 0 : i32
    %c0_i32_0 = arith.constant 0 : i32
    %c0_i32_1 = arith.constant 0 : i32
    return %c0_i32, %c0_i32_0 : i32, i32
  }
  func.func @transform_4(%arg0: i32) -> (i32, i32) {
    %c0_i32 = arith.constant 0 : i32
    %c0_i32_0 = arith.constant 0 : i32
    %c0_i32_1 = arith.constant 0 : i32
    return %c0_i32, %c0_i32_0 : i32, i32
  }
  func.func @transform_5(%arg0: i32) -> (i32, i32) {
    %c0_i32 = arith.constant 0 : i32
    %c0_i32_0 = arith.constant 0 : i32
    %c0_i32_1 = arith.constant 0 : i32
    return %c0_i32, %c0_i32_0 : i32, i32
  }
}

</mosaic_0001>

<bundles_post_ra>
// kernel: marionet_forward.4
= control target key start
LH: loop header
LB: loop body
LE: loop exit
PB: predicated region body
PF: predicated region fallthrough
CT: control target
= control target key end

     0   :  { %s1174_s12 = smov 0   ;;  %s1176_s13 = smov 0   ;;  %s1318_s0 = inlined_call_operand.vmem [shape: bf16[800,256], index: 0, kind: input, shape index: {}]   ;;  %s1319_s1 = inlined_call_operand.vmem [shape: bf16[256,128], index: 1, kind: input, shape index: {}]   ;;  %s1320_s2 = inlined_call_operand.vmem [shape: f32[1,128], index: 2, kind: input, shape index: {}]   ;;  %s1321_s3 = inlined_call_operand.vmem [shape: bf16[800,128], index: 3, kind: output, shape index: {}]  }
   0x1   :  { %s1178_s14 = smov 0  }
   0x2 LB: > { %s25_s15 = sadd.s32 1, %s1148_s13  ;;  %p825_p0 = scmp.ge.s32.totalorder %s1152_s14, 1  ;;  %s1152_s14 = sphi %s1178_s14, %s13_s14   ;;  %s1148_s13 = sphi %s1176_s13, %s1323_s13   ;;  %s1144_s12 = sphi %s1174_s12, %s1322_s12  }
   0x3   : > { %p27_p1 = scmp.ge.s32.totalorder %s25_s15, 5  ;;  %p170_p2 = scmp.lt.s32.totalorder %s1152_s14, 6 }
   0x5   : > { %s1325_s15 = smov (%p27_p1, %s25_s15), 0  ;;  %p171_p3 = pnand %p825_p0, %p170_p2 }
   0x6   : > { %v1084_v0 = vld [vmem:[%s1319_s1 + $0x40] sm:$0xff] (!%p171_p3)   ;;  %s205_s18 = smul.u32 (!%p171_p3), 20, %s1144_s12  ;;  %v1086_v2 = vld [vmem:[%s1319_s1 + $0x48] sm:$0xff] (!%p171_p3)   ;;  %v1088_v4 = vld [vmem:[%s1319_s1 + $0x50] sm:$0xff] (!%p171_p3)  }
   0x7   : > { %174 = sbr.rel (%p171_p3) target bundleno = 295 (0x127), region = 32  ;;  %v1085_v1 = vld [vmem:[%s1319_s1] sm:$0xff] (!%p171_p3)   ;;  %968 = vmatprep.subr.bf16.mxu0 (!%p171_p3), %v1084_v0  ;;  %1044 = vmatprep.subr.bf16.mxu1 (!%p171_p3), %v1084_v0  ;;  %v1087_v3 = vld [vmem:[%s1319_s1 + $0x8] sm:$0xff] (!%p171_p3)   ;;  %v1089_v5 = vld [vmem:[%s1319_s1 + $0x10] sm:$0xff] (!%p171_p3)  }
   0x8   : > { %969 = vmatpush3.bf16.msra.mxu0 (!%p171_p3), %v1085_v1  ;;  %1052 = vmatpush3.bf16.msra.mxu1 (!%p171_p3), %v1085_v1  ;;  %p206_p4 = scmp.lt.s32.totalorder (!%p171_p3), %s205_s18, 99  ;;  %v1090_v6 = vld [vmem:[%s1319_s1 + $0x58] sm:$0xff] (!%p171_p3)   ;;  %v1092_v8 = vld [vmem:[%s1319_s1 + $0x60] sm:$0xff] (!%p171_p3)   ;;  %v1094_v10 = vld [vmem:[%s1319_s1 + $0x68] sm:$0xff] (!%p171_p3)  }
   0x9   : > { %970 = vmatprep.subr.bf16.mxu0 (!%p171_p3), %v1086_v2  ;;  %1045 = vmatprep.subr.bf16.mxu1 (!%p171_p3), %v1086_v2  ;;  %v1091_v7 = vld [vmem:[%s1319_s1 + $0x18] sm:$0xff] (!%p171_p3)   ;;  %v1093_v9 = vld [vmem:[%s1319_s1 + $0x20] sm:$0xff] (!%p171_p3)   ;;  %v1095_v13 = vld [vmem:[%s1319_s1 + $0x28] sm:$0xff] (!%p171_p3)  }
   0xa   : > { %v1096_v14 = vld [vmem:[%s1319_s1 + $0x70] sm:$0xff] (!%p171_p3)   ;;  %v1098_v16 = vld [vmem:[%s1319_s1 + $0x78] sm:$0xff] (!%p171_p3)   ;;  %v1271_v38 = vld [vmem:[%s1320_s2] ss:$0 sm:$0xff] (!%p171_p3) }
   0xb   : > { %v1097_v15 = vld [vmem:[%s1319_s1 + $0x30] sm:$0xff] (!%p171_p3)   ;;  %v1099_v17 = vld [vmem:[%s1319_s1 + $0x38] sm:$0xff] (!%p171_p3)  }
   0xc   : > { %971 = vmatpush3.bf16.msra.mxu0 (!%p171_p3), %v1087_v3  ;;  %1053 = vmatpush3.bf16.msra.mxu1 (!%p171_p3), %v1087_v3 }
   0xd   : > { %972 = vmatprep.subr.bf16.mxu0 (!%p171_p3), %v1088_v4  ;;  %1046 = vmatprep.subr.bf16.mxu1 (!%p171_p3), %v1088_v4 }
   0xe   : > { %s1327_s18 = smov (!%p206_p4, %s205_s18), 99 }
   0xf   : > { %s888_s6 = sshll.u32 %s1327_s18, 3  ;;  %s828_s5 = sshll.u32 %s1327_s18, 2 }
  0x10   : > { %973 = vmatpush3.bf16.msra.mxu0 %v1089_v5  ;;  %1054 = vmatpush3.bf16.msra.mxu1 %v1089_v5  ;;  %s1225_s11 = scalar_lea.vmem %s1318_s0, %s888_s6  ;;  %s1281_s8 = scalar_lea.vmem %s1321_s3, %s828_s5 }
  0x11   : > { %974 = vmatprep.subr.bf16.mxu0 %v1090_v6  ;;  %1047 = vmatprep.subr.bf16.mxu1 %v1090_v6  ;;  %v1102_v11 = vld [vmem:[%s1225_s11 + $0x4] ss:$8 sps:$4 sm:$0xff]   ;;  %v1105_v12 = vld [vmem:[%s1225_s11 + $0x54] ss:$8 sps:$4 sm:$0xff]   ;;  %v1100_v18 = vld [vmem:[%s1225_s11] ss:$8 sps:$4 sm:$0xff]  }
  0x12   : > { %516 = vmatprep.mubr.bf16.mxu0 %v1102_v11  ;;  %556 = vmatprep.mubr.bf16.mxu1 %v1105_v12  ;;  %v1103_v19 = vld [vmem:[%s1225_s11 + $0x50] ss:$8 sps:$4 sm:$0xff]   ;;  %v1106_v20 = vld [vmem:[%s1225_s11 + $0x14] ss:$8 sps:$4 sm:$0xff]   ;;  %v1108_v21 = vld [vmem:[%s1225_s11 + $0x64] ss:$8 sps:$4 sm:$0xff]  }
  0x13   : > { %v1110_v22 = vld [vmem:[%s1225_s11 + $0x10] ss:$8 sps:$4 sm:$0xff]   ;;  %v1111_v23 = vld [vmem:[%s1225_s11 + $0x60] ss:$8 sps:$4 sm:$0xff]   ;;  %v1112_v24 = vld [vmem:[%s1225_s11 + $0x24] ss:$8 sps:$4 sm:$0xff]  }
  0x14   : > { %975 = vmatpush3.bf16.msra.mxu0 %v1091_v7  ;;  %1055 = vmatpush3.bf16.msra.mxu1 %v1091_v7  ;;  %v1114_v25 = vld [vmem:[%s1225_s11 + $0x74] ss:$8 sps:$4 sm:$0xff]   ;;  %v1116_v26 = vld [vmem:[%s1225_s11 + $0x20] ss:$8 sps:$4 sm:$0xff]   ;;  %v1117_v27 = vld [vmem:[%s1225_s11 + $0x70] ss:$8 sps:$4 sm:$0xff]  }
  0x15   : > { %976 = vmatprep.subr.bf16.mxu0 %v1092_v8  ;;  %1048 = vmatprep.subr.bf16.mxu1 %v1092_v8  ;;  %v1118_v28 = vld [vmem:[%s1225_s11 + $0x34] ss:$8 sps:$4 sm:$0xff]   ;;  %v1120_v29 = vld [vmem:[%s1225_s11 + $0x84] ss:$8 sps:$4 sm:$0xff]   ;;  %v1122_v30 = vld [vmem:[%s1225_s11 + $0x30] ss:$8 sps:$4 sm:$0xff]  }
  0x16   : > { %v1123_v31 = vld [vmem:[%s1225_s11 + $0x80] ss:$8 sps:$4 sm:$0xff]   ;;  %v1124_v32 = vld [vmem:[%s1225_s11 + $0x44] ss:$8 sps:$4 sm:$0xff]   ;;  %v1126_v33 = vld [vmem:[%s1225_s11 + $0x94] ss:$8 sps:$4 sm:$0xff]  }
  0x17   : > { %v1128_v34 = vld [vmem:[%s1225_s11 + $0x40] ss:$8 sps:$4 sm:$0xff]   ;;  %v1129_v35 = vld [vmem:[%s1225_s11 + $0x90] ss:$8 sps:$4 sm:$0xff]  }
  0x18   : > { %977 = vmatpush3.bf16.msra.mxu0 %v1093_v9  ;;  %1056 = vmatpush3.bf16.msra.mxu1 %v1093_v9 }
  0x19   : > { %978 = vmatprep.subr.bf16.mxu0 %v1094_v10  ;;  %1049 = vmatprep.subr.bf16.mxu1 %v1094_v10 }
  0x1c   : > { %979 = vmatpush3.bf16.msra.mxu0 %v1095_v13  ;;  %1057 = vmatpush3.bf16.msra.mxu1 %v1095_v13 }
  0x1d   : > { %980 = vmatprep.subr.bf16.mxu0 %v1096_v14  ;;  %1050 = vmatprep.subr.bf16.mxu1 %v1096_v14 }
  0x20   : > { %981 = vmatpush3.bf16.msra.mxu0 %v1097_v15  ;;  %1058 = vmatpush3.bf16.msra.mxu1 %v1097_v15 }
  0x21   : > { %982 = vmatprep.subr.bf16.mxu0 %v1098_v16  ;;  %1051 = vmatprep.subr.bf16.mxu1 %v1098_v16 }
  0x24   : > { %983 = vmatpush3.bf16.msra.mxu0 %v1099_v17  ;;  %1059 = vmatpush3.bf16.msra.mxu1 %v1099_v17 }
  0x27   : > { %517 = vmatmul.mubr.bf16.vlgmr.msra.gmra.mrb[0].mxu0 %v1100_v18  ;;  %557 = vmatmul.mubr.bf16.vlgmr.msra.gmra.mrb[0].mxu1 %v1103_v19 }
  0x28   : > { %524 = vmatprep.mubr.bf16.mxu0 %v1106_v20  ;;  %564 = vmatprep.mubr.bf16.mxu1 %v1108_v21 }
  0x2f   : > { %525 = vmatmul.mubr.bf16.gmra.mrb[4].mxu0 %v1110_v22  ;;  %565 = vmatmul.mubr.bf16.gmra.mrb[4].mxu1 %v1111_v23 }
  0x30   : > { %532 = vmatprep.mubr.bf16.mxu0 %v1112_v24  ;;  %572 = vmatprep.mubr.bf16.mxu1 %v1114_v25 }
  0x37   : > { %533 = vmatmul.mubr.bf16.gmra.mrb[8].mxu0 %v1116_v26  ;;  %573 = vmatmul.mubr.bf16.gmra.mrb[8].mxu1 %v1117_v27 }
  0x38   : > { %540 = vmatprep.mubr.bf16.mxu0 %v1118_v28  ;;  %580 = vmatprep.mubr.bf16.mxu1 %v1120_v29 }
  0x3f   : > { %541 = vmatmul.mubr.bf16.gmra.mrb[12].mxu0 %v1122_v30  ;;  %581 = vmatmul.mubr.bf16.gmra.mrb[12].mxu1 %v1123_v31 }
  0x40   : > { %548 = vmatprep.mubr.bf16.mxu0 %v1124_v32  ;;  %588 = vmatprep.mubr.bf16.mxu1 %v1126_v33 }
  0x47   : > { %549 = vmatmul.mubr.bf16.gmra.mrb[16].mxu0 %v1128_v34  ;;  %589 = vmatmul.mubr.bf16.gmra.mrb[16].mxu1 %v1129_v35 }
  0xfa   : > { %v984_v36 = vpop.f32.mrb[0].mxu0  ;;  %v1014_v37 = vpop.f32.mrb[0].mxu1 }
  0xfb   : > { %v985_v39 = vpop.f32.mrb[1].mxu0  ;;  %v1015_v40 = vpop.f32.mrb[1].mxu1 }
  0xfc   : > { %v986_v41 = vadd.f32 %v985_v39, %v984_v36  ;;  %v1016_v42 = vadd.f32 %v1015_v40, %v1014_v37  ;;  %v987_v43 = vpop.f32.mrb[2].mxu0  ;;  %v1017_v44 = vpop.f32.mrb[2].mxu1 }
  0xfd   : > { %v988_v45 = vpop.f32.mrb[3].mxu0  ;;  %v1018_v46 = vpop.f32.mrb[3].mxu1 }
  0xfe   : > { %v519_v47 = vadd.f32 %v986_v41, %v1271_v38  ;;  %v559_v48 = vadd.f32 %v1016_v42, %v1271_v38  ;;  %v989_v49 = vadd.f32 %v988_v45, %v987_v43  ;;  %v1019_v50 = vadd.f32 %v1018_v46, %v1017_v44 }
 0x100   : > { %v522_v51 = vadd.f32 %v989_v49, %v1271_v38  ;;  %v562_v52 = vadd.f32 %v1019_v50, %v1271_v38  ;;  %v597_v53 = vmax.f32 %v519_v47, 0.0  ;;  %v607_v54 = vmax.f32 %v559_v48, 0.0 }
 0x102   : > { %v598_v55 = vmax.f32 %v522_v51, 0.0  ;;  %v608_v56 = vmax.f32 %v562_v52, 0.0  ;;  %v990_v57 = vpop.f32.mrb[4].mxu0  ;;  %v1020_v58 = vpop.f32.mrb[4].mxu1 }
 0x103   : > { %v991_v59 = vpop.f32.mrb[5].mxu0  ;;  %v1021_v60 = vpop.f32.mrb[5].mxu1 }
 0x104   : > { %v912_v61 = vpack.c.bf16 %v598_v55, %v597_v53  ;;  %v937_v62 = vpack.c.bf16 %v608_v56, %v607_v54  ;;  %v992_v63 = vadd.f32 %v991_v59, %v990_v57  ;;  %v1022_v0 = vadd.f32 %v1021_v60, %v1020_v58  ;;  %v993_v1 = vpop.f32.mrb[6].mxu0  ;;  %v1023_v2 = vpop.f32.mrb[6].mxu1 }
 0x105   : > { %v994_v3 = vpop.f32.mrb[7].mxu0  ;;  %v1024_v4 = vpop.f32.mrb[7].mxu1 }
 0x106   : > { %913 = vst [vmem:[%s1281_s8] sm:$0xff] %v912_v61   ;;  %963 = vst [vmem:[%s1281_s8 + $0x28] sm:$0xff] %v937_v62   ;;  %v527_v5 = vadd.f32 %v992_v63, %v1271_v38  ;;  %v567_v6 = vadd.f32 %v1022_v0, %v1271_v38  ;;  %v995_v7 = vadd.f32 %v994_v3, %v993_v1 }
 0x107   : > { %v1025_v8 = vadd.f32 %v1024_v4, %v1023_v2 }
 0x108   : > { %v530_v9 = vadd.f32 %v995_v7, %v1271_v38  ;;  %v599_v11 = vmax.f32 %v527_v5, 0.0  ;;  %v609_v12 = vmax.f32 %v567_v6, 0.0 }
 0x109   : > { %v570_v10 = vadd.f32 %v1025_v8, %v1271_v38 }
 0x10a   : > { %v600_v13 = vmax.f32 %v530_v9, 0.0  ;;  %v996_v15 = vpop.f32.mrb[8].mxu0  ;;  %v1026_v16 = vpop.f32.mrb[8].mxu1 }
 0x10b   : > { %v610_v14 = vmax.f32 %v570_v10, 0.0  ;;  %v997_v17 = vpop.f32.mrb[9].mxu0  ;;  %v1027_v18 = vpop.f32.mrb[9].mxu1 }
 0x10c   : > { %v917_v19 = vpack.c.bf16 %v600_v13, %v599_v11  ;;  %v998_v21 = vadd.f32 %v997_v17, %v996_v15  ;;  %v1028_v22 = vadd.f32 %v1027_v18, %v1026_v16  ;;  %v999_v23 = vpop.f32.mrb[10].mxu0  ;;  %v1029_v24 = vpop.f32.mrb[10].mxu1 }
 0x10d   : > { %v942_v20 = vpack.c.bf16 %v610_v14, %v609_v12  ;;  %v1000_v25 = vpop.f32.mrb[11].mxu0  ;;  %v1030_v26 = vpop.f32.mrb[11].mxu1 }
 0x10e   : > { %959 = vst [vmem:[%s1281_s8 + $0x8] sm:$0xff] %v917_v19   ;;  %v535_v27 = vadd.f32 %v998_v21, %v1271_v38  ;;  %v575_v28 = vadd.f32 %v1028_v22, %v1271_v38  ;;  %v1001_v29 = vadd.f32 %v1000_v25, %v999_v23  ;;  %v1031_v30 = vadd.f32 %v1030_v26, %v1029_v24 }
 0x10f   : > { %964 = vst [vmem:[%s1281_s8 + $0x30] sm:$0xff] %v942_v20  }
 0x110   : > { %v538_v31 = vadd.f32 %v1001_v29, %v1271_v38  ;;  %v578_v32 = vadd.f32 %v1031_v30, %v1271_v38  ;;  %v601_v33 = vmax.f32 %v535_v27, 0.0  ;;  %v611_v34 = vmax.f32 %v575_v28, 0.0 }
 0x112   : > { %v602_v35 = vmax.f32 %v538_v31, 0.0  ;;  %v612_v36 = vmax.f32 %v578_v32, 0.0  ;;  %v1002_v37 = vpop.f32.mrb[12].mxu0  ;;  %v1032_v39 = vpop.f32.mrb[12].mxu1 }
 0x113   : > { %v1003_v40 = vpop.f32.mrb[13].mxu0  ;;  %v1033_v41 = vpop.f32.mrb[13].mxu1 }
 0x114   : > { %v922_v42 = vpack.c.bf16 %v602_v35, %v601_v33  ;;  %v947_v43 = vpack.c.bf16 %v612_v36, %v611_v34  ;;  %v1004_v44 = vadd.f32 %v1003_v40, %v1002_v37  ;;  %v1034_v45 = vadd.f32 %v1033_v41, %v1032_v39  ;;  %v1005_v46 = vpop.f32.mrb[14].mxu0  ;;  %v1035_v47 = vpop.f32.mrb[14].mxu1 }
 0x115   : > { %v1006_v48 = vpop.f32.mrb[15].mxu0  ;;  %v1036_v49 = vpop.f32.mrb[15].mxu1 }
 0x116   : > { %960 = vst [vmem:[%s1281_s8 + $0x10] sm:$0xff] %v922_v42   ;;  %965 = vst [vmem:[%s1281_s8 + $0x38] sm:$0xff] %v947_v43   ;;  %v543_v50 = vadd.f32 %v1004_v44, %v1271_v38  ;;  %v583_v51 = vadd.f32 %v1034_v45, %v1271_v38  ;;  %v1007_v52 = vadd.f32 %v1006_v48, %v1005_v46 }
 0x117   : > { %v1037_v53 = vadd.f32 %v1036_v49, %v1035_v47 }
 0x118   : > { %v546_v54 = vadd.f32 %v1007_v52, %v1271_v38  ;;  %v603_v56 = vmax.f32 %v543_v50, 0.0  ;;  %v613_v57 = vmax.f32 %v583_v51, 0.0 }
 0x119   : > { %v586_v55 = vadd.f32 %v1037_v53, %v1271_v38 }
 0x11a   : > { %v604_v58 = vmax.f32 %v546_v54, 0.0  ;;  %v1008_v60 = vpop.f32.mrb[16].mxu0  ;;  %v1038_v61 = vpop.f32.mrb[16].mxu1 }
 0x11b   : > { %v614_v59 = vmax.f32 %v586_v55, 0.0  ;;  %v1009_v62 = vpop.f32.mrb[17].mxu0  ;;  %v1039_v63 = vpop.f32.mrb[17].mxu1 }
 0x11c   : > { %v927_v0 = vpack.c.bf16 %v604_v58, %v603_v56  ;;  %v1010_v2 = vadd.f32 %v1009_v62, %v1008_v60  ;;  %v1040_v3 = vadd.f32 %v1039_v63, %v1038_v61  ;;  %v1011_v4 = vpop.f32.mrb[18].mxu0  ;;  %v1041_v5 = vpop.f32.mrb[18].mxu1 }
 0x11d   : > { %v952_v1 = vpack.c.bf16 %v614_v59, %v613_v57  ;;  %v1012_v6 = vpop.f32.mrb[19].mxu0  ;;  %v1042_v7 = vpop.f32.mrb[19].mxu1 }
 0x11e   : > { %961 = vst [vmem:[%s1281_s8 + $0x18] sm:$0xff] %v927_v0   ;;  %v551_v8 = vadd.f32 %v1010_v2, %v1271_v38  ;;  %v591_v9 = vadd.f32 %v1040_v3, %v1271_v38  ;;  %v1013_v10 = vadd.f32 %v1012_v6, %v1011_v4  ;;  %v1043_v11 = vadd.f32 %v1042_v7, %v1041_v5 }
 0x11f   : > { %966 = vst [vmem:[%s1281_s8 + $0x40] sm:$0xff] %v952_v1  }
 0x120   : > { %v554_v12 = vadd.f32 %v1013_v10, %v1271_v38  ;;  %v594_v13 = vadd.f32 %v1043_v11, %v1271_v38  ;;  %v605_v14 = vmax.f32 %v551_v8, 0.0  ;;  %v615_v15 = vmax.f32 %v591_v9, 0.0 }
 0x122   : > { %v606_v16 = vmax.f32 %v554_v12, 0.0  ;;  %v616_v17 = vmax.f32 %v594_v13, 0.0 }
 0x124   : > { %v932_v18 = vpack.c.bf16 %v606_v16, %v605_v14  ;;  %v957_v19 = vpack.c.bf16 %v616_v17, %v615_v15 }
 0x126   : > { %962 = vst [vmem:[%s1281_s8 + $0x20] sm:$0xff] %v932_v18   ;;  %967 = vst [vmem:[%s1281_s8 + $0x48] sm:$0xff] %v957_v19  }
 0x127 PF: > { %s13_s14 = sadd.s32 1, %s1152_s14   ;;  %s1322_s12 = smov %s1148_s13 }
 0x128   : > { %p10_p5 = scmp.ge.s32.totalorder %s13_s14, 7   ;;  %s1323_s13 = smov %s1325_s15 }
 0x12a   :  { %12 = sbr.rel (!%p10_p5) target bundleno = 2 (0x2), region = 68 }

// kernel: marionet_forward.5
= control target key start
LH: loop header
LB: loop body
LE: loop exit
PB: predicated region body
PF: predicated region fallthrough
CT: control target
= control target key end

     0   :  { %s1676_s1 = inlined_call_operand.vmem [shape: bf16[512,128], index: 1, kind: input, shape index: {}]   ;;  %s1677_s0 = inlined_call_operand.vmem [shape: bf16[176,512], index: 0, kind: input, shape index: {}]   ;;  %s1678_s2 = inlined_call_operand.vmem [shape: f32[1,128], index: 2, kind: input, shape index: {}]   ;;  %s1679_s3 = inlined_call_operand.vmem [shape: bf16[176,128], index: 3, kind: output, shape index: {}]  }
   0x1   :  { %v1270_v0 = vld [vmem:[%s1676_s1 + $0x40] sm:$0xff]   ;;  %v1274_v4 = vld [vmem:[%s1676_s1 + $0x48] sm:$0xff]   ;;  %v1278_v8 = vld [vmem:[%s1676_s1 + $0x50] sm:$0xff]  }
   0x2   :  { %v1271_v1 = vld [vmem:[%s1676_s1 + $0xc0] sm:$0xff]   ;;  %1106 = vmatprep.subr.bf16.mxu0 %v1270_v0  ;;  %v1275_v5 = vld [vmem:[%s1676_s1 + $0xc8] sm:$0xff]   ;;  %v1279_v9 = vld [vmem:[%s1676_s1 + $0xd0] sm:$0xff]  }
   0x3   :  { %v1272_v2 = vld [vmem:[%s1676_s1] sm:$0xff]   ;;  %1188 = vmatprep.subr.bf16.mxu1 %v1271_v1  ;;  %v1276_v6 = vld [vmem:[%s1676_s1 + $0x8] sm:$0xff]   ;;  %v1280_v10 = vld [vmem:[%s1676_s1 + $0x10] sm:$0xff]  }
   0x4   :  { %v1273_v3 = vld [vmem:[%s1676_s1 + $0x80] sm:$0xff]   ;;  %1107 = vmatpush3.bf16.msra.mxu0 %v1272_v2  ;;  %v1277_v7 = vld [vmem:[%s1676_s1 + $0x88] sm:$0xff]   ;;  %v1281_v11 = vld [vmem:[%s1676_s1 + $0x90] sm:$0xff]  }
   0x5   :  { %1189 = vmatpush3.bf16.msra.mxu1 %v1273_v3  ;;  %1108 = vmatprep.subr.bf16.mxu0 %v1274_v4  ;;  %v1282_v12 = vld [vmem:[%s1676_s1 + $0x58] sm:$0xff]   ;;  %v1286_v16 = vld [vmem:[%s1676_s1 + $0x60] sm:$0xff]   ;;  %v1290_v20 = vld [vmem:[%s1676_s1 + $0x68] sm:$0xff]  }
   0x6   :  { %1190 = vmatprep.subr.bf16.mxu1 %v1275_v5  ;;  %v1283_v13 = vld [vmem:[%s1676_s1 + $0xd8] sm:$0xff]   ;;  %v1287_v17 = vld [vmem:[%s1676_s1 + $0xe0] sm:$0xff]   ;;  %v1291_v21 = vld [vmem:[%s1676_s1 + $0xe8] sm:$0xff]  }
   0x7   :  { %v1284_v14 = vld [vmem:[%s1676_s1 + $0x18] sm:$0xff]   ;;  %v1288_v18 = vld [vmem:[%s1676_s1 + $0x20] sm:$0xff]   ;;  %v1292_v22 = vld [vmem:[%s1676_s1 + $0x28] sm:$0xff]  }
   0x8   :  { %1109 = vmatpush3.bf16.msra.mxu0 %v1276_v6  ;;  %v1285_v15 = vld [vmem:[%s1676_s1 + $0x98] sm:$0xff]   ;;  %v1289_v19 = vld [vmem:[%s1676_s1 + $0xa0] sm:$0xff]   ;;  %v1293_v23 = vld [vmem:[%s1676_s1 + $0xa8] sm:$0xff]  }
   0x9   :  { %1191 = vmatpush3.bf16.msra.mxu1 %v1277_v7  ;;  %1110 = vmatprep.subr.bf16.mxu0 %v1278_v8  ;;  %v1294_v24 = vld [vmem:[%s1676_s1 + $0x70] sm:$0xff]   ;;  %v1298_v28 = vld [vmem:[%s1676_s1 + $0x78] sm:$0xff]  }
   0xa   :  { %1192 = vmatprep.subr.bf16.mxu1 %v1279_v9  ;;  %v1295_v25 = vld [vmem:[%s1676_s1 + $0xf0] sm:$0xff]   ;;  %v1299_v29 = vld [vmem:[%s1676_s1 + $0xf8] sm:$0xff]  }
   0xb   :  { %v1296_v26 = vld [vmem:[%s1676_s1 + $0x30] sm:$0xff]   ;;  %v1300_v30 = vld [vmem:[%s1676_s1 + $0x38] sm:$0xff]  }
   0xc   :  { %1111 = vmatpush3.bf16.msra.mxu0 %v1280_v10  ;;  %v1297_v27 = vld [vmem:[%s1676_s1 + $0xb0] sm:$0xff]   ;;  %v1301_v31 = vld [vmem:[%s1676_s1 + $0xb8] sm:$0xff]  }
   0xd   :  { %1193 = vmatpush3.bf16.msra.mxu1 %v1281_v11  ;;  %1112 = vmatprep.subr.bf16.mxu0 %v1282_v12  ;;  %v1302_v32 = vld [vmem:[%s1677_s0] ss:$16 sps:$4 sm:$0xff]   ;;  %v1304_v33 = vld [vmem:[%s1677_s0 + $0x4] ss:$16 sps:$4 sm:$0xff]   ;;  %v1305_v34 = vld [vmem:[%s1677_s0 + $0x8] ss:$16 sps:$4 sm:$0xff]  }
   0xe   :  { %1194 = vmatprep.subr.bf16.mxu1 %v1283_v13  ;;  %v1307_v35 = vld [vmem:[%s1677_s0 + $0xc] ss:$16 sps:$4 sm:$0xff]   ;;  %574 = vmatprep.mubr.bf16.mxu0 %v1304_v33  ;;  %v1308_v36 = vld [vmem:[%s1677_s0 + $0x24] ss:$16 sps:$4 sm:$0xff]   ;;  %v1312_v38 = vld [vmem:[%s1677_s0 + $0x20] ss:$16 sps:$4 sm:$0xff]  }
   0xf   :  { %695 = vmatprep.mubr.bf16.mxu1 %v1307_v35  ;;  %v1310_v37 = vld [vmem:[%s1677_s0 + $0x2c] ss:$16 sps:$4 sm:$0xff]   ;;  %v1313_v39 = vld [vmem:[%s1677_s0 + $0x28] ss:$16 sps:$4 sm:$0xff]   ;;  %v1314_v40 = vld [vmem:[%s1677_s0 + $0x44] ss:$16 sps:$4 sm:$0xff]  }
  0x10   :  { %1113 = vmatpush3.bf16.msra.mxu0 %v1284_v14  ;;  %v1316_v41 = vld [vmem:[%s1677_s0 + $0x4c] ss:$16 sps:$4 sm:$0xff]   ;;  %v1318_v42 = vld [vmem:[%s1677_s0 + $0x40] ss:$16 sps:$4 sm:$0xff]   ;;  %v1319_v43 = vld [vmem:[%s1677_s0 + $0x48] ss:$16 sps:$4 sm:$0xff]  }
  0x11   :  { %1195 = vmatpush3.bf16.msra.mxu1 %v1285_v15  ;;  %1114 = vmatprep.subr.bf16.mxu0 %v1286_v16  ;;  %v1320_v44 = vld [vmem:[%s1677_s0 + $0x64] ss:$16 sps:$4 sm:$0xff]   ;;  %v1322_v45 = vld [vmem:[%s1677_s0 + $0x6c] ss:$16 sps:$4 sm:$0xff]   ;;  %v1324_v46 = vld [vmem:[%s1677_s0 + $0x60] ss:$16 sps:$4 sm:$0xff]  }
  0x12   :  { %1196 = vmatprep.subr.bf16.mxu1 %v1287_v17  ;;  %v1325_v47 = vld [vmem:[%s1677_s0 + $0x68] ss:$16 sps:$4 sm:$0xff]   ;;  %v1326_v48 = vld [vmem:[%s1677_s0 + $0x84] ss:$16 sps:$4 sm:$0xff]   ;;  %v1328_v49 = vld [vmem:[%s1677_s0 + $0x8c] ss:$16 sps:$4 sm:$0xff]  }
  0x13   :  { %v1330_v50 = vld [vmem:[%s1677_s0 + $0x80] ss:$16 sps:$4 sm:$0xff]   ;;  %v1331_v51 = vld [vmem:[%s1677_s0 + $0x88] ss:$16 sps:$4 sm:$0xff]   ;;  %v1332_v52 = vld [vmem:[%s1677_s0 + $0xa4] ss:$16 sps:$4 sm:$0xff]  }
  0x14   :  { %1115 = vmatpush3.bf16.msra.mxu0 %v1288_v18  ;;  %v1334_v53 = vld [vmem:[%s1677_s0 + $0xac] ss:$16 sps:$4 sm:$0xff]   ;;  %v1336_v54 = vld [vmem:[%s1677_s0 + $0xa0] ss:$16 sps:$4 sm:$0xff]   ;;  %v1337_v55 = vld [vmem:[%s1677_s0 + $0xa8] ss:$16 sps:$4 sm:$0xff]  }
  0x15   :  { %1197 = vmatpush3.bf16.msra.mxu1 %v1289_v19  ;;  %1116 = vmatprep.subr.bf16.mxu0 %v1290_v20  ;;  %v1338_v56 = vld [vmem:[%s1677_s0 + $0xc4] ss:$16 sps:$4 sm:$0xff]   ;;  %v1340_v57 = vld [vmem:[%s1677_s0 + $0xcc] ss:$16 sps:$4 sm:$0xff]   ;;  %v1342_v58 = vld [vmem:[%s1677_s0 + $0xc0] ss:$16 sps:$4 sm:$0xff]  }
  0x16   :  { %1198 = vmatprep.subr.bf16.mxu1 %v1291_v21  ;;  %v1343_v59 = vld [vmem:[%s1677_s0 + $0xc8] ss:$16 sps:$4 sm:$0xff]   ;;  %v1344_v60 = vld [vmem:[%s1677_s0 + $0xe4] ss:$16 sps:$4 sm:$0xff]   ;;  %v1346_v61 = vld [vmem:[%s1677_s0 + $0xec] ss:$16 sps:$4 sm:$0xff]  }
  0x17   :  { %v1348_v62 = vld [vmem:[%s1677_s0 + $0xe0] ss:$16 sps:$4 sm:$0xff]   ;;  %v1349_v63 = vld [vmem:[%s1677_s0 + $0xe8] ss:$16 sps:$4 sm:$0xff]   ;;  %v1350_v0 = vld [vmem:[%s1677_s0 + $0x104] ss:$16 sps:$4 sm:$0xff]  }
  0x18   :  { %1117 = vmatpush3.bf16.msra.mxu0 %v1292_v22  ;;  %v1352_v1 = vld [vmem:[%s1677_s0 + $0x10c] ss:$16 sps:$4 sm:$0xff]   ;;  %v1354_v2 = vld [vmem:[%s1677_s0 + $0x100] ss:$16 sps:$4 sm:$0xff]   ;;  %v1355_v3 = vld [vmem:[%s1677_s0 + $0x108] ss:$16 sps:$4 sm:$0xff]  }
  0x19   :  { %1199 = vmatpush3.bf16.msra.mxu1 %v1293_v23  ;;  %1118 = vmatprep.subr.bf16.mxu0 %v1294_v24  ;;  %v1356_v4 = vld [vmem:[%s1677_s0 + $0x124] ss:$16 sps:$4 sm:$0xff]   ;;  %v1358_v5 = vld [vmem:[%s1677_s0 + $0x12c] ss:$16 sps:$4 sm:$0xff]   ;;  %v1360_v6 = vld [vmem:[%s1677_s0 + $0x120] ss:$16 sps:$4 sm:$0xff]  }
  0x1a   :  { %1200 = vmatprep.subr.bf16.mxu1 %v1295_v25  ;;  %v1361_v7 = vld [vmem:[%s1677_s0 + $0x128] ss:$16 sps:$4 sm:$0xff]   ;;  %v1362_v8 = vld [vmem:[%s1677_s0 + $0x144] ss:$16 sps:$4 sm:$0xff]   ;;  %v1364_v9 = vld [vmem:[%s1677_s0 + $0x14c] ss:$16 sps:$4 sm:$0xff]  }
  0x1b   :  { %v1366_v10 = vld [vmem:[%s1677_s0 + $0x140] ss:$16 sps:$4 sm:$0xff]   ;;  %v1367_v11 = vld [vmem:[%s1677_s0 + $0x148] ss:$16 sps:$4 sm:$0xff]  }
  0x1c   :  { %1119 = vmatpush3.bf16.msra.mxu0 %v1296_v26  ;;  %v1619_v14 = vld [vmem:[%s1678_s2] ss:$0 sm:$0xff] }
  0x1d   :  { %1201 = vmatpush3.bf16.msra.mxu1 %v1297_v27  ;;  %1120 = vmatprep.subr.bf16.mxu0 %v1298_v28 }
  0x1e   :  { %1202 = vmatprep.subr.bf16.mxu1 %v1299_v29 }
  0x20   :  { %1121 = vmatpush3.bf16.msra.mxu0 %v1300_v30 }
  0x21   :  { %1203 = vmatpush3.bf16.msra.mxu1 %v1301_v31 }
  0x23   :  { %575 = vmatmul.mubr.bf16.vlgmr.msra.gmra.mrb[0].mxu0 %v1302_v32 }
  0x24   :  { %696 = vmatmul.mubr.bf16.vlgmr.msra.gmra.mrb[0].mxu1 %v1305_v34  ;;  %582 = vmatprep.mubr.bf16.mxu0 %v1308_v36 }
  0x25   :  { %703 = vmatprep.mubr.bf16.mxu1 %v1310_v37 }
  0x2b   :  { %583 = vmatmul.mubr.bf16.gmra.mrb[4].mxu0 %v1312_v38 }
  0x2c   :  { %704 = vmatmul.mubr.bf16.gmra.mrb[4].mxu1 %v1313_v39  ;;  %590 = vmatprep.mubr.bf16.mxu0 %v1314_v40 }
  0x2d   :  { %711 = vmatprep.mubr.bf16.mxu1 %v1316_v41 }
  0x33   :  { %591 = vmatmul.mubr.bf16.gmra.mrb[8].mxu0 %v1318_v42 }
  0x34   :  { %712 = vmatmul.mubr.bf16.gmra.mrb[8].mxu1 %v1319_v43  ;;  %598 = vmatprep.mubr.bf16.mxu0 %v1320_v44 }
  0x35   :  { %719 = vmatprep.mubr.bf16.mxu1 %v1322_v45 }
  0x3b   :  { %599 = vmatmul.mubr.bf16.gmra.mrb[12].mxu0 %v1324_v46 }
  0x3c   :  { %720 = vmatmul.mubr.bf16.gmra.mrb[12].mxu1 %v1325_v47  ;;  %606 = vmatprep.mubr.bf16.mxu0 %v1326_v48 }
  0x3d   :  { %727 = vmatprep.mubr.bf16.mxu1 %v1328_v49 }
  0x43   :  { %607 = vmatmul.mubr.bf16.gmra.mrb[16].mxu0 %v1330_v50 }
  0x44   :  { %728 = vmatmul.mubr.bf16.gmra.mrb[16].mxu1 %v1331_v51  ;;  %614 = vmatprep.mubr.bf16.mxu0 %v1332_v52 }
  0x45   :  { %735 = vmatprep.mubr.bf16.mxu1 %v1334_v53 }
  0x4b   :  { %615 = vmatmul.mubr.bf16.gmra.mrb[20].mxu0 %v1336_v54 }
  0x4c   :  { %736 = vmatmul.mubr.bf16.gmra.mrb[20].mxu1 %v1337_v55  ;;  %622 = vmatprep.mubr.bf16.mxu0 %v1338_v56 }
  0x4d   :  { %743 = vmatprep.mubr.bf16.mxu1 %v1340_v57 }
  0x53   :  { %623 = vmatmul.mubr.bf16.gmra.mrb[24].mxu0 %v1342_v58 }
  0x54   :  { %744 = vmatmul.mubr.bf16.gmra.mrb[24].mxu1 %v1343_v59  ;;  %630 = vmatprep.mubr.bf16.mxu0 %v1344_v60 }
  0x55   :  { %751 = vmatprep.mubr.bf16.mxu1 %v1346_v61 }
  0x5b   :  { %631 = vmatmul.mubr.bf16.gmra.mrb[28].mxu0 %v1348_v62 }
  0x5c   :  { %752 = vmatmul.mubr.bf16.gmra.mrb[28].mxu1 %v1349_v63  ;;  %638 = vmatprep.mubr.bf16.mxu0 %v1350_v0 }
  0x5d   :  { %759 = vmatprep.mubr.bf16.mxu1 %v1352_v1 }
  0x63   :  { %639 = vmatmul.mubr.bf16.gmra.mrb[32].mxu0 %v1354_v2 }
  0x64   :  { %760 = vmatmul.mubr.bf16.gmra.mrb[32].mxu1 %v1355_v3  ;;  %646 = vmatprep.mubr.bf16.mxu0 %v1356_v4 }
  0x65   :  { %767 = vmatprep.mubr.bf16.mxu1 %v1358_v5 }
  0x6b   :  { %647 = vmatmul.mubr.bf16.gmra.mrb[36].mxu0 %v1360_v6 }
  0x6c   :  { %768 = vmatmul.mubr.bf16.gmra.mrb[36].mxu1 %v1361_v7  ;;  %654 = vmatprep.mubr.bf16.mxu0 %v1362_v8 }
  0x6d   :  { %775 = vmatprep.mubr.bf16.mxu1 %v1364_v9 }
  0x73   :  { %655 = vmatmul.mubr.bf16.gmra.mrb[40].mxu0 %v1366_v10 }
  0x74   :  { %776 = vmatmul.mubr.bf16.gmra.mrb[40].mxu1 %v1367_v11 }
  0xf6   :  { %v1122_v12 = vpop.f32.mrb[0].mxu0 }
  0xf7   :  { %v1204_v13 = vpop.f32.mrb[0].mxu1  ;;  %v1123_v15 = vpop.f32.mrb[1].mxu0 }
  0xf8   :  { %v1124_v16 = vadd.f32 %v1123_v15, %v1122_v12  ;;  %v1205_v17 = vpop.f32.mrb[1].mxu1  ;;  %v1125_v18 = vpop.f32.mrb[2].mxu0 }
  0xf9   :  { %v1206_v19 = vadd.f32 %v1205_v17, %v1204_v13  ;;  %v1207_v20 = vpop.f32.mrb[2].mxu1  ;;  %v1126_v21 = vpop.f32.mrb[3].mxu0 }
  0xfa   :  { %v577_v22 = vadd.f32 %v1124_v16, %v1619_v14  ;;  %v1127_v23 = vadd.f32 %v1126_v21, %v1125_v18  ;;  %v1208_v24 = vpop.f32.mrb[3].mxu1 }
  0xfb   :  { %v1209_v25 = vadd.f32 %v1208_v24, %v1207_v20 }
  0xfc   :  { %v698_v26 = vadd.f32 %v1206_v19, %v577_v22  ;;  %v580_v27 = vadd.f32 %v1127_v23, %v1619_v14 }
  0xfe   :  { %v701_v28 = vadd.f32 %v1209_v25, %v580_v27  ;;  %v1128_v29 = vpop.f32.mrb[4].mxu0  ;;  %v784_v32 = vmax.f32 %v698_v26, 0.0 }
  0xff   :  { %v1210_v30 = vpop.f32.mrb[4].mxu1  ;;  %v1129_v31 = vpop.f32.mrb[5].mxu0 }
 0x100   :  { %v785_v33 = vmax.f32 %v701_v28, 0.0  ;;  %v1130_v34 = vadd.f32 %v1129_v31, %v1128_v29  ;;  %v1211_v35 = vpop.f32.mrb[5].mxu1  ;;  %v1131_v36 = vpop.f32.mrb[6].mxu0 }
 0x101   :  { %v1212_v37 = vadd.f32 %v1211_v35, %v1210_v30  ;;  %v1213_v38 = vpop.f32.mrb[6].mxu1  ;;  %v1132_v39 = vpop.f32.mrb[7].mxu0 }
 0x102   :  { %v1044_v40 = vpack.c.bf16 %v785_v33, %v784_v32  ;;  %v585_v41 = vadd.f32 %v1130_v34, %v1619_v14  ;;  %v1133_v42 = vadd.f32 %v1132_v39, %v1131_v36  ;;  %v1214_v43 = vpop.f32.mrb[7].mxu1 }
 0x103   :  { %v1215_v44 = vadd.f32 %v1214_v43, %v1213_v38 }
 0x104   :  { %1045 = vst [vmem:[%s1679_s3] sm:$0xff] %v1044_v40   ;;  %v706_v45 = vadd.f32 %v1212_v37, %v585_v41  ;;  %v588_v46 = vadd.f32 %v1133_v42, %v1619_v14 }
 0x106   :  { %v709_v47 = vadd.f32 %v1215_v44, %v588_v46  ;;  %v1134_v48 = vpop.f32.mrb[8].mxu0  ;;  %v786_v51 = vmax.f32 %v706_v45, 0.0 }
 0x107   :  { %v1216_v49 = vpop.f32.mrb[8].mxu1  ;;  %v1135_v50 = vpop.f32.mrb[9].mxu0 }
 0x108   :  { %v787_v52 = vmax.f32 %v709_v47, 0.0  ;;  %v1136_v53 = vadd.f32 %v1135_v50, %v1134_v48  ;;  %v1217_v54 = vpop.f32.mrb[9].mxu1  ;;  %v1137_v55 = vpop.f32.mrb[10].mxu0 }
 0x109   :  { %v1218_v56 = vadd.f32 %v1217_v54, %v1216_v49  ;;  %v1219_v57 = vpop.f32.mrb[10].mxu1  ;;  %v1138_v58 = vpop.f32.mrb[11].mxu0 }
 0x10a   :  { %v1049_v59 = vpack.c.bf16 %v787_v52, %v786_v51  ;;  %v593_v60 = vadd.f32 %v1136_v53, %v1619_v14  ;;  %v1139_v61 = vadd.f32 %v1138_v58, %v1137_v55  ;;  %v1220_v62 = vpop.f32.mrb[11].mxu1 }
 0x10b   :  { %v1221_v63 = vadd.f32 %v1220_v62, %v1219_v57 }
 0x10c   :  { %1096 = vst [vmem:[%s1679_s3 + $0x8] sm:$0xff] %v1049_v59   ;;  %v714_v0 = vadd.f32 %v1218_v56, %v593_v60  ;;  %v596_v1 = vadd.f32 %v1139_v61, %v1619_v14 }
 0x10e   :  { %v717_v2 = vadd.f32 %v1221_v63, %v596_v1  ;;  %v1140_v3 = vpop.f32.mrb[12].mxu0  ;;  %v788_v6 = vmax.f32 %v714_v0, 0.0 }
 0x10f   :  { %v1222_v4 = vpop.f32.mrb[12].mxu1  ;;  %v1141_v5 = vpop.f32.mrb[13].mxu0 }
 0x110   :  { %v789_v7 = vmax.f32 %v717_v2, 0.0  ;;  %v1142_v8 = vadd.f32 %v1141_v5, %v1140_v3  ;;  %v1223_v9 = vpop.f32.mrb[13].mxu1  ;;  %v1143_v10 = vpop.f32.mrb[14].mxu0 }
 0x111   :  { %v1224_v11 = vadd.f32 %v1223_v9, %v1222_v4  ;;  %v1225_v12 = vpop.f32.mrb[14].mxu1  ;;  %v1144_v13 = vpop.f32.mrb[15].mxu0 }
 0x112   :  { %v1054_v15 = vpack.c.bf16 %v789_v7, %v788_v6  ;;  %v601_v16 = vadd.f32 %v1142_v8, %v1619_v14  ;;  %v1145_v17 = vadd.f32 %v1144_v13, %v1143_v10  ;;  %v1226_v18 = vpop.f32.mrb[15].mxu1 }
 0x113   :  { %v1227_v19 = vadd.f32 %v1226_v18, %v1225_v12 }
 0x114   :  { %1097 = vst [vmem:[%s1679_s3 + $0x10] sm:$0xff] %v1054_v15   ;;  %v722_v20 = vadd.f32 %v1224_v11, %v601_v16  ;;  %v604_v21 = vadd.f32 %v1145_v17, %v1619_v14 }
 0x116   :  { %v725_v22 = vadd.f32 %v1227_v19, %v604_v21  ;;  %v1146_v23 = vpop.f32.mrb[16].mxu0  ;;  %v790_v26 = vmax.f32 %v722_v20, 0.0 }
 0x117   :  { %v1228_v24 = vpop.f32.mrb[16].mxu1  ;;  %v1147_v25 = vpop.f32.mrb[17].mxu0 }
 0x118   :  { %v791_v27 = vmax.f32 %v725_v22, 0.0  ;;  %v1148_v28 = vadd.f32 %v1147_v25, %v1146_v23  ;;  %v1229_v29 = vpop.f32.mrb[17].mxu1  ;;  %v1149_v30 = vpop.f32.mrb[18].mxu0 }
 0x119   :  { %v1230_v31 = vadd.f32 %v1229_v29, %v1228_v24  ;;  %v1231_v32 = vpop.f32.mrb[18].mxu1  ;;  %v1150_v33 = vpop.f32.mrb[19].mxu0 }
 0x11a   :  { %v1059_v34 = vpack.c.bf16 %v791_v27, %v790_v26  ;;  %v609_v35 = vadd.f32 %v1148_v28, %v1619_v14  ;;  %v1151_v36 = vadd.f32 %v1150_v33, %v1149_v30  ;;  %v1232_v37 = vpop.f32.mrb[19].mxu1 }
 0x11b   :  { %v1233_v38 = vadd.f32 %v1232_v37, %v1231_v32 }
 0x11c   :  { %1098 = vst [vmem:[%s1679_s3 + $0x18] sm:$0xff] %v1059_v34   ;;  %v730_v39 = vadd.f32 %v1230_v31, %v609_v35  ;;  %v612_v40 = vadd.f32 %v1151_v36, %v1619_v14 }
 0x11e   :  { %v733_v41 = vadd.f32 %v1233_v38, %v612_v40  ;;  %v1152_v42 = vpop.f32.mrb[20].mxu0  ;;  %v792_v45 = vmax.f32 %v730_v39, 0.0 }
 0x11f   :  { %v1234_v43 = vpop.f32.mrb[20].mxu1  ;;  %v1153_v44 = vpop.f32.mrb[21].mxu0 }
 0x120   :  { %v793_v46 = vmax.f32 %v733_v41, 0.0  ;;  %v1154_v47 = vadd.f32 %v1153_v44, %v1152_v42  ;;  %v1235_v48 = vpop.f32.mrb[21].mxu1  ;;  %v1155_v49 = vpop.f32.mrb[22].mxu0 }
 0x121   :  { %v1236_v50 = vadd.f32 %v1235_v48, %v1234_v43  ;;  %v1237_v51 = vpop.f32.mrb[22].mxu1  ;;  %v1156_v52 = vpop.f32.mrb[23].mxu0 }
 0x122   :  { %v1064_v53 = vpack.c.bf16 %v793_v46, %v792_v45  ;;  %v617_v54 = vadd.f32 %v1154_v47, %v1619_v14  ;;  %v1157_v55 = vadd.f32 %v1156_v52, %v1155_v49  ;;  %v1238_v56 = vpop.f32.mrb[23].mxu1 }
 0x123   :  { %v1239_v57 = vadd.f32 %v1238_v56, %v1237_v51 }
 0x124   :  { %1099 = vst [vmem:[%s1679_s3 + $0x20] sm:$0xff] %v1064_v53   ;;  %v738_v58 = vadd.f32 %v1236_v50, %v617_v54  ;;  %v620_v59 = vadd.f32 %v1157_v55, %v1619_v14 }
 0x126   :  { %v741_v60 = vadd.f32 %v1239_v57, %v620_v59  ;;  %v1158_v61 = vpop.f32.mrb[24].mxu0  ;;  %v794_v0 = vmax.f32 %v738_v58, 0.0 }
 0x127   :  { %v1240_v62 = vpop.f32.mrb[24].mxu1  ;;  %v1159_v63 = vpop.f32.mrb[25].mxu0 }
 0x128   :  { %v795_v1 = vmax.f32 %v741_v60, 0.0  ;;  %v1160_v2 = vadd.f32 %v1159_v63, %v1158_v61  ;;  %v1241_v3 = vpop.f32.mrb[25].mxu1  ;;  %v1161_v4 = vpop.f32.mrb[26].mxu0 }
 0x129   :  { %v1242_v5 = vadd.f32 %v1241_v3, %v1240_v62  ;;  %v1243_v6 = vpop.f32.mrb[26].mxu1  ;;  %v1162_v7 = vpop.f32.mrb[27].mxu0 }
 0x12a   :  { %v1069_v8 = vpack.c.bf16 %v795_v1, %v794_v0  ;;  %v625_v9 = vadd.f32 %v1160_v2, %v1619_v14  ;;  %v1163_v10 = vadd.f32 %v1162_v7, %v1161_v4  ;;  %v1244_v11 = vpop.f32.mrb[27].mxu1 }
 0x12b   :  { %v1245_v12 = vadd.f32 %v1244_v11, %v1243_v6 }
 0x12c   :  { %1100 = vst [vmem:[%s1679_s3 + $0x28] sm:$0xff] %v1069_v8   ;;  %v746_v13 = vadd.f32 %v1242_v5, %v625_v9  ;;  %v628_v15 = vadd.f32 %v1163_v10, %v1619_v14 }
 0x12e   :  { %v749_v16 = vadd.f32 %v1245_v12, %v628_v15  ;;  %v1164_v17 = vpop.f32.mrb[28].mxu0  ;;  %v796_v20 = vmax.f32 %v746_v13, 0.0 }
 0x12f   :  { %v1246_v18 = vpop.f32.mrb[28].mxu1  ;;  %v1165_v19 = vpop.f32.mrb[29].mxu0 }
 0x130   :  { %v797_v21 = vmax.f32 %v749_v16, 0.0  ;;  %v1166_v22 = vadd.f32 %v1165_v19, %v1164_v17  ;;  %v1247_v23 = vpop.f32.mrb[29].mxu1  ;;  %v1167_v24 = vpop.f32.mrb[30].mxu0 }
 0x131   :  { %v1248_v25 = vadd.f32 %v1247_v23, %v1246_v18  ;;  %v1249_v26 = vpop.f32.mrb[30].mxu1  ;;  %v1168_v27 = vpop.f32.mrb[31].mxu0 }
 0x132   :  { %v1074_v28 = vpack.c.bf16 %v797_v21, %v796_v20  ;;  %v633_v29 = vadd.f32 %v1166_v22, %v1619_v14  ;;  %v1169_v30 = vadd.f32 %v1168_v27, %v1167_v24  ;;  %v1250_v31 = vpop.f32.mrb[31].mxu1 }
 0x133   :  { %v1251_v32 = vadd.f32 %v1250_v31, %v1249_v26 }
 0x134   :  { %1101 = vst [vmem:[%s1679_s3 + $0x30] sm:$0xff] %v1074_v28   ;;  %v754_v33 = vadd.f32 %v1248_v25, %v633_v29  ;;  %v636_v34 = vadd.f32 %v1169_v30, %v1619_v14 }
 0x136   :  { %v757_v35 = vadd.f32 %v1251_v32, %v636_v34  ;;  %v1170_v36 = vpop.f32.mrb[32].mxu0  ;;  %v798_v39 = vmax.f32 %v754_v33, 0.0 }
 0x137   :  { %v1252_v37 = vpop.f32.mrb[32].mxu1  ;;  %v1171_v38 = vpop.f32.mrb[33].mxu0 }
 0x138   :  { %v799_v40 = vmax.f32 %v757_v35, 0.0  ;;  %v1172_v41 = vadd.f32 %v1171_v38, %v1170_v36  ;;  %v1253_v42 = vpop.f32.mrb[33].mxu1  ;;  %v1173_v43 = vpop.f32.mrb[34].mxu0 }
 0x139   :  { %v1254_v44 = vadd.f32 %v1253_v42, %v1252_v37  ;;  %v1255_v45 = vpop.f32.mrb[34].mxu1  ;;  %v1174_v46 = vpop.f32.mrb[35].mxu0 }
 0x13a   :  { %v1079_v47 = vpack.c.bf16 %v799_v40, %v798_v39  ;;  %v641_v48 = vadd.f32 %v1172_v41, %v1619_v14  ;;  %v1175_v49 = vadd.f32 %v1174_v46, %v1173_v43  ;;  %v1256_v50 = vpop.f32.mrb[35].mxu1 }
 0x13b   :  { %v1257_v51 = vadd.f32 %v1256_v50, %v1255_v45 }
 0x13c   :  { %1102 = vst [vmem:[%s1679_s3 + $0x38] sm:$0xff] %v1079_v47   ;;  %v762_v52 = vadd.f32 %v1254_v44, %v641_v48  ;;  %v644_v53 = vadd.f32 %v1175_v49, %v1619_v14 }
 0x13e   :  { %v765_v54 = vadd.f32 %v1257_v51, %v644_v53  ;;  %v1176_v55 = vpop.f32.mrb[36].mxu0  ;;  %v800_v58 = vmax.f32 %v762_v52, 0.0 }
 0x13f   :  { %v1258_v56 = vpop.f32.mrb[36].mxu1  ;;  %v1177_v57 = vpop.f32.mrb[37].mxu0 }
 0x140   :  { %v801_v59 = vmax.f32 %v765_v54, 0.0  ;;  %v1178_v60 = vadd.f32 %v1177_v57, %v1176_v55  ;;  %v1259_v61 = vpop.f32.mrb[37].mxu1  ;;  %v1179_v62 = vpop.f32.mrb[38].mxu0 }
 0x141   :  { %v1260_v63 = vadd.f32 %v1259_v61, %v1258_v56  ;;  %v1261_v0 = vpop.f32.mrb[38].mxu1  ;;  %v1180_v1 = vpop.f32.mrb[39].mxu0 }
 0x142   :  { %v1084_v2 = vpack.c.bf16 %v801_v59, %v800_v58  ;;  %v649_v3 = vadd.f32 %v1178_v60, %v1619_v14  ;;  %v1181_v4 = vadd.f32 %v1180_v1, %v1179_v62  ;;  %v1262_v5 = vpop.f32.mrb[39].mxu1 }
 0x143   :  { %v1263_v6 = vadd.f32 %v1262_v5, %v1261_v0 }
 0x144   :  { %1103 = vst [vmem:[%s1679_s3 + $0x40] sm:$0xff] %v1084_v2   ;;  %v770_v7 = vadd.f32 %v1260_v63, %v649_v3  ;;  %v652_v8 = vadd.f32 %v1181_v4, %v1619_v14 }
 0x146   :  { %v773_v9 = vadd.f32 %v1263_v6, %v652_v8  ;;  %v1182_v10 = vpop.f32.mrb[40].mxu0  ;;  %v802_v13 = vmax.f32 %v770_v7, 0.0 }
 0x147   :  { %v1264_v11 = vpop.f32.mrb[40].mxu1  ;;  %v1183_v12 = vpop.f32.mrb[41].mxu0 }
 0x148   :  { %v803_v15 = vmax.f32 %v773_v9, 0.0  ;;  %v1184_v16 = vadd.f32 %v1183_v12, %v1182_v10  ;;  %v1265_v17 = vpop.f32.mrb[41].mxu1  ;;  %v1185_v18 = vpop.f32.mrb[42].mxu0 }
 0x149   :  { %v1266_v19 = vadd.f32 %v1265_v17, %v1264_v11  ;;  %v1267_v20 = vpop.f32.mrb[42].mxu1  ;;  %v1186_v21 = vpop.f32.mrb[43].mxu0 }
 0x14a   :  { %v1089_v22 = vpack.c.bf16 %v803_v15, %v802_v13  ;;  %v657_v23 = vadd.f32 %v1184_v16, %v1619_v14  ;;  %v1187_v24 = vadd.f32 %v1186_v21, %v1185_v18  ;;  %v1268_v25 = vpop.f32.mrb[43].mxu1 }
 0x14b   :  { %v1269_v26 = vadd.f32 %v1268_v25, %v1267_v20 }
 0x14c   :  { %1104 = vst [vmem:[%s1679_s3 + $0x48] sm:$0xff] %v1089_v22   ;;  %v778_v27 = vadd.f32 %v1266_v19, %v657_v23  ;;  %v660_v28 = vadd.f32 %v1187_v24, %v1619_v14 }
 0x14e   :  { %v781_v29 = vadd.f32 %v1269_v26, %v660_v28  ;;  %v804_v30 = vmax.f32 %v778_v27, 0.0 }
 0x150   :  { %v805_v31 = vmax.f32 %v781_v29, 0.0 }
 0x152   :  { %v1094_v32 = vpack.c.bf16 %v805_v31, %v804_v30 }
 0x154   :  { %1105 = vst [vmem:[%s1679_s3 + $0x50] sm:$0xff] %v1094_v32  }

// kernel: marionet_forward.6
= control target key start
LH: loop header
LB: loop body
LE: loop exit
PB: predicated region body
PF: predicated region fallthrough
CT: control target
= control target key end

     0   :  { %v1348_v24 = vmov 0.0   ;;  %vm1349_vm0 = vmmov 0   ;;  %s1681_s1 = inlined_call_operand.vmem [shape: bf16[640,128], index: 1, kind: input, shape index: {}]   ;;  %s1682_s0 = inlined_call_operand.vmem [shape: bf16[112,640], index: 0, kind: input, shape index: {}]   ;;  %s1683_s2 = inlined_call_operand.vmem [shape: f32[1,128], index: 2, kind: input, shape index: {}]   ;;  %s1684_s3 = inlined_call_operand.vmem [shape: bf16[112,128], index: 3, kind: output, shape index: {}]  }
   0x1   :  { %v1259_v0 = vld [vmem:[%s1681_s1 + $0x40] sm:$0xff]   ;;  %v1261_v2 = vld [vmem:[%s1681_s1 + $0x48] sm:$0xff]   ;;  %v1263_v4 = vld [vmem:[%s1681_s1 + $0x50] sm:$0xff]  }
   0x2   :  { %v1260_v1 = vld [vmem:[%s1681_s1] sm:$0xff]   ;;  %1241 = vmatprep.subr.bf16.mxu1 %v1259_v0  ;;  %1066 = vmatprep.subr.bf16.mxu0 %v1259_v0  ;;  %v1262_v3 = vld [vmem:[%s1681_s1 + $0x8] sm:$0xff]   ;;  %v1264_v5 = vld [vmem:[%s1681_s1 + $0x10] sm:$0xff]  }
   0x3   :  { %1249 = vmatpush3.bf16.msra.mxu1 %v1260_v1  ;;  %1067 = vmatpush3.bf16.msra.mxu0 %v1260_v1  ;;  %v1265_v6 = vld [vmem:[%s1681_s1 + $0x58] sm:$0xff]   ;;  %v1267_v8 = vld [vmem:[%s1681_s1 + $0x60] sm:$0xff]   ;;  %v1269_v10 = vld [vmem:[%s1681_s1 + $0x68] sm:$0xff]  }
   0x4   :  { %1242 = vmatprep.subr.bf16.mxu1 %v1261_v2  ;;  %1068 = vmatprep.subr.bf16.mxu0 %v1261_v2  ;;  %v1266_v7 = vld [vmem:[%s1681_s1 + $0x18] sm:$0xff]   ;;  %v1268_v9 = vld [vmem:[%s1681_s1 + $0x20] sm:$0xff]   ;;  %v1270_v12 = vld [vmem:[%s1681_s1 + $0x28] sm:$0xff]  }
   0x5   :  { %v1277_v11 = vld [vmem:[%s1682_s0 + $0xa4] ss:$20 sps:$4 sm:$0xff]   ;;  %v1271_v14 = vld [vmem:[%s1681_s1 + $0x70] sm:$0xff]   ;;  %v1284_v23 = vld [vmem:[%s1681_s1 + $0xc8] sm:$0xff]  }
   0x6   :  { %v1281_v13 = vld [vmem:[%s1682_s0 + $0x4] ss:$20 sps:$4 sm:$0xff]   ;;  %630 = vmatprep.mubr.bf16.mxu1 %v1277_v11  ;;  %v1272_v15 = vld [vmem:[%s1681_s1 + $0x30] sm:$0xff]   ;;  %v1288_v25 = vld [vmem:[%s1682_s0 + $0x2c] ss:$20 sps:$4 sm:$0xff]  }
   0x7   :  { %1250 = vmatpush3.bf16.msra.mxu1 %v1262_v3  ;;  %1069 = vmatpush3.bf16.msra.mxu0 %v1262_v3  ;;  %v1273_v16 = vld [vmem:[%s1681_s1 + $0x78] sm:$0xff]   ;;  %v1278_v18 = vld [vmem:[%s1681_s1 + $0xc0] sm:$0xff]   ;;  %v1285_v27 = vld [vmem:[%s1681_s1 + $0x88] sm:$0xff]  }
   0x8   :  { %1243 = vmatprep.subr.bf16.mxu1 %v1263_v4  ;;  %1070 = vmatprep.subr.bf16.mxu0 %v1263_v4  ;;  %v1274_v17 = vld [vmem:[%s1681_s1 + $0x38] sm:$0xff]   ;;  %v1275_v19 = vld [vmem:[%s1682_s0 + $0xa0] ss:$20 sps:$4 sm:$0xff]   ;;  %v1286_v28 = vld [vmem:[%s1681_s1 + $0x108] sm:$0xff]  }
   0x9   :  { %598 = vmatprep.mubr.bf16.mxu0 %v1281_v13  ;;  %v1279_v20 = vld [vmem:[%s1682_s0] ss:$20 sps:$4 sm:$0xff]   ;;  %v1291_v31 = vld [vmem:[%s1682_s0 + $0x28] ss:$20 sps:$4 sm:$0xff]   ;;  %v1303_v41 = vld [vmem:[%s1682_s0 + $0x50] ss:$20 sps:$4 sm:$0xff]  }
   0xa   :  { %v1282_v21 = vld [vmem:[%s1681_s1 + $0x80] sm:$0xff]   ;;  %v1287_v29 = vld [vmem:[%s1681_s1 + $0xd0] sm:$0xff]   ;;  %v1296_v32 = vld [vmem:[%s1682_s0 + $0xc8] ss:$20 sps:$4 sm:$0xff]  }
   0xb   :  { %1251 = vmatpush3.bf16.msra.mxu1 %v1264_v5  ;;  %1071 = vmatpush3.bf16.msra.mxu0 %v1264_v5  ;;  %v1283_v22 = vld [vmem:[%s1681_s1 + $0x100] sm:$0xff]   ;;  %v1290_v30 = vld [vmem:[%s1681_s1 + $0x90] sm:$0xff]   ;;  %v1295_v34 = vld [vmem:[%s1681_s1 + $0xd8] sm:$0xff]  }
   0xc   :  { %1244 = vmatprep.subr.bf16.mxu1 %v1265_v6  ;;  %1072 = vmatprep.subr.bf16.mxu0 %v1265_v6  ;;  %v1293_v26 = vld [vmem:[%s1682_s0 + $0xcc] ss:$20 sps:$4 sm:$0xff]   ;;  %v1292_v33 = vld [vmem:[%s1681_s1 + $0x110] sm:$0xff]   ;;  %v1297_v37 = vld [vmem:[%s1681_s1 + $0x98] sm:$0xff]  }
   0xd   :  { %v1300_v35 = vld [vmem:[%s1682_s0 + $0x54] ss:$20 sps:$4 sm:$0xff]   ;;  %v1298_v38 = vld [vmem:[%s1681_s1 + $0x118] sm:$0xff]   ;;  %v1299_v39 = vld [vmem:[%s1681_s1 + $0xe0] sm:$0xff]  }
   0xe   :  { %v1305_v36 = vld [vmem:[%s1682_s0 + $0xf4] ss:$20 sps:$4 sm:$0xff]   ;;  %v1302_v40 = vld [vmem:[%s1681_s1 + $0xa0] sm:$0xff]   ;;  %v1312_v45 = vld [vmem:[%s1682_s0 + $0x7c] ss:$20 sps:$4 sm:$0xff]  }
   0xf   :  { %1252 = vmatpush3.bf16.msra.mxu1 %v1266_v7  ;;  %1073 = vmatpush3.bf16.msra.mxu0 %v1266_v7  ;;  %v1308_v42 = vld [vmem:[%s1682_s0 + $0xf0] ss:$20 sps:$4 sm:$0xff]   ;;  %v1307_v44 = vld [vmem:[%s1681_s1 + $0xe8] sm:$0xff]   ;;  %v1317_v53 = vld [vmem:[%s1681_s1 + $0xf8] sm:$0xff]  }
  0x10   :  { %1245 = vmatprep.subr.bf16.mxu1 %v1267_v8  ;;  %1074 = vmatprep.subr.bf16.mxu0 %v1267_v8  ;;  %v1304_v43 = vld [vmem:[%s1681_s1 + $0x120] sm:$0xff]   ;;  %v1309_v47 = vld [vmem:[%s1681_s1 + $0xa8] sm:$0xff]   ;;  %v1311_v49 = vld [vmem:[%s1681_s1 + $0xf0] sm:$0xff]  }
  0x11   :  { %v1321_v46 = vld [vmem:[%s1682_s0 + $0xc] ss:$20 sps:$4 sm:$0xff]   ;;  %v1314_v50 = vld [vmem:[%s1681_s1 + $0xb0] sm:$0xff]   ;;  %v1318_v54 = vld [vmem:[%s1681_s1 + $0xb8] sm:$0xff]  }
  0x12   :  { %v1310_v48 = vld [vmem:[%s1681_s1 + $0x128] sm:$0xff]   ;;  %v1316_v52 = vld [vmem:[%s1681_s1 + $0x130] sm:$0xff]   ;;  %v1322_v55 = vld [vmem:[%s1681_s1 + $0x138] sm:$0xff]  }
  0x13   :  { %1253 = vmatpush3.bf16.msra.mxu1 %v1268_v9  ;;  %1075 = vmatpush3.bf16.msra.mxu0 %v1268_v9  ;;  %v1315_v51 = vld [vmem:[%s1682_s0 + $0x78] ss:$20 sps:$4 sm:$0xff]   ;;  %v1319_v56 = vld [vmem:[%s1682_s0 + $0x8] ss:$20 sps:$4 sm:$0xff]   ;;  %v1323_v57 = vld [vmem:[%s1682_s0 + $0x10] ss:$20 sps:$4 sm:$0xff]  }
  0x14   :  { %1246 = vmatprep.subr.bf16.mxu1 %v1269_v10  ;;  %1076 = vmatprep.subr.bf16.mxu0 %v1269_v10  ;;  %v1324_v58 = vld [vmem:[%s1682_s0 + $0x34] ss:$20 sps:$4 sm:$0xff]   ;;  %v1326_v59 = vld [vmem:[%s1682_s0 + $0x30] ss:$20 sps:$4 sm:$0xff]   ;;  %v1327_v60 = vld [vmem:[%s1682_s0 + $0x38] ss:$20 sps:$4 sm:$0xff]  }
  0x15   :  { %v1328_v61 = vld [vmem:[%s1682_s0 + $0x5c] ss:$20 sps:$4 sm:$0xff]   ;;  %v1330_v62 = vld [vmem:[%s1682_s0 + $0x58] ss:$20 sps:$4 sm:$0xff]   ;;  %v1331_v63 = vld [vmem:[%s1682_s0 + $0x60] ss:$20 sps:$4 sm:$0xff]  }
  0x16   :  { %v1332_v0 = vld [vmem:[%s1682_s0 + $0x84] ss:$20 sps:$4 sm:$0xff]   ;;  %v1334_v1 = vld [vmem:[%s1682_s0 + $0x80] ss:$20 sps:$4 sm:$0xff]   ;;  %v1335_v2 = vld [vmem:[%s1682_s0 + $0x88] ss:$20 sps:$4 sm:$0xff]  }
  0x17   :  { %1254 = vmatpush3.bf16.msra.mxu1 %v1270_v12  ;;  %1077 = vmatpush3.bf16.msra.mxu0 %v1270_v12  ;;  %v1336_v3 = vld [vmem:[%s1682_s0 + $0xac] ss:$20 sps:$4 sm:$0xff]   ;;  %v1338_v4 = vld [vmem:[%s1682_s0 + $0xa8] ss:$20 sps:$4 sm:$0xff]   ;;  %v1339_v5 = vld [vmem:[%s1682_s0 + $0xb0] ss:$20 sps:$4 sm:$0xff]  }
  0x18   :  { %1247 = vmatprep.subr.bf16.mxu1 %v1271_v14  ;;  %1078 = vmatprep.subr.bf16.mxu0 %v1271_v14  ;;  %v1340_v6 = vld [vmem:[%s1682_s0 + $0xd4] ss:$20 sps:$4 sm:$0xff]   ;;  %v1342_v7 = vld [vmem:[%s1682_s0 + $0xd0] ss:$20 sps:$4 sm:$0xff]   ;;  %v1343_v8 = vld [vmem:[%s1682_s0 + $0xd8] ss:$20 sps:$4 sm:$0xff]  }
  0x19   :  { %v1344_v9 = vld [vmem:[%s1682_s0 + $0xfc] ss:$20 sps:$4 sm:$0xff]   ;;  %v1346_v10 = vld [vmem:[%s1682_s0 + $0xf8] ss:$20 sps:$4 sm:$0xff]   ;;  %v1347_v11 = vld [vmem:[%s1682_s0 + $0x100] ss:$20 sps:$4 sm:$0xff]  }
  0x1b   :  { %1255 = vmatpush3.bf16.msra.mxu1 %v1272_v15  ;;  %1079 = vmatpush3.bf16.msra.mxu0 %v1272_v15 }
  0x1c   :  { %1248 = vmatprep.subr.bf16.mxu1 %v1273_v16  ;;  %1080 = vmatprep.subr.bf16.mxu0 %v1273_v16 }
  0x1f   :  { %1256 = vmatpush3.bf16.msra.mxu1 %v1274_v17  ;;  %1081 = vmatpush3.bf16.msra.mxu0 %v1274_v17 }
  0x20   :  { %1124 = vmatprep.subr.bf16.mxu1 %v1278_v18  ;;  %1197 = vmatprep.subr.bf16.mxu0 %v1348_v24 }
  0x22   :  { %631 = vmatmul.mubr.bf16.vlgmr.msra.gmra.mrb[0].mxu1 %v1275_v19  ;;  %599 = vmatmul.mubr.bf16.vlgmr.msra.gmra.mrb[0].mxu0 %v1279_v20 }
  0x23   :  { %1125 = vmatpush3.bf16.msra.mxu1 %v1282_v21  ;;  %1198 = vmatpush3.bf16.msra.mxu0 %v1283_v22 }
  0x24   :  { %1126 = vmatprep.subr.bf16.mxu1 %v1284_v23  ;;  %1199 = vmatprep.subr.bf16.mxu0 %v1348_v24 }
  0x25   :  { %606 = vmatprep.mubr.bf16.mxu0 %v1288_v25  ;;  %638 = vmatprep.mubr.bf16.mxu1 %v1293_v26 }
  0x27   :  { %1127 = vmatpush3.bf16.msra.mxu1 %v1285_v27  ;;  %1200 = vmatpush3.bf16.msra.mxu0 %v1286_v28 }
  0x28   :  { %1128 = vmatprep.subr.bf16.mxu1 %v1287_v29  ;;  %1201 = vmatprep.subr.bf16.mxu0 %v1348_v24 }
  0x2a   :  { %607 = vmatmul.mubr.bf16.gmra.mrb[4].mxu0 %v1291_v31  ;;  %639 = vmatmul.mubr.bf16.gmra.mrb[4].mxu1 %v1296_v32 }
  0x2b   :  { %1129 = vmatpush3.bf16.msra.mxu1 %v1290_v30  ;;  %1202 = vmatpush3.bf16.msra.mxu0 %v1292_v33 }
  0x2c   :  { %1130 = vmatprep.subr.bf16.mxu1 %v1295_v34  ;;  %1203 = vmatprep.subr.bf16.mxu0 %v1348_v24 }
  0x2d   :  { %614 = vmatprep.mubr.bf16.mxu0 %v1300_v35  ;;  %646 = vmatprep.mubr.bf16.mxu1 %v1305_v36 }
  0x2f   :  { %1131 = vmatpush3.bf16.msra.mxu1 %v1297_v37  ;;  %1204 = vmatpush3.bf16.msra.mxu0 %v1298_v38 }
  0x30   :  { %1132 = vmatprep.subr.bf16.mxu1 %v1299_v39  ;;  %1205 = vmatprep.subr.bf16.mxu0 %v1348_v24 }
  0x32   :  { %615 = vmatmul.mubr.bf16.gmra.mrb[8].mxu0 %v1303_v41  ;;  %647 = vmatmul.mubr.bf16.gmra.mrb[8].mxu1 %v1308_v42 }
  0x33   :  { %1133 = vmatpush3.bf16.msra.mxu1 %v1302_v40  ;;  %1206 = vmatpush3.bf16.msra.mxu0 %v1304_v43 }
  0x34   :  { %1134 = vmatprep.subr.bf16.mxu1 %v1307_v44  ;;  %1207 = vmatprep.subr.bf16.mxu0 %v1348_v24 }
  0x35   :  { %622 = vmatprep.mubr.bf16.mxu0 %v1312_v45  ;;  %687 = vmatprep.mubr.bf16.mxu1 %v1321_v46 }
  0x37   :  { %1135 = vmatpush3.bf16.msra.mxu1 %v1309_v47  ;;  %1208 = vmatpush3.bf16.msra.mxu0 %v1310_v48 }
  0x38   :  { %1136 = vmatprep.subr.bf16.mxu1 %v1311_v49  ;;  %1209 = vmatprep.subr.bf16.mxu0 %v1348_v24 }
  0x3a   :  { %623 = vmatmul.mubr.bf16.gmra.mrb[12].mxu0 %v1315_v51 }
  0x3b   :  { %1137 = vmatpush3.bf16.msra.mxu1 %v1314_v50  ;;  %1210 = vmatpush3.bf16.msra.mxu0 %v1316_v52 }
  0x3c   :  { %1138 = vmatprep.subr.bf16.mxu1 %v1317_v53  ;;  %1211 = vmatprep.subr.bf16.mxu0 %v1348_v24 }
  0x3d   :  { %1213 = vmatprep.mubr.msk.bf16.mxu0 %vm1349_vm0, %v1348_v24 }
  0x3f   :  { %1139 = vmatpush3.bf16.msra.mxu1 %v1318_v54  ;;  %1212 = vmatpush3.bf16.msra.mxu0 %v1322_v55 }
  0x42   :  { %688 = vmatmul.mubr.bf16.vlgmr.msra.gmra.mrb[12].mxu1 %v1319_v56  ;;  %1214 = vmatmul.mubr.bf16.vlgmr.msra.gmra.mrb[16].mxu0 %v1323_v57  ;;  %v1636_v56 = vld [vmem:[%s1683_s2] ss:$0 sm:$0xff] }
  0x43   :  { %695 = vmatprep.mubr.bf16.mxu1 %v1324_v58  ;;  %1217 = vmatprep.mubr.msk.bf16.mxu0 %vm1349_vm0, %v1348_v24 }
  0x4a   :  { %696 = vmatmul.mubr.bf16.gmra.mrb[16].mxu1 %v1326_v59  ;;  %1218 = vmatmul.mubr.bf16.gmra.mrb[20].mxu0 %v1327_v60 }
  0x4b   :  { %703 = vmatprep.mubr.bf16.mxu1 %v1328_v61  ;;  %1221 = vmatprep.mubr.msk.bf16.mxu0 %vm1349_vm0, %v1348_v24 }
  0x52   :  { %704 = vmatmul.mubr.bf16.gmra.mrb[20].mxu1 %v1330_v62  ;;  %1222 = vmatmul.mubr.bf16.gmra.mrb[24].mxu0 %v1331_v63 }
  0x53   :  { %711 = vmatprep.mubr.bf16.mxu1 %v1332_v0  ;;  %1225 = vmatprep.mubr.msk.bf16.mxu0 %vm1349_vm0, %v1348_v24 }
  0x5a   :  { %712 = vmatmul.mubr.bf16.gmra.mrb[24].mxu1 %v1334_v1  ;;  %1226 = vmatmul.mubr.bf16.gmra.mrb[28].mxu0 %v1335_v2 }
  0x5b   :  { %719 = vmatprep.mubr.bf16.mxu1 %v1336_v3  ;;  %1229 = vmatprep.mubr.msk.bf16.mxu0 %vm1349_vm0, %v1348_v24 }
  0x62   :  { %720 = vmatmul.mubr.bf16.gmra.mrb[28].mxu1 %v1338_v4  ;;  %1230 = vmatmul.mubr.bf16.gmra.mrb[32].mxu0 %v1339_v5 }
  0x63   :  { %727 = vmatprep.mubr.bf16.mxu1 %v1340_v6  ;;  %1233 = vmatprep.mubr.msk.bf16.mxu0 %vm1349_vm0, %v1348_v24 }
  0x6a   :  { %728 = vmatmul.mubr.bf16.gmra.mrb[32].mxu1 %v1342_v7  ;;  %1234 = vmatmul.mubr.bf16.gmra.mrb[36].mxu0 %v1343_v8 }
  0x6b   :  { %735 = vmatprep.mubr.bf16.mxu1 %v1344_v9  ;;  %1237 = vmatprep.mubr.msk.bf16.mxu0 %vm1349_vm0, %v1348_v24 }
  0x72   :  { %736 = vmatmul.mubr.bf16.gmra.mrb[36].mxu1 %v1346_v10  ;;  %1238 = vmatmul.mubr.bf16.gmra.mrb[40].mxu0 %v1347_v11 }
  0xf5   :  { %v1106_v12 = vpop.f32.mrb[0].mxu1  ;;  %v1082_v13 = vpop.f32.mrb[0].mxu0 }
  0xf6   :  { %v1107_v14 = vpop.f32.mrb[1].mxu1  ;;  %v1083_v15 = vpop.f32.mrb[1].mxu0 }
  0xf7   :  { %v1617_v16 = vadd.f32 %v1107_v14, %v1106_v12  ;;  %v1109_v17 = vpop.f32.mrb[2].mxu1  ;;  %v1084_v18 = vadd.f32 %v1083_v15, %v1082_v13  ;;  %v1085_v19 = vpop.f32.mrb[2].mxu0 }
  0xf8   :  { %v1110_v20 = vpop.f32.mrb[3].mxu1  ;;  %v1086_v21 = vpop.f32.mrb[3].mxu0 }
  0xf9   :  { %v1619_v22 = vadd.f32 %v1110_v20, %v1109_v17  ;;  %v1087_v23 = vadd.f32 %v1086_v21, %v1085_v19  ;;  %v601_v59 = vadd.f32 %v1084_v18, %v1636_v56 }
  0xfb   :  { %v604_v1 = vadd.f32 %v1087_v23, %v1636_v56 }
  0xfd   :  { %v1088_v24 = vpop.f32.mrb[4].mxu0  ;;  %v1112_v25 = vpop.f32.mrb[4].mxu1 }
  0xfe   :  { %v1089_v26 = vpop.f32.mrb[5].mxu0  ;;  %v1113_v27 = vpop.f32.mrb[5].mxu1 }
  0xff   :  { %v1090_v28 = vadd.f32 %v1089_v26, %v1088_v24  ;;  %v1091_v29 = vpop.f32.mrb[6].mxu0  ;;  %v1621_v30 = vadd.f32 %v1113_v27, %v1112_v25  ;;  %v1115_v31 = vpop.f32.mrb[6].mxu1 }
 0x100   :  { %v1092_v32 = vpop.f32.mrb[7].mxu0  ;;  %v1116_v33 = vpop.f32.mrb[7].mxu1 }
 0x101   :  { %v1093_v34 = vadd.f32 %v1092_v32, %v1091_v29  ;;  %v1623_v35 = vadd.f32 %v1116_v33, %v1115_v31  ;;  %v609_v11 = vadd.f32 %v1090_v28, %v1636_v56 }
 0x103   :  { %v612_v20 = vadd.f32 %v1093_v34, %v1636_v56 }
 0x105   :  { %v1094_v36 = vpop.f32.mrb[8].mxu0  ;;  %v1118_v37 = vpop.f32.mrb[8].mxu1 }
 0x106   :  { %v1095_v38 = vpop.f32.mrb[9].mxu0  ;;  %v1119_v39 = vpop.f32.mrb[9].mxu1 }
 0x107   :  { %v1096_v40 = vadd.f32 %v1095_v38, %v1094_v36  ;;  %v1097_v41 = vpop.f32.mrb[10].mxu0  ;;  %v1625_v42 = vadd.f32 %v1119_v39, %v1118_v37  ;;  %v1121_v43 = vpop.f32.mrb[10].mxu1 }
 0x108   :  { %v1098_v44 = vpop.f32.mrb[11].mxu0  ;;  %v1122_v45 = vpop.f32.mrb[11].mxu1 }
 0x109   :  { %v1099_v46 = vadd.f32 %v1098_v44, %v1097_v41  ;;  %v1627_v47 = vadd.f32 %v1122_v45, %v1121_v43  ;;  %v617_v33 = vadd.f32 %v1096_v40, %v1636_v56 }
 0x10b   :  { %v620_v44 = vadd.f32 %v1099_v46, %v1636_v56 }
 0x10d   :  { %v1100_v48 = vpop.f32.mrb[12].mxu0 }
 0x10e   :  { %v1101_v49 = vpop.f32.mrb[13].mxu0 }
 0x10f   :  { %v1629_v50 = vadd.f32 %v1101_v49, %v1100_v48  ;;  %v1103_v51 = vpop.f32.mrb[14].mxu0 }
 0x110   :  { %v1104_v52 = vpop.f32.mrb[15].mxu0 }
 0x111   :  { %v1631_v53 = vadd.f32 %v1104_v52, %v1103_v51 }
 0x115   :  { %v1140_v54 = vpop.f32.mrb[12].mxu1  ;;  %v778_v55 = vpop.f32.mrb[16].mxu0 }
 0x116   :  { %v1141_v57 = vpop.f32.mrb[13].mxu1  ;;  %v1215_v58 = vpop.f32.mrb[17].mxu0 }
 0x117   :  { %v1142_v60 = vadd.f32 %v1141_v57, %v1140_v54  ;;  %v1143_v61 = vpop.f32.mrb[14].mxu1  ;;  %v781_v62 = vpop.f32.mrb[18].mxu0 }
 0x118   :  { %v1144_v63 = vpop.f32.mrb[15].mxu1  ;;  %v1216_v0 = vpop.f32.mrb[19].mxu0 }
 0x119   :  { %v690_v2 = vadd.f32 %v1142_v60, %v601_v59  ;;  %v1145_v3 = vadd.f32 %v1144_v63, %v1143_v61  ;;  %v625_v59 = vadd.f32 %v1629_v50, %v1636_v56 }
 0x11b   :  { %v779_v4 = vadd.f32 %v778_v55, %v690_v2  ;;  %v693_v5 = vadd.f32 %v1145_v3, %v604_v1  ;;  %v628_v2 = vadd.f32 %v1631_v53, %v1636_v56 }
 0x11d   :  { %v782_v6 = vadd.f32 %v781_v62, %v693_v5  ;;  %v1146_v7 = vpop.f32.mrb[16].mxu1  ;;  %v786_v8 = vpop.f32.mrb[20].mxu0  ;;  %v833_v12 = vmax.f32 %v779_v4, 0.0 }
 0x11e   :  { %v1147_v9 = vpop.f32.mrb[17].mxu1  ;;  %v1219_v10 = vpop.f32.mrb[21].mxu0 }
 0x11f   :  { %v834_v13 = vmax.f32 %v782_v6, 0.0  ;;  %v1148_v14 = vadd.f32 %v1147_v9, %v1146_v7  ;;  %v1149_v15 = vpop.f32.mrb[18].mxu1  ;;  %v789_v17 = vpop.f32.mrb[22].mxu0 }
 0x120   :  { %v1150_v18 = vpop.f32.mrb[19].mxu1  ;;  %v1220_v19 = vpop.f32.mrb[23].mxu0 }
 0x121   :  { %v1028_v21 = vpack.c.bf16 %v834_v13, %v833_v12  ;;  %v698_v23 = vadd.f32 %v1148_v14, %v609_v11  ;;  %v1151_v24 = vadd.f32 %v1150_v18, %v1149_v15  ;;  %v633_v12 = vadd.f32 %v1617_v16, %v1636_v56 }
 0x123   :  { %1029 = vst [vmem:[%s1684_s3] sm:$0xff] %v1028_v21   ;;  %v787_v25 = vadd.f32 %v786_v8, %v698_v23  ;;  %v701_v26 = vadd.f32 %v1151_v24, %v612_v20  ;;  %v636_v20 = vadd.f32 %v1619_v22, %v1636_v56 }
 0x125   :  { %v790_v27 = vadd.f32 %v789_v17, %v701_v26  ;;  %v1152_v28 = vpop.f32.mrb[20].mxu1  ;;  %v794_v29 = vpop.f32.mrb[24].mxu0  ;;  %v835_v36 = vmax.f32 %v787_v25, 0.0 }
 0x126   :  { %v1153_v31 = vpop.f32.mrb[21].mxu1  ;;  %v1223_v32 = vpop.f32.mrb[25].mxu0 }
 0x127   :  { %v836_v37 = vmax.f32 %v790_v27, 0.0  ;;  %v1154_v38 = vadd.f32 %v1153_v31, %v1152_v28  ;;  %v1155_v34 = vpop.f32.mrb[22].mxu1  ;;  %v797_v39 = vpop.f32.mrb[26].mxu0  ;;  %v641_v32 = vadd.f32 %v1621_v30, %v1636_v56 }
 0x128   :  { %v1156_v41 = vpop.f32.mrb[23].mxu1  ;;  %v1224_v43 = vpop.f32.mrb[27].mxu0 }
 0x129   :  { %v1033_v45 = vpack.c.bf16 %v836_v37, %v835_v36  ;;  %v706_v48 = vadd.f32 %v1154_v38, %v617_v33  ;;  %v1157_v49 = vadd.f32 %v1156_v41, %v1155_v34  ;;  %v644_v41 = vadd.f32 %v1623_v35, %v1636_v56 }
 0x12b   :  { %1060 = vst [vmem:[%s1684_s3 + $0x8] sm:$0xff] %v1033_v45   ;;  %v795_v51 = vadd.f32 %v794_v29, %v706_v48  ;;  %v709_v52 = vadd.f32 %v1157_v49, %v620_v44 }
 0x12d   :  { %v798_v54 = vadd.f32 %v797_v39, %v709_v52  ;;  %v1158_v40 = vpop.f32.mrb[24].mxu1  ;;  %v802_v55 = vpop.f32.mrb[28].mxu0  ;;  %v837_v60 = vmax.f32 %v795_v51, 0.0 }
 0x12e   :  { %v1159_v57 = vpop.f32.mrb[25].mxu1  ;;  %v1227_v58 = vpop.f32.mrb[29].mxu0 }
 0x12f   :  { %v838_v61 = vmax.f32 %v798_v54, 0.0  ;;  %v1160_v46 = vadd.f32 %v1159_v57, %v1158_v40  ;;  %v1161_v62 = vpop.f32.mrb[26].mxu1  ;;  %v805_v63 = vpop.f32.mrb[30].mxu0 }
 0x130   :  { %v1162_v0 = vpop.f32.mrb[27].mxu1  ;;  %v1228_v1 = vpop.f32.mrb[31].mxu0 }
 0x131   :  { %v1038_v3 = vpack.c.bf16 %v838_v61, %v837_v60  ;;  %v714_v4 = vadd.f32 %v1160_v46, %v625_v59  ;;  %v1163_v5 = vadd.f32 %v1162_v0, %v1161_v62  ;;  %v652_v62 = vadd.f32 %v1627_v47, %v1636_v56 }
 0x133   :  { %1061 = vst [vmem:[%s1684_s3 + $0x10] sm:$0xff] %v1038_v3   ;;  %v803_v6 = vadd.f32 %v802_v55, %v714_v4  ;;  %v717_v7 = vadd.f32 %v1163_v5, %v628_v2  ;;  %v649_v55 = vadd.f32 %v1625_v42, %v1636_v56 }
 0x135   :  { %v806_v50 = vadd.f32 %v805_v63, %v717_v7  ;;  %v1164_v8 = vpop.f32.mrb[28].mxu1  ;;  %v810_v9 = vpop.f32.mrb[32].mxu0  ;;  %v839_v13 = vmax.f32 %v803_v6, 0.0 }
 0x136   :  { %v1165_v10 = vpop.f32.mrb[29].mxu1  ;;  %v1231_v11 = vpop.f32.mrb[33].mxu0 }
 0x137   :  { %v840_v14 = vmax.f32 %v806_v50, 0.0  ;;  %v1166_v53 = vadd.f32 %v1165_v10, %v1164_v8  ;;  %v1167_v15 = vpop.f32.mrb[30].mxu1  ;;  %v813_v17 = vpop.f32.mrb[34].mxu0 }
 0x138   :  { %v1168_v18 = vpop.f32.mrb[31].mxu1  ;;  %v1232_v19 = vpop.f32.mrb[35].mxu0 }
 0x139   :  { %v1043_v21 = vpack.c.bf16 %v840_v14, %v839_v13  ;;  %v722_v23 = vadd.f32 %v1166_v53, %v633_v12  ;;  %v1169_v24 = vadd.f32 %v1168_v18, %v1167_v15 }
 0x13b   :  { %1062 = vst [vmem:[%s1684_s3 + $0x18] sm:$0xff] %v1043_v21   ;;  %v811_v25 = vadd.f32 %v810_v9, %v722_v23  ;;  %v725_v26 = vadd.f32 %v1169_v24, %v636_v20 }
 0x13d   :  { %v814_v16 = vadd.f32 %v813_v17, %v725_v26  ;;  %v1170_v27 = vpop.f32.mrb[32].mxu1  ;;  %v818_v28 = vpop.f32.mrb[36].mxu0  ;;  %v841_v33 = vmax.f32 %v811_v25, 0.0 }
 0x13e   :  { %v1171_v29 = vpop.f32.mrb[33].mxu1  ;;  %v1235_v31 = vpop.f32.mrb[37].mxu0 }
 0x13f   :  { %v842_v36 = vmax.f32 %v814_v16, 0.0  ;;  %v1172_v22 = vadd.f32 %v1171_v29, %v1170_v27  ;;  %v1173_v37 = vpop.f32.mrb[34].mxu1  ;;  %v821_v38 = vpop.f32.mrb[38].mxu0 }
 0x140   :  { %v1174_v34 = vpop.f32.mrb[35].mxu1  ;;  %v1236_v39 = vpop.f32.mrb[39].mxu0 }
 0x141   :  { %v1048_v43 = vpack.c.bf16 %v842_v36, %v841_v33  ;;  %v730_v44 = vadd.f32 %v1172_v22, %v641_v32  ;;  %v1175_v45 = vadd.f32 %v1174_v34, %v1173_v37 }
 0x143   :  { %1063 = vst [vmem:[%s1684_s3 + $0x20] sm:$0xff] %v1048_v43   ;;  %v819_v48 = vadd.f32 %v818_v28, %v730_v44  ;;  %v733_v49 = vadd.f32 %v1175_v45, %v644_v41 }
 0x145   :  { %v822_v30 = vadd.f32 %v821_v38, %v733_v49  ;;  %v1176_v51 = vpop.f32.mrb[36].mxu1  ;;  %v826_v52 = vpop.f32.mrb[40].mxu0  ;;  %v843_v57 = vmax.f32 %v819_v48, 0.0 }
 0x146   :  { %v1177_v54 = vpop.f32.mrb[37].mxu1  ;;  %v1239_v40 = vpop.f32.mrb[41].mxu0 }
 0x147   :  { %v844_v58 = vmax.f32 %v822_v30, 0.0  ;;  %v1178_v35 = vadd.f32 %v1177_v54, %v1176_v51  ;;  %v1179_v59 = vpop.f32.mrb[38].mxu1  ;;  %v829_v60 = vpop.f32.mrb[42].mxu0 }
 0x148   :  { %v1180_v61 = vpop.f32.mrb[39].mxu1  ;;  %v1240_v46 = vpop.f32.mrb[43].mxu0 }
 0x149   :  { %v1053_v63 = vpack.c.bf16 %v844_v58, %v843_v57  ;;  %v738_v0 = vadd.f32 %v1178_v35, %v649_v55  ;;  %v1181_v1 = vadd.f32 %v1180_v61, %v1179_v59 }
 0x14b   :  { %1064 = vst [vmem:[%s1684_s3 + $0x28] sm:$0xff] %v1053_v63   ;;  %v827_v2 = vadd.f32 %v826_v52, %v738_v0  ;;  %v741_v3 = vadd.f32 %v1181_v1, %v652_v62 }
 0x14d   :  { %v830_v42 = vadd.f32 %v829_v60, %v741_v3  ;;  %v845_v4 = vmax.f32 %v827_v2, 0.0 }
 0x14f   :  { %v846_v5 = vmax.f32 %v830_v42, 0.0 }
 0x151   :  { %v1058_v6 = vpack.c.bf16 %v846_v5, %v845_v4 }
 0x153   :  { %1065 = vst [vmem:[%s1684_s3 + $0x30] sm:$0xff] %v1058_v6  }

// kernel: marionet_forward.7
= control target key start
LH: loop header
LB: loop body
LE: loop exit
PB: predicated region body
PF: predicated region fallthrough
CT: control target
= control target key end

     0   :  { %s11366_s1 = inlined_call_operand.vmem [shape: bf16[3200,512], index: 1, kind: input, shape index: {}]   ;;  %s11367_s0 = inlined_call_operand.vmem [shape: bf16[16,3200], index: 0, kind: input, shape index: {}]   ;;  %s11368_s3 = inlined_call_operand.vmem [shape: bf16[512,128], index: 3, kind: input, shape index: {}]   ;;  %s11369_s2 = inlined_call_operand.vmem [shape: f32[1,512], index: 2, kind: input, shape index: {}]   ;;  %s11370_s4 = inlined_call_operand.vmem [shape: f32[1,128], index: 4, kind: input, shape index: {}]   ;;  %s11371_s5 = inlined_call_operand.vmem [shape: f32[16,128], index: 5, kind: output, shape index: {}]  }
   0x1   :  { %v7483_v0 = vld [vmem:[%s11366_s1 + $0x4] ss:$16 sps:$4 sm:$0xff]   ;;  %v7485_v1 = vld [vmem:[%s11366_s1 + $0xc] ss:$16 sps:$4 sm:$0xff]   ;;  %v7487_v2 = vld [vmem:[%s11366_s1] ss:$16 sps:$4 sm:$0xff]  }
   0x2   :  { %4995 = vmatprep.subr.bf16.mxu0 %v7483_v0  ;;  %v7488_v3 = vld [vmem:[%s11366_s1 + $0x8] ss:$16 sps:$4 sm:$0xff]   ;;  %5554 = vmatprep.subr.bf16.mxu1 %v7485_v1  ;;  %v7489_v4 = vld [vmem:[%s11366_s1 + $0x24] ss:$16 sps:$4 sm:$0xff]   ;;  %v7491_v5 = vld [vmem:[%s11366_s1 + $0x2c] ss:$16 sps:$4 sm:$0xff]  }
   0x3   :  { %4996 = vmatpush1.bf16.msra.mxu0 %v7487_v2  ;;  %5555 = vmatpush1.bf16.msra.mxu1 %v7488_v3  ;;  %v7493_v6 = vld [vmem:[%s11366_s1 + $0x20] ss:$16 sps:$4 sm:$0xff]   ;;  %v7494_v7 = vld [vmem:[%s11366_s1 + $0x28] ss:$16 sps:$4 sm:$0xff]   ;;  %v7495_v8 = vld [vmem:[%s11366_s1 + $0x44] ss:$16 sps:$4 sm:$0xff]  }
   0x4   :  { %4997 = vmatprep.subr.bf16.mxu0 %v7489_v4  ;;  %5556 = vmatprep.subr.bf16.mxu1 %v7491_v5  ;;  %v7497_v9 = vld [vmem:[%s11366_s1 + $0x4c] ss:$16 sps:$4 sm:$0xff]   ;;  %v7499_v10 = vld [vmem:[%s11366_s1 + $0x40] ss:$16 sps:$4 sm:$0xff]   ;;  %v7500_v11 = vld [vmem:[%s11366_s1 + $0x48] ss:$16 sps:$4 sm:$0xff]  }
   0x5   :  { %v7501_v12 = vld [vmem:[%s11366_s1 + $0x64] ss:$16 sps:$4 sm:$0xff]   ;;  %v7503_v13 = vld [vmem:[%s11366_s1 + $0x6c] ss:$16 sps:$4 sm:$0xff]   ;;  %v7505_v14 = vld [vmem:[%s11366_s1 + $0x60] ss:$16 sps:$4 sm:$0xff]  }
   0x6   :  { %v7506_v15 = vld [vmem:[%s11366_s1 + $0x68] ss:$16 sps:$4 sm:$0xff]   ;;  %v7507_v16 = vld [vmem:[%s11366_s1 + $0x84] ss:$16 sps:$4 sm:$0xff]   ;;  %v7509_v17 = vld [vmem:[%s11366_s1 + $0x8c] ss:$16 sps:$4 sm:$0xff]  }
   0x7   :  { %4998 = vmatpush1.bf16.msra.mxu0 %v7493_v6  ;;  %5557 = vmatpush1.bf16.msra.mxu1 %v7494_v7  ;;  %v7511_v18 = vld [vmem:[%s11366_s1 + $0x80] ss:$16 sps:$4 sm:$0xff]   ;;  %v7512_v19 = vld [vmem:[%s11366_s1 + $0x88] ss:$16 sps:$4 sm:$0xff]   ;;  %v7513_v20 = vld [vmem:[%s11366_s1 + $0xa4] ss:$16 sps:$4 sm:$0xff]  }
   0x8   :  { %4999 = vmatprep.subr.bf16.mxu0 %v7495_v8  ;;  %5558 = vmatprep.subr.bf16.mxu1 %v7497_v9  ;;  %v7515_v21 = vld [vmem:[%s11366_s1 + $0xac] ss:$16 sps:$4 sm:$0xff]   ;;  %v7517_v22 = vld [vmem:[%s11366_s1 + $0xa0] ss:$16 sps:$4 sm:$0xff]   ;;  %v7518_v23 = vld [vmem:[%s11366_s1 + $0xa8] ss:$16 sps:$4 sm:$0xff]  }
   0x9   :  { %v7519_v24 = vld [vmem:[%s11366_s1 + $0xc4] ss:$16 sps:$4 sm:$0xff]   ;;  %v7521_v25 = vld [vmem:[%s11366_s1 + $0xcc] ss:$16 sps:$4 sm:$0xff]   ;;  %v7523_v26 = vld [vmem:[%s11366_s1 + $0xc0] ss:$16 sps:$4 sm:$0xff]  }
   0xa   :  { %v7524_v27 = vld [vmem:[%s11366_s1 + $0xc8] ss:$16 sps:$4 sm:$0xff]   ;;  %v7525_v28 = vld [vmem:[%s11366_s1 + $0xe4] ss:$16 sps:$4 sm:$0xff]   ;;  %v7527_v29 = vld [vmem:[%s11366_s1 + $0xec] ss:$16 sps:$4 sm:$0xff]  }
   0xb   :  { %5000 = vmatpush1.bf16.msra.mxu0 %v7499_v10  ;;  %5559 = vmatpush1.bf16.msra.mxu1 %v7500_v11  ;;  %v7529_v30 = vld [vmem:[%s11366_s1 + $0xe0] ss:$16 sps:$4 sm:$0xff]   ;;  %v7530_v31 = vld [vmem:[%s11366_s1 + $0xe8] ss:$16 sps:$4 sm:$0xff]   ;;  %v7531_v32 = vld [vmem:[%s11366_s1 + $0x104] ss:$16 sps:$4 sm:$0xff]  }
   0xc   :  { %5001 = vmatprep.subr.bf16.mxu0 %v7501_v12  ;;  %5560 = vmatprep.subr.bf16.mxu1 %v7503_v13  ;;  %v7533_v33 = vld [vmem:[%s11366_s1 + $0x10c] ss:$16 sps:$4 sm:$0xff]   ;;  %v7535_v34 = vld [vmem:[%s11366_s1 + $0x100] ss:$16 sps:$4 sm:$0xff]   ;;  %v7536_v35 = vld [vmem:[%s11366_s1 + $0x108] ss:$16 sps:$4 sm:$0xff]  }
   0xd   :  { %v7537_v36 = vld [vmem:[%s11366_s1 + $0x124] ss:$16 sps:$4 sm:$0xff]   ;;  %v7539_v37 = vld [vmem:[%s11366_s1 + $0x12c] ss:$16 sps:$4 sm:$0xff]   ;;  %v7541_v38 = vld [vmem:[%s11366_s1 + $0x120] ss:$16 sps:$4 sm:$0xff]  }
   0xe   :  { %v7542_v39 = vld [vmem:[%s11366_s1 + $0x128] ss:$16 sps:$4 sm:$0xff]   ;;  %v7543_v40 = vld [vmem:[%s11366_s1 + $0x144] ss:$16 sps:$4 sm:$0xff]   ;;  %v7545_v41 = vld [vmem:[%s11366_s1 + $0x14c] ss:$16 sps:$4 sm:$0xff]  }
   0xf   :  { %5002 = vmatpush1.bf16.msra.mxu0 %v7505_v14  ;;  %5561 = vmatpush1.bf16.msra.mxu1 %v7506_v15  ;;  %v7547_v42 = vld [vmem:[%s11366_s1 + $0x140] ss:$16 sps:$4 sm:$0xff]   ;;  %v7548_v43 = vld [vmem:[%s11366_s1 + $0x148] ss:$16 sps:$4 sm:$0xff]   ;;  %v7549_v44 = vld [vmem:[%s11366_s1 + $0x164] ss:$16 sps:$4 sm:$0xff]  }
  0x10   :  { %5003 = vmatprep.subr.bf16.mxu0 %v7507_v16  ;;  %5562 = vmatprep.subr.bf16.mxu1 %v7509_v17  ;;  %v7551_v45 = vld [vmem:[%s11366_s1 + $0x16c] ss:$16 sps:$4 sm:$0xff]   ;;  %v7553_v46 = vld [vmem:[%s11366_s1 + $0x160] ss:$16 sps:$4 sm:$0xff]   ;;  %v7554_v47 = vld [vmem:[%s11366_s1 + $0x168] ss:$16 sps:$4 sm:$0xff]  }
  0x11   :  { %v7581_v48 = vld [vmem:[%s11367_s0 + $0x4] ss:$100 sps:$4 sm:$0xff]   ;;  %v7557_v50 = vld [vmem:[%s11366_s1 + $0x18c] ss:$16 sps:$4 sm:$0xff]   ;;  %v7559_v51 = vld [vmem:[%s11366_s1 + $0x180] ss:$16 sps:$4 sm:$0xff]  }
  0x12   :  { %v7555_v49 = vld [vmem:[%s11366_s1 + $0x184] ss:$16 sps:$4 sm:$0xff]   ;;  %5027 = vmatprep.mubr.bf16.mxu0 %v7581_v48  ;;  %5586 = vmatprep.mubr.bf16.mxu1 %v7581_v48  ;;  %v7560_v52 = vld [vmem:[%s11366_s1 + $0x188] ss:$16 sps:$4 sm:$0xff]   ;;  %v7563_v54 = vld [vmem:[%s11366_s1 + $0x1ac] ss:$16 sps:$4 sm:$0xff]  }
  0x13   :  { %5004 = vmatpush1.bf16.msra.mxu0 %v7511_v18  ;;  %5563 = vmatpush1.bf16.msra.mxu1 %v7512_v19  ;;  %v7561_v53 = vld [vmem:[%s11366_s1 + $0x1a4] ss:$16 sps:$4 sm:$0xff]   ;;  %v7565_v55 = vld [vmem:[%s11366_s1 + $0x1a0] ss:$16 sps:$4 sm:$0xff]   ;;  %v7566_v56 = vld [vmem:[%s11366_s1 + $0x1a8] ss:$16 sps:$4 sm:$0xff]  }
  0x14   :  { %5005 = vmatprep.subr.bf16.mxu0 %v7513_v20  ;;  %5564 = vmatprep.subr.bf16.mxu1 %v7515_v21  ;;  %v7567_v57 = vld [vmem:[%s11366_s1 + $0x1c4] ss:$16 sps:$4 sm:$0xff]   ;;  %v7569_v58 = vld [vmem:[%s11366_s1 + $0x1cc] ss:$16 sps:$4 sm:$0xff]   ;;  %v7571_v59 = vld [vmem:[%s11366_s1 + $0x1c0] ss:$16 sps:$4 sm:$0xff]  }
  0x15   :  { %v7572_v60 = vld [vmem:[%s11366_s1 + $0x1c8] ss:$16 sps:$4 sm:$0xff]   ;;  %v7573_v61 = vld [vmem:[%s11366_s1 + $0x1e4] ss:$16 sps:$4 sm:$0xff]   ;;  %v7575_v62 = vld [vmem:[%s11366_s1 + $0x1ec] ss:$16 sps:$4 sm:$0xff]  }
  0x16   :  { %v7577_v63 = vld [vmem:[%s11366_s1 + $0x1e0] ss:$16 sps:$4 sm:$0xff]   ;;  %v7578_v0 = vld [vmem:[%s11366_s1 + $0x1e8] ss:$16 sps:$4 sm:$0xff]   ;;  %v7584_v1 = vld [vmem:[%s11366_s1 + $0x204] ss:$16 sps:$4 sm:$0xff]  }
  0x17   :  { %5006 = vmatpush1.bf16.msra.mxu0 %v7517_v22  ;;  %5565 = vmatpush1.bf16.msra.mxu1 %v7518_v23  ;;  %v7587_v2 = vld [vmem:[%s11366_s1 + $0x20c] ss:$16 sps:$4 sm:$0xff]   ;;  %v7579_v3 = vld [vmem:[%s11367_s0] ss:$100 sps:$4 sm:$0xff]   ;;  %v7585_v5 = vld [vmem:[%s11366_s1 + $0x208] ss:$16 sps:$4 sm:$0xff]  }
  0x18   :  { %5007 = vmatprep.subr.bf16.mxu0 %v7519_v24  ;;  %5566 = vmatprep.subr.bf16.mxu1 %v7521_v25  ;;  %v7582_v4 = vld [vmem:[%s11366_s1 + $0x200] ss:$16 sps:$4 sm:$0xff]   ;;  %v7590_v6 = vld [vmem:[%s11366_s1 + $0x224] ss:$16 sps:$4 sm:$0xff]   ;;  %v7593_v7 = vld [vmem:[%s11366_s1 + $0x22c] ss:$16 sps:$4 sm:$0xff]  }
  0x19   :  { %v7588_v8 = vld [vmem:[%s11366_s1 + $0x220] ss:$16 sps:$4 sm:$0xff]   ;;  %v7591_v9 = vld [vmem:[%s11366_s1 + $0x228] ss:$16 sps:$4 sm:$0xff]   ;;  %v7596_v10 = vld [vmem:[%s11366_s1 + $0x244] ss:$16 sps:$4 sm:$0xff]  }
  0x1a   :  { %v7599_v11 = vld [vmem:[%s11366_s1 + $0x24c] ss:$16 sps:$4 sm:$0xff]   ;;  %v7594_v12 = vld [vmem:[%s11366_s1 + $0x240] ss:$16 sps:$4 sm:$0xff]   ;;  %v7597_v13 = vld [vmem:[%s11366_s1 + $0x248] ss:$16 sps:$4 sm:$0xff]  }
  0x1b   :  { %5008 = vmatpush1.bf16.msra.mxu0 %v7523_v26  ;;  %5567 = vmatpush1.bf16.msra.mxu1 %v7524_v27  ;;  %v7602_v14 = vld [vmem:[%s11366_s1 + $0x264] ss:$16 sps:$4 sm:$0xff]   ;;  %v7605_v15 = vld [vmem:[%s11366_s1 + $0x26c] ss:$16 sps:$4 sm:$0xff]   ;;  %v7600_v16 = vld [vmem:[%s11366_s1 + $0x260] ss:$16 sps:$4 sm:$0xff]  }
  0x1c   :  { %5009 = vmatprep.subr.bf16.mxu0 %v7525_v28  ;;  %5568 = vmatprep.subr.bf16.mxu1 %v7527_v29  ;;  %v7603_v17 = vld [vmem:[%s11366_s1 + $0x268] ss:$16 sps:$4 sm:$0xff]   ;;  %v7608_v18 = vld [vmem:[%s11366_s1 + $0x284] ss:$16 sps:$4 sm:$0xff]   ;;  %v7611_v19 = vld [vmem:[%s11366_s1 + $0x28c] ss:$16 sps:$4 sm:$0xff]  }
  0x1d   :  { %v7606_v20 = vld [vmem:[%s11366_s1 + $0x280] ss:$16 sps:$4 sm:$0xff]   ;;  %v7609_v21 = vld [vmem:[%s11366_s1 + $0x288] ss:$16 sps:$4 sm:$0xff]   ;;  %v7614_v22 = vld [vmem:[%s11366_s1 + $0x2a4] ss:$16 sps:$4 sm:$0xff]  }
  0x1e   :  { %v7617_v23 = vld [vmem:[%s11366_s1 + $0x2ac] ss:$16 sps:$4 sm:$0xff]   ;;  %v7612_v24 = vld [vmem:[%s11366_s1 + $0x2a0] ss:$16 sps:$4 sm:$0xff]   ;;  %v7615_v25 = vld [vmem:[%s11366_s1 + $0x2a8] ss:$16 sps:$4 sm:$0xff]  }
  0x1f   :  { %5010 = vmatpush1.bf16.msra.mxu0 %v7529_v30  ;;  %5569 = vmatpush1.bf16.msra.mxu1 %v7530_v31  ;;  %v7620_v26 = vld [vmem:[%s11366_s1 + $0x2c4] ss:$16 sps:$4 sm:$0xff]   ;;  %v7623_v27 = vld [vmem:[%s11366_s1 + $0x2cc] ss:$16 sps:$4 sm:$0xff]   ;;  %v7618_v28 = vld [vmem:[%s11366_s1 + $0x2c0] ss:$16 sps:$4 sm:$0xff]  }
  0x20   :  { %5011 = vmatprep.subr.bf16.mxu0 %v7531_v32  ;;  %5570 = vmatprep.subr.bf16.mxu1 %v7533_v33  ;;  %v7621_v29 = vld [vmem:[%s11366_s1 + $0x2c8] ss:$16 sps:$4 sm:$0xff]   ;;  %v7680_v30 = vld [vmem:[%s11367_s0 + $0xc] ss:$100 sps:$4 sm:$0xff]   ;;  %v7626_v31 = vld [vmem:[%s11366_s1 + $0x2e4] ss:$16 sps:$4 sm:$0xff]  }
  0x21   :  { %v7629_v32 = vld [vmem:[%s11366_s1 + $0x2ec] ss:$16 sps:$4 sm:$0xff]   ;;  %v7624_v33 = vld [vmem:[%s11366_s1 + $0x2e0] ss:$16 sps:$4 sm:$0xff]  }
  0x22   :  { %v7653_v48 = vld [vmem:[%s11366_s1 + $0x36c] ss:$16 sps:$4 sm:$0xff]  }
  0x23   :  { %5012 = vmatpush1.bf16.msra.mxu0 %v7535_v34  ;;  %5571 = vmatpush1.bf16.msra.mxu1 %v7536_v35  ;;  %v7627_v34 = vld [vmem:[%s11366_s1 + $0x2e8] ss:$16 sps:$4 sm:$0xff]   ;;  %v7632_v35 = vld [vmem:[%s11366_s1 + $0x304] ss:$16 sps:$4 sm:$0xff]  }
  0x24   :  { %5013 = vmatprep.subr.bf16.mxu0 %v7537_v36  ;;  %5572 = vmatprep.subr.bf16.mxu1 %v7539_v37  ;;  %v7635_v36 = vld [vmem:[%s11366_s1 + $0x30c] ss:$16 sps:$4 sm:$0xff]   ;;  %v7630_v37 = vld [vmem:[%s11366_s1 + $0x300] ss:$16 sps:$4 sm:$0xff]  }
  0x27   :  { %5014 = vmatpush1.bf16.msra.mxu0 %v7541_v38  ;;  %5573 = vmatpush1.bf16.msra.mxu1 %v7542_v39  ;;  %v7633_v38 = vld [vmem:[%s11366_s1 + $0x308] ss:$16 sps:$4 sm:$0xff]   ;;  %v7638_v39 = vld [vmem:[%s11366_s1 + $0x324] ss:$16 sps:$4 sm:$0xff]  }
  0x28   :  { %5015 = vmatprep.subr.bf16.mxu0 %v7543_v40  ;;  %5574 = vmatprep.subr.bf16.mxu1 %v7545_v41  ;;  %v7641_v40 = vld [vmem:[%s11366_s1 + $0x32c] ss:$16 sps:$4 sm:$0xff]   ;;  %v7636_v41 = vld [vmem:[%s11366_s1 + $0x320] ss:$16 sps:$4 sm:$0xff]  }
  0x2b   :  { %5016 = vmatpush1.bf16.msra.mxu0 %v7547_v42  ;;  %5575 = vmatpush1.bf16.msra.mxu1 %v7548_v43  ;;  %v7639_v42 = vld [vmem:[%s11366_s1 + $0x328] ss:$16 sps:$4 sm:$0xff]   ;;  %v7644_v43 = vld [vmem:[%s11366_s1 + $0x344] ss:$16 sps:$4 sm:$0xff]  }
  0x2c   :  { %5017 = vmatprep.subr.bf16.mxu0 %v7549_v44  ;;  %5576 = vmatprep.subr.bf16.mxu1 %v7551_v45  ;;  %v7647_v44 = vld [vmem:[%s11366_s1 + $0x34c] ss:$16 sps:$4 sm:$0xff]   ;;  %v7642_v45 = vld [vmem:[%s11366_s1 + $0x340] ss:$16 sps:$4 sm:$0xff]  }
  0x2f   :  { %5018 = vmatpush1.bf16.msra.mxu0 %v7553_v46  ;;  %5577 = vmatpush1.bf16.msra.mxu1 %v7554_v47  ;;  %v7645_v46 = vld [vmem:[%s11366_s1 + $0x348] ss:$16 sps:$4 sm:$0xff]   ;;  %v7650_v47 = vld [vmem:[%s11366_s1 + $0x364] ss:$16 sps:$4 sm:$0xff]  }
  0x30   :  { %5019 = vmatprep.subr.bf16.mxu0 %v7555_v49  ;;  %5578 = vmatprep.subr.bf16.mxu1 %v7557_v50  ;;  %v7648_v49 = vld [vmem:[%s11366_s1 + $0x360] ss:$16 sps:$4 sm:$0xff]   ;;  %v7651_v50 = vld [vmem:[%s11366_s1 + $0x368] ss:$16 sps:$4 sm:$0xff]  }
  0x33   :  { %5020 = vmatpush1.bf16.msra.mxu0 %v7559_v51  ;;  %5579 = vmatpush1.bf16.msra.mxu1 %v7560_v52  ;;  %v7656_v51 = vld [vmem:[%s11366_s1 + $0x384] ss:$16 sps:$4 sm:$0xff]   ;;  %v7659_v52 = vld [vmem:[%s11366_s1 + $0x38c] ss:$16 sps:$4 sm:$0xff]  }
  0x34   :  { %5021 = vmatprep.subr.bf16.mxu0 %v7561_v53  ;;  %5580 = vmatprep.subr.bf16.mxu1 %v7563_v54  ;;  %v7654_v53 = vld [vmem:[%s11366_s1 + $0x380] ss:$16 sps:$4 sm:$0xff]   ;;  %v7657_v54 = vld [vmem:[%s11366_s1 + $0x388] ss:$16 sps:$4 sm:$0xff]  }
  0x37   :  { %5022 = vmatpush1.bf16.msra.mxu0 %v7565_v55  ;;  %5581 = vmatpush1.bf16.msra.mxu1 %v7566_v56  ;;  %v7662_v55 = vld [vmem:[%s11366_s1 + $0x3a4] ss:$16 sps:$4 sm:$0xff]   ;;  %v7665_v56 = vld [vmem:[%s11366_s1 + $0x3ac] ss:$16 sps:$4 sm:$0xff]  }
  0x38   :  { %5023 = vmatprep.subr.bf16.mxu0 %v7567_v57  ;;  %5582 = vmatprep.subr.bf16.mxu1 %v7569_v58  ;;  %v7660_v57 = vld [vmem:[%s11366_s1 + $0x3a0] ss:$16 sps:$4 sm:$0xff]   ;;  %v7663_v58 = vld [vmem:[%s11366_s1 + $0x3a8] ss:$16 sps:$4 sm:$0xff]  }
  0x3b   :  { %5024 = vmatpush1.bf16.msra.mxu0 %v7571_v59  ;;  %5583 = vmatpush1.bf16.msra.mxu1 %v7572_v60  ;;  %v7668_v59 = vld [vmem:[%s11366_s1 + $0x3c4] ss:$16 sps:$4 sm:$0xff]   ;;  %v7671_v60 = vld [vmem:[%s11366_s1 + $0x3cc] ss:$16 sps:$4 sm:$0xff]  }
  0x3c   :  { %5025 = vmatprep.subr.bf16.mxu0 %v7573_v61  ;;  %5584 = vmatprep.subr.bf16.mxu1 %v7575_v62  ;;  %v7666_v61 = vld [vmem:[%s11366_s1 + $0x3c0] ss:$16 sps:$4 sm:$0xff]   ;;  %v7669_v62 = vld [vmem:[%s11366_s1 + $0x3c8] ss:$16 sps:$4 sm:$0xff]  }
  0x3f   :  { %5026 = vmatpush1.bf16.msra.mxu0 %v7577_v63  ;;  %5585 = vmatpush1.bf16.msra.mxu1 %v7578_v0  ;;  %v7674_v63 = vld [vmem:[%s11366_s1 + $0x3e4] ss:$16 sps:$4 sm:$0xff]   ;;  %v7677_v0 = vld [vmem:[%s11366_s1 + $0x3ec] ss:$16 sps:$4 sm:$0xff]  }
  0x40   :  { %5038 = vmatprep.subr.bf16.mxu0 %v7584_v1  ;;  %5597 = vmatprep.subr.bf16.mxu1 %v7587_v2  ;;  %v7672_v1 = vld [vmem:[%s11366_s1 + $0x3e0] ss:$16 sps:$4 sm:$0xff]   ;;  %v7675_v2 = vld [vmem:[%s11366_s1 + $0x3e8] ss:$16 sps:$4 sm:$0xff]  }
  0x42   :  { %5028 = vmatmul.mubr.bf16.vlgmr.msra.gmra.mrb[0].mxu0 %v7579_v3  ;;  %5587 = vmatmul.mubr.bf16.vlgmr.msra.gmra.mrb[0].mxu1 %v7579_v3  ;;  %v7683_v3 = vld [vmem:[%s11366_s1 + $0x404] ss:$16 sps:$4 sm:$0xff]  }
  0x43   :  { %5039 = vmatpush1.bf16.msra.mxu0 %v7582_v4  ;;  %5598 = vmatpush1.bf16.msra.mxu1 %v7585_v5  ;;  %v7686_v4 = vld [vmem:[%s11366_s1 + $0x40c] ss:$16 sps:$4 sm:$0xff]  }
  0x44   :  { %5040 = vmatprep.subr.bf16.mxu0 %v7590_v6  ;;  %5599 = vmatprep.subr.bf16.mxu1 %v7593_v7  ;;  %v7678_v5 = vld [vmem:[%s11367_s0 + $0x8] ss:$100 sps:$4 sm:$0xff]   ;;  %v7681_v6 = vld [vmem:[%s11366_s1 + $0x400] ss:$16 sps:$4 sm:$0xff]  }
  0x45   :  { %5070 = vmatprep.mubr.bf16.mxu0 %v7680_v30  ;;  %5629 = vmatprep.mubr.bf16.mxu1 %v7680_v30  ;;  %v7684_v7 = vld [vmem:[%s11366_s1 + $0x408] ss:$16 sps:$4 sm:$0xff]   ;;  %v7722_v30 = vld [vmem:[%s11366_s1 + $0x4cc] ss:$16 sps:$4 sm:$0xff]  }
  0x47   :  { %5041 = vmatpush1.bf16.msra.mxu0 %v7588_v8  ;;  %5600 = vmatpush1.bf16.msra.mxu1 %v7591_v9  ;;  %v7689_v8 = vld [vmem:[%s11366_s1 + $0x424] ss:$16 sps:$4 sm:$0xff]   ;;  %v7692_v9 = vld [vmem:[%s11366_s1 + $0x42c] ss:$16 sps:$4 sm:$0xff]  }
  0x48   :  { %5042 = vmatprep.subr.bf16.mxu0 %v7596_v10  ;;  %5601 = vmatprep.subr.bf16.mxu1 %v7599_v11  ;;  %v7687_v10 = vld [vmem:[%s11366_s1 + $0x420] ss:$16 sps:$4 sm:$0xff]   ;;  %v7690_v11 = vld [vmem:[%s11366_s1 + $0x428] ss:$16 sps:$4 sm:$0xff]  }
  0x4b   :  { %5043 = vmatpush1.bf16.msra.mxu0 %v7594_v12  ;;  %5602 = vmatpush1.bf16.msra.mxu1 %v7597_v13  ;;  %v7779_v12 = vld [vmem:[%s11367_s0 + $0x14] ss:$100 sps:$4 sm:$0xff]  }
  0x4c   :  { %5044 = vmatprep.subr.bf16.mxu0 %v7602_v14  ;;  %5603 = vmatprep.subr.bf16.mxu1 %v7605_v15  ;;  %v7695_v13 = vld [vmem:[%s11366_s1 + $0x444] ss:$16 sps:$4 sm:$0xff]   ;;  %v7698_v14 = vld [vmem:[%s11366_s1 + $0x44c] ss:$16 sps:$4 sm:$0xff]   ;;  %v7693_v15 = vld [vmem:[%s11366_s1 + $0x440] ss:$16 sps:$4 sm:$0xff]  }
  0x4f   :  { %5045 = vmatpush1.bf16.msra.mxu0 %v7600_v16  ;;  %5604 = vmatpush1.bf16.msra.mxu1 %v7603_v17  ;;  %v7696_v16 = vld [vmem:[%s11366_s1 + $0x448] ss:$16 sps:$4 sm:$0xff]   ;;  %v7701_v17 = vld [vmem:[%s11366_s1 + $0x464] ss:$16 sps:$4 sm:$0xff]  }
  0x50   :  { %5046 = vmatprep.subr.bf16.mxu0 %v7608_v18  ;;  %5605 = vmatprep.subr.bf16.mxu1 %v7611_v19  ;;  %v7704_v18 = vld [vmem:[%s11366_s1 + $0x46c] ss:$16 sps:$4 sm:$0xff]   ;;  %v7699_v19 = vld [vmem:[%s11366_s1 + $0x460] ss:$16 sps:$4 sm:$0xff]  }
  0x53   :  { %5047 = vmatpush1.bf16.msra.mxu0 %v7606_v20  ;;  %5606 = vmatpush1.bf16.msra.mxu1 %v7609_v21  ;;  %v7702_v20 = vld [vmem:[%s11366_s1 + $0x468] ss:$16 sps:$4 sm:$0xff]   ;;  %v7707_v21 = vld [vmem:[%s11366_s1 + $0x484] ss:$16 sps:$4 sm:$0xff]  }
  0x54   :  { %5048 = vmatprep.subr.bf16.mxu0 %v7614_v22  ;;  %5607 = vmatprep.subr.bf16.mxu1 %v7617_v23  ;;  %v7710_v22 = vld [vmem:[%s11366_s1 + $0x48c] ss:$16 sps:$4 sm:$0xff]   ;;  %v7705_v23 = vld [vmem:[%s11366_s1 + $0x480] ss:$16 sps:$4 sm:$0xff]  }
  0x57   :  { %5049 = vmatpush1.bf16.msra.mxu0 %v7612_v24  ;;  %5608 = vmatpush1.bf16.msra.mxu1 %v7615_v25  ;;  %v7708_v24 = vld [vmem:[%s11366_s1 + $0x488] ss:$16 sps:$4 sm:$0xff]   ;;  %v7713_v25 = vld [vmem:[%s11366_s1 + $0x4a4] ss:$16 sps:$4 sm:$0xff]  }
  0x58   :  { %5050 = vmatprep.subr.bf16.mxu0 %v7620_v26  ;;  %5609 = vmatprep.subr.bf16.mxu1 %v7623_v27  ;;  %v7716_v26 = vld [vmem:[%s11366_s1 + $0x4ac] ss:$16 sps:$4 sm:$0xff]   ;;  %v7711_v27 = vld [vmem:[%s11366_s1 + $0x4a0] ss:$16 sps:$4 sm:$0xff]  }
  0x5b   :  { %5051 = vmatpush1.bf16.msra.mxu0 %v7618_v28  ;;  %5610 = vmatpush1.bf16.msra.mxu1 %v7621_v29  ;;  %v7714_v28 = vld [vmem:[%s11366_s1 + $0x4a8] ss:$16 sps:$4 sm:$0xff]   ;;  %v7719_v29 = vld [vmem:[%s11366_s1 + $0x4c4] ss:$16 sps:$4 sm:$0xff]  }
  0x5c   :  { %5052 = vmatprep.subr.bf16.mxu0 %v7626_v31  ;;  %5611 = vmatprep.subr.bf16.mxu1 %v7629_v32  ;;  %v7717_v31 = vld [vmem:[%s11366_s1 + $0x4c0] ss:$16 sps:$4 sm:$0xff]   ;;  %v7720_v32 = vld [vmem:[%s11366_s1 + $0x4c8] ss:$16 sps:$4 sm:$0xff]  }
  0x5f   :  { %5053 = vmatpush1.bf16.msra.mxu0 %v7624_v33  ;;  %5612 = vmatpush1.bf16.msra.mxu1 %v7627_v34  ;;  %v7725_v33 = vld [vmem:[%s11366_s1 + $0x4e4] ss:$16 sps:$4 sm:$0xff]   ;;  %v7728_v34 = vld [vmem:[%s11366_s1 + $0x4ec] ss:$16 sps:$4 sm:$0xff]  }
  0x60   :  { %5054 = vmatprep.subr.bf16.mxu0 %v7632_v35  ;;  %5613 = vmatprep.subr.bf16.mxu1 %v7635_v36  ;;  %v7723_v35 = vld [vmem:[%s11366_s1 + $0x4e0] ss:$16 sps:$4 sm:$0xff]   ;;  %v7726_v36 = vld [vmem:[%s11366_s1 + $0x4e8] ss:$16 sps:$4 sm:$0xff]  }
  0x63   :  { %5055 = vmatpush1.bf16.msra.mxu0 %v7630_v37  ;;  %5614 = vmatpush1.bf16.msra.mxu1 %v7633_v38  ;;  %v7731_v37 = vld [vmem:[%s11366_s1 + $0x504] ss:$16 sps:$4 sm:$0xff]   ;;  %v7734_v38 = vld [vmem:[%s11366_s1 + $0x50c] ss:$16 sps:$4 sm:$0xff]  }
  0x64   :  { %5056 = vmatprep.subr.bf16.mxu0 %v7638_v39  ;;  %5615 = vmatprep.subr.bf16.mxu1 %v7641_v40  ;;  %v7729_v39 = vld [vmem:[%s11366_s1 + $0x500] ss:$16 sps:$4 sm:$0xff]   ;;  %v7732_v40 = vld [vmem:[%s11366_s1 + $0x508] ss:$16 sps:$4 sm:$0xff]  }
  0x67   :  { %5057 = vmatpush1.bf16.msra.mxu0 %v7636_v41  ;;  %5616 = vmatpush1.bf16.msra.mxu1 %v7639_v42  ;;  %v7737_v41 = vld [vmem:[%s11366_s1 + $0x524] ss:$16 sps:$4 sm:$0xff]   ;;  %v7740_v42 = vld [vmem:[%s11366_s1 + $0x52c] ss:$16 sps:$4 sm:$0xff]  }
  0x68   :  { %5058 = vmatprep.subr.bf16.mxu0 %v7644_v43  ;;  %5617 = vmatprep.subr.bf16.mxu1 %v7647_v44  ;;  %v7735_v43 = vld [vmem:[%s11366_s1 + $0x520] ss:$16 sps:$4 sm:$0xff]   ;;  %v7738_v44 = vld [vmem:[%s11366_s1 + $0x528] ss:$16 sps:$4 sm:$0xff]  }
  0x6b   :  { %5059 = vmatpush1.bf16.msra.mxu0 %v7642_v45  ;;  %5618 = vmatpush1.bf16.msra.mxu1 %v7645_v46  ;;  %v7743_v45 = vld [vmem:[%s11366_s1 + $0x544] ss:$16 sps:$4 sm:$0xff]   ;;  %v7746_v46 = vld [vmem:[%s11366_s1 + $0x54c] ss:$16 sps:$4 sm:$0xff]  }
  0x6c   :  { %5060 = vmatprep.subr.bf16.mxu0 %v7650_v47  ;;  %5619 = vmatprep.subr.bf16.mxu1 %v7653_v48  ;;  %v7741_v47 = vld [vmem:[%s11366_s1 + $0x540] ss:$16 sps:$4 sm:$0xff]   ;;  %v7744_v48 = vld [vmem:[%s11366_s1 + $0x548] ss:$16 sps:$4 sm:$0xff]  }
  0x6f   :  { %5061 = vmatpush1.bf16.msra.mxu0 %v7648_v49  ;;  %5620 = vmatpush1.bf16.msra.mxu1 %v7651_v50  ;;  %v7749_v49 = vld [vmem:[%s11366_s1 + $0x564] ss:$16 sps:$4 sm:$0xff]   ;;  %v7752_v50 = vld [vmem:[%s11366_s1 + $0x56c] ss:$16 sps:$4 sm:$0xff]  }
  0x70   :  { %5062 = vmatprep.subr.bf16.mxu0 %v7656_v51  ;;  %5621 = vmatprep.subr.bf16.mxu1 %v7659_v52  ;;  %v7747_v51 = vld [vmem:[%s11366_s1 + $0x560] ss:$16 sps:$4 sm:$0xff]   ;;  %v7750_v52 = vld [vmem:[%s11366_s1 + $0x568] ss:$16 sps:$4 sm:$0xff]  }
  0x73   :  { %5063 = vmatpush1.bf16.msra.mxu0 %v7654_v53  ;;  %5622 = vmatpush1.bf16.msra.mxu1 %v7657_v54  ;;  %v7755_v53 = vld [vmem:[%s11366_s1 + $0x584] ss:$16 sps:$4 sm:$0xff]   ;;  %v7758_v54 = vld [vmem:[%s11366_s1 + $0x58c] ss:$16 sps:$4 sm:$0xff]  }
  0x74   :  { %5064 = vmatprep.subr.bf16.mxu0 %v7662_v55  ;;  %5623 = vmatprep.subr.bf16.mxu1 %v7665_v56  ;;  %v7753_v55 = vld [vmem:[%s11366_s1 + $0x580] ss:$16 sps:$4 sm:$0xff]   ;;  %v7756_v56 = vld [vmem:[%s11366_s1 + $0x588] ss:$16 sps:$4 sm:$0xff]  }
  0x77   :  { %5065 = vmatpush1.bf16.msra.mxu0 %v7660_v57  ;;  %5624 = vmatpush1.bf16.msra.mxu1 %v7663_v58  ;;  %v7761_v57 = vld [vmem:[%s11366_s1 + $0x5a4] ss:$16 sps:$4 sm:$0xff]   ;;  %v7764_v58 = vld [vmem:[%s11366_s1 + $0x5ac] ss:$16 sps:$4 sm:$0xff]  }
  0x78   :  { %5066 = vmatprep.subr.bf16.mxu0 %v7668_v59  ;;  %5625 = vmatprep.subr.bf16.mxu1 %v7671_v60  ;;  %v7759_v59 = vld [vmem:[%s11366_s1 + $0x5a0] ss:$16 sps:$4 sm:$0xff]   ;;  %v7762_v60 = vld [vmem:[%s11366_s1 + $0x5a8] ss:$16 sps:$4 sm:$0xff]  }
  0x7b   :  { %5067 = vmatpush1.bf16.msra.mxu0 %v7666_v61  ;;  %5626 = vmatpush1.bf16.msra.mxu1 %v7669_v62  ;;  %v7767_v61 = vld [vmem:[%s11366_s1 + $0x5c4] ss:$16 sps:$4 sm:$0xff]   ;;  %v7770_v62 = vld [vmem:[%s11366_s1 + $0x5cc] ss:$16 sps:$4 sm:$0xff]  }
  0x7c   :  { %5068 = vmatprep.subr.bf16.mxu0 %v7674_v63  ;;  %5627 = vmatprep.subr.bf16.mxu1 %v7677_v0  ;;  %v7765_v63 = vld [vmem:[%s11366_s1 + $0x5c0] ss:$16 sps:$4 sm:$0xff]   ;;  %v7768_v0 = vld [vmem:[%s11366_s1 + $0x5c8] ss:$16 sps:$4 sm:$0xff]  }
  0x7f   :  { %5069 = vmatpush1.bf16.msra.mxu0 %v7672_v1  ;;  %5628 = vmatpush1.bf16.msra.mxu1 %v7675_v2  ;;  %v7773_v1 = vld [vmem:[%s11366_s1 + $0x5e4] ss:$16 sps:$4 sm:$0xff]   ;;  %v7776_v2 = vld [vmem:[%s11366_s1 + $0x5ec] ss:$16 sps:$4 sm:$0xff]  }
  0x80   :  { %5081 = vmatprep.subr.bf16.mxu0 %v7683_v3  ;;  %5640 = vmatprep.subr.bf16.mxu1 %v7686_v4  ;;  %v7771_v3 = vld [vmem:[%s11366_s1 + $0x5e0] ss:$16 sps:$4 sm:$0xff]   ;;  %v7774_v4 = vld [vmem:[%s11366_s1 + $0x5e8] ss:$16 sps:$4 sm:$0xff]  }
  0x82   :  { %5071 = vmatmul.mubr.bf16.vlgmr.msra.gmra.mrb[0].mxu0 %v7678_v5  ;;  %5630 = vmatmul.mubr.bf16.vlgmr.msra.gmra.mrb[0].mxu1 %v7678_v5  ;;  %v7782_v5 = vld [vmem:[%s11366_s1 + $0x604] ss:$16 sps:$4 sm:$0xff]  }
  0x83   :  { %5082 = vmatpush1.bf16.msra.mxu0 %v7681_v6  ;;  %5641 = vmatpush1.bf16.msra.mxu1 %v7684_v7  ;;  %v7785_v6 = vld [vmem:[%s11366_s1 + $0x60c] ss:$16 sps:$4 sm:$0xff]   ;;  %v7777_v7 = vld [vmem:[%s11367_s0 + $0x10] ss:$100 sps:$4 sm:$0xff]  }
  0x84   :  { %5083 = vmatprep.subr.bf16.mxu0 %v7689_v8  ;;  %5642 = vmatprep.subr.bf16.mxu1 %v7692_v9  ;;  %v7780_v8 = vld [vmem:[%s11366_s1 + $0x600] ss:$16 sps:$4 sm:$0xff]   ;;  %v7783_v9 = vld [vmem:[%s11366_s1 + $0x608] ss:$16 sps:$4 sm:$0xff]  }
  0x85   :  { %5113 = vmatprep.mubr.bf16.mxu0 %v7779_v12  ;;  %5672 = vmatprep.mubr.bf16.mxu1 %v7779_v12  ;;  %v7878_v12 = vld [vmem:[%s11367_s0 + $0x1c] ss:$100 sps:$4 sm:$0xff]  }
  0x87   :  { %5084 = vmatpush1.bf16.msra.mxu0 %v7687_v10  ;;  %5643 = vmatpush1.bf16.msra.mxu1 %v7690_v11  ;;  %v7788_v10 = vld [vmem:[%s11366_s1 + $0x624] ss:$16 sps:$4 sm:$0xff]   ;;  %v7791_v11 = vld [vmem:[%s11366_s1 + $0x62c] ss:$16 sps:$4 sm:$0xff]  }
  0x88   :  { %5085 = vmatprep.subr.bf16.mxu0 %v7695_v13  ;;  %5644 = vmatprep.subr.bf16.mxu1 %v7698_v14  ;;  %v7786_v13 = vld [vmem:[%s11366_s1 + $0x620] ss:$16 sps:$4 sm:$0xff]   ;;  %v7789_v14 = vld [vmem:[%s11366_s1 + $0x628] ss:$16 sps:$4 sm:$0xff]  }
  0x8b   :  { %5086 = vmatpush1.bf16.msra.mxu0 %v7693_v15  ;;  %5645 = vmatpush1.bf16.msra.mxu1 %v7696_v16  ;;  %v7794_v15 = vld [vmem:[%s11366_s1 + $0x644] ss:$16 sps:$4 sm:$0xff]   ;;  %v7797_v16 = vld [vmem:[%s11366_s1 + $0x64c] ss:$16 sps:$4 sm:$0xff]  }
  0x8c   :  { %5087 = vmatprep.subr.bf16.mxu0 %v7701_v17  ;;  %5646 = vmatprep.subr.bf16.mxu1 %v7704_v18  ;;  %v7792_v17 = vld [vmem:[%s11366_s1 + $0x640] ss:$16 sps:$4 sm:$0xff]   ;;  %v7795_v18 = vld [vmem:[%s11366_s1 + $0x648] ss:$16 sps:$4 sm:$0xff]  }
  0x8f   :  { %5088 = vmatpush1.bf16.msra.mxu0 %v7699_v19  ;;  %5647 = vmatpush1.bf16.msra.mxu1 %v7702_v20  ;;  %v7800_v19 = vld [vmem:[%s11366_s1 + $0x664] ss:$16 sps:$4 sm:$0xff]   ;;  %v7803_v20 = vld [vmem:[%s11366_s1 + $0x66c] ss:$16 sps:$4 sm:$0xff]  }
  0x90   :  { %5089 = vmatprep.subr.bf16.mxu0 %v7707_v21  ;;  %5648 = vmatprep.subr.bf16.mxu1 %v7710_v22  ;;  %v7798_v21 = vld [vmem:[%s11366_s1 + $0x660] ss:$16 sps:$4 sm:$0xff]   ;;  %v7801_v22 = vld [vmem:[%s11366_s1 + $0x668] ss:$16 sps:$4 sm:$0xff]  }
  0x93   :  { %5090 = vmatpush1.bf16.msra.mxu0 %v7705_v23  ;;  %5649 = vmatpush1.bf16.msra.mxu1 %v7708_v24  ;;  %v7806_v23 = vld [vmem:[%s11366_s1 + $0x684] ss:$16 sps:$4 sm:$0xff]   ;;  %v7809_v24 = vld [vmem:[%s11366_s1 + $0x68c] ss:$16 sps:$4 sm:$0xff]  }
  0x94   :  { %5091 = vmatprep.subr.bf16.mxu0 %v7713_v25  ;;  %5650 = vmatprep.subr.bf16.mxu1 %v7716_v26  ;;  %v7804_v25 = vld [vmem:[%s11366_s1 + $0x680] ss:$16 sps:$4 sm:$0xff]   ;;  %v7807_v26 = vld [vmem:[%s11366_s1 + $0x688] ss:$16 sps:$4 sm:$0xff]  }
  0x97   :  { %5092 = vmatpush1.bf16.msra.mxu0 %v7711_v27  ;;  %5651 = vmatpush1.bf16.msra.mxu1 %v7714_v28  ;;  %v7812_v27 = vld [vmem:[%s11366_s1 + $0x6a4] ss:$16 sps:$4 sm:$0xff]   ;;  %v7815_v28 = vld [vmem:[%s11366_s1 + $0x6ac] ss:$16 sps:$4 sm:$0xff]  }
  0x98   :  { %5093 = vmatprep.subr.bf16.mxu0 %v7719_v29  ;;  %5652 = vmatprep.subr.bf16.mxu1 %v7722_v30  ;;  %v7810_v29 = vld [vmem:[%s11366_s1 + $0x6a0] ss:$16 sps:$4 sm:$0xff]   ;;  %v7813_v30 = vld [vmem:[%s11366_s1 + $0x6a8] ss:$16 sps:$4 sm:$0xff]  }
  0x9b   :  { %5094 = vmatpush1.bf16.msra.mxu0 %v7717_v31  ;;  %5653 = vmatpush1.bf16.msra.mxu1 %v7720_v32  ;;  %v7818_v31 = vld [vmem:[%s11366_s1 + $0x6c4] ss:$16 sps:$4 sm:$0xff]   ;;  %v7821_v32 = vld [vmem:[%s11366_s1 + $0x6cc] ss:$16 sps:$4 sm:$0xff]  }
  0x9c   :  { %5095 = vmatprep.subr.bf16.mxu0 %v7725_v33  ;;  %5654 = vmatprep.subr.bf16.mxu1 %v7728_v34  ;;  %v7816_v33 = vld [vmem:[%s11366_s1 + $0x6c0] ss:$16 sps:$4 sm:$0xff]   ;;  %v7819_v34 = vld [vmem:[%s11366_s1 + $0x6c8] ss:$16 sps:$4 sm:$0xff]  }
  0x9f   :  { %5096 = vmatpush1.bf16.msra.mxu0 %v7723_v35  ;;  %5655 = vmatpush1.bf16.msra.mxu1 %v7726_v36  ;;  %v7824_v35 = vld [vmem:[%s11366_s1 + $0x6e4] ss:$16 sps:$4 sm:$0xff]   ;;  %v7827_v36 = vld [vmem:[%s11366_s1 + $0x6ec] ss:$16 sps:$4 sm:$0xff]  }
  0xa0   :  { %5097 = vmatprep.subr.bf16.mxu0 %v7731_v37  ;;  %5656 = vmatprep.subr.bf16.mxu1 %v7734_v38  ;;  %v7822_v37 = vld [vmem:[%s11366_s1 + $0x6e0] ss:$16 sps:$4 sm:$0xff]   ;;  %v7825_v38 = vld [vmem:[%s11366_s1 + $0x6e8] ss:$16 sps:$4 sm:$0xff]  }
  0xa3   :  { %5098 = vmatpush1.bf16.msra.mxu0 %v7729_v39  ;;  %5657 = vmatpush1.bf16.msra.mxu1 %v7732_v40  ;;  %v7830_v39 = vld [vmem:[%s11366_s1 + $0x704] ss:$16 sps:$4 sm:$0xff]   ;;  %v7833_v40 = vld [vmem:[%s11366_s1 + $0x70c] ss:$16 sps:$4 sm:$0xff]  }
  0xa4   :  { %5099 = vmatprep.subr.bf16.mxu0 %v7737_v41  ;;  %5658 = vmatprep.subr.bf16.mxu1 %v7740_v42  ;;  %v7828_v41 = vld [vmem:[%s11366_s1 + $0x700] ss:$16 sps:$4 sm:$0xff]   ;;  %v7831_v42 = vld [vmem:[%s11366_s1 + $0x708] ss:$16 sps:$4 sm:$0xff]  }
  0xa7   :  { %5100 = vmatpush1.bf16.msra.mxu0 %v7735_v43  ;;  %5659 = vmatpush1.bf16.msra.mxu1 %v7738_v44  ;;  %v7836_v43 = vld [vmem:[%s11366_s1 + $0x724] ss:$16 sps:$4 sm:$0xff]   ;;  %v7839_v44 = vld [vmem:[%s11366_s1 + $0x72c] ss:$16 sps:$4 sm:$0xff]  }
  0xa8   :  { %5101 = vmatprep.subr.bf16.mxu0 %v7743_v45  ;;  %5660 = vmatprep.subr.bf16.mxu1 %v7746_v46  ;;  %v7834_v45 = vld [vmem:[%s11366_s1 + $0x720] ss:$16 sps:$4 sm:$0xff]   ;;  %v7837_v46 = vld [vmem:[%s11366_s1 + $0x728] ss:$16 sps:$4 sm:$0xff]  }
  0xab   :  { %5102 = vmatpush1.bf16.msra.mxu0 %v7741_v47  ;;  %5661 = vmatpush1.bf16.msra.mxu1 %v7744_v48  ;;  %v7842_v47 = vld [vmem:[%s11366_s1 + $0x744] ss:$16 sps:$4 sm:$0xff]   ;;  %v7845_v48 = vld [vmem:[%s11366_s1 + $0x74c] ss:$16 sps:$4 sm:$0xff]  }
  0xac   :  { %5103 = vmatprep.subr.bf16.mxu0 %v7749_v49  ;;  %5662 = vmatprep.subr.bf16.mxu1 %v7752_v50  ;;  %v7840_v49 = vld [vmem:[%s11366_s1 + $0x740] ss:$16 sps:$4 sm:$0xff]   ;;  %v7843_v50 = vld [vmem:[%s11366_s1 + $0x748] ss:$16 sps:$4 sm:$0xff]  }
  0xaf   :  { %5104 = vmatpush1.bf16.msra.mxu0 %v7747_v51  ;;  %5663 = vmatpush1.bf16.msra.mxu1 %v7750_v52  ;;  %v7848_v51 = vld [vmem:[%s11366_s1 + $0x764] ss:$16 sps:$4 sm:$0xff]   ;;  %v7851_v52 = vld [vmem:[%s11366_s1 + $0x76c] ss:$16 sps:$4 sm:$0xff]  }
  0xb0   :  { %5105 = vmatprep.subr.bf16.mxu0 %v7755_v53  ;;  %5664 = vmatprep.subr.bf16.mxu1 %v7758_v54  ;;  %v7846_v53 = vld [vmem:[%s11366_s1 + $0x760] ss:$16 sps:$4 sm:$0xff]   ;;  %v7849_v54 = vld [vmem:[%s11366_s1 + $0x768] ss:$16 sps:$4 sm:$0xff]  }
  0xb3   :  { %5106 = vmatpush1.bf16.msra.mxu0 %v7753_v55  ;;  %5665 = vmatpush1.bf16.msra.mxu1 %v7756_v56  ;;  %v7854_v55 = vld [vmem:[%s11366_s1 + $0x784] ss:$16 sps:$4 sm:$0xff]   ;;  %v7857_v56 = vld [vmem:[%s11366_s1 + $0x78c] ss:$16 sps:$4 sm:$0xff]  }
  0xb4   :  { %5107 = vmatprep.subr.bf16.mxu0 %v7761_v57  ;;  %5666 = vmatprep.subr.bf16.mxu1 %v7764_v58  ;;  %v7852_v57 = vld [vmem:[%s11366_s1 + $0x780] ss:$16 sps:$4 sm:$0xff]   ;;  %v7855_v58 = vld [vmem:[%s11366_s1 + $0x788] ss:$16 sps:$4 sm:$0xff]  }
  0xb7   :  { %5108 = vmatpush1.bf16.msra.mxu0 %v7759_v59  ;;  %5667 = vmatpush1.bf16.msra.mxu1 %v7762_v60  ;;  %v7860_v59 = vld [vmem:[%s11366_s1 + $0x7a4] ss:$16 sps:$4 sm:$0xff]   ;;  %v7863_v60 = vld [vmem:[%s11366_s1 + $0x7ac] ss:$16 sps:$4 sm:$0xff]  }
  0xb8   :  { %5109 = vmatprep.subr.bf16.mxu0 %v7767_v61  ;;  %5668 = vmatprep.subr.bf16.mxu1 %v7770_v62  ;;  %v7858_v61 = vld [vmem:[%s11366_s1 + $0x7a0] ss:$16 sps:$4 sm:$0xff]   ;;  %v7861_v62 = vld [vmem:[%s11366_s1 + $0x7a8] ss:$16 sps:$4 sm:$0xff]  }
  0xbb   :  { %5110 = vmatpush1.bf16.msra.mxu0 %v7765_v63  ;;  %5669 = vmatpush1.bf16.msra.mxu1 %v7768_v0  ;;  %v7866_v63 = vld [vmem:[%s11366_s1 + $0x7c4] ss:$16 sps:$4 sm:$0xff]   ;;  %v7869_v0 = vld [vmem:[%s11366_s1 + $0x7cc] ss:$16 sps:$4 sm:$0xff]  }
  0xbc   :  { %5111 = vmatprep.subr.bf16.mxu0 %v7773_v1  ;;  %5670 = vmatprep.subr.bf16.mxu1 %v7776_v2  ;;  %v7864_v1 = vld [vmem:[%s11366_s1 + $0x7c0] ss:$16 sps:$4 sm:$0xff]   ;;  %v7867_v2 = vld [vmem:[%s11366_s1 + $0x7c8] ss:$16 sps:$4 sm:$0xff]  }
  0xbf   :  { %5112 = vmatpush1.bf16.msra.mxu0 %v7771_v3  ;;  %5671 = vmatpush1.bf16.msra.mxu1 %v7774_v4  ;;  %v7872_v3 = vld [vmem:[%s11366_s1 + $0x7e4] ss:$16 sps:$4 sm:$0xff]   ;;  %v7875_v4 = vld [vmem:[%s11366_s1 + $0x7ec] ss:$16 sps:$4 sm:$0xff]  }
  0xc0   :  { %5124 = vmatprep.subr.bf16.mxu0 %v7782_v5  ;;  %5683 = vmatprep.subr.bf16.mxu1 %v7785_v6  ;;  %v7870_v5 = vld [vmem:[%s11366_s1 + $0x7e0] ss:$16 sps:$4 sm:$0xff]   ;;  %v7873_v6 = vld [vmem:[%s11366_s1 + $0x7e8] ss:$16 sps:$4 sm:$0xff]  }
  0xc2   :  { %5114 = vmatmul.mubr.bf16.vlgmr.msra.gmra.mrb[0].mxu0 %v7777_v7  ;;  %5673 = vmatmul.mubr.bf16.vlgmr.msra.gmra.mrb[0].mxu1 %v7777_v7  ;;  %v7881_v7 = vld [vmem:[%s11366_s1 + $0x804] ss:$16 sps:$4 sm:$0xff]  }
  0xc3   :  { %5125 = vmatpush1.bf16.msra.mxu0 %v7780_v8  ;;  %5684 = vmatpush1.bf16.msra.mxu1 %v7783_v9  ;;  %v7884_v8 = vld [vmem:[%s11366_s1 + $0x80c] ss:$16 sps:$4 sm:$0xff]  }
  0xc4   :  { %5126 = vmatprep.subr.bf16.mxu0 %v7788_v10  ;;  %5685 = vmatprep.subr.bf16.mxu1 %v7791_v11  ;;  %v7876_v9 = vld [vmem:[%s11367_s0 + $0x18] ss:$100 sps:$4 sm:$0xff]   ;;  %v7879_v10 = vld [vmem:[%s11366_s1 + $0x800] ss:$16 sps:$4 sm:$0xff]  }
  0xc5   :  { %5156 = vmatprep.mubr.bf16.mxu0 %v7878_v12  ;;  %5715 = vmatprep.mubr.bf16.mxu1 %v7878_v12  ;;  %v7882_v11 = vld [vmem:[%s11366_s1 + $0x808] ss:$16 sps:$4 sm:$0xff]   ;;  %v7887_v12 = vld [vmem:[%s11366_s1 + $0x824] ss:$16 sps:$4 sm:$0xff]  }
  0xc7   :  { %5127 = vmatpush1.bf16.msra.mxu0 %v7786_v13  ;;  %5686 = vmatpush1.bf16.msra.mxu1 %v7789_v14  ;;  %v7890_v13 = vld [vmem:[%s11366_s1 + $0x82c] ss:$16 sps:$4 sm:$0xff]   ;;  %v7977_v14 = vld [vmem:[%s11367_s0 + $0x24] ss:$100 sps:$4 sm:$0xff]  }
  0xc8   :  { %5128 = vmatprep.subr.bf16.mxu0 %v7794_v15  ;;  %5687 = vmatprep.subr.bf16.mxu1 %v7797_v16  ;;  %v7885_v15 = vld [vmem:[%s11366_s1 + $0x820] ss:$16 sps:$4 sm:$0xff]   ;;  %v7888_v16 = vld [vmem:[%s11366_s1 + $0x828] ss:$16 sps:$4 sm:$0xff]  }
  0xcb   :  { %5129 = vmatpush1.bf16.msra.mxu0 %v7792_v17  ;;  %5688 = vmatpush1.bf16.msra.mxu1 %v7795_v18  ;;  %v7893_v17 = vld [vmem:[%s11366_s1 + $0x844] ss:$16 sps:$4 sm:$0xff]   ;;  %v7896_v18 = vld [vmem:[%s11366_s1 + $0x84c] ss:$16 sps:$4 sm:$0xff]  }
  0xcc   :  { %5130 = vmatprep.subr.bf16.mxu0 %v7800_v19  ;;  %5689 = vmatprep.subr.bf16.mxu1 %v7803_v20  ;;  %v7891_v19 = vld [vmem:[%s11366_s1 + $0x840] ss:$16 sps:$4 sm:$0xff]   ;;  %v7894_v20 = vld [vmem:[%s11366_s1 + $0x848] ss:$16 sps:$4 sm:$0xff]  }
  0xcf   :  { %5131 = vmatpush1.bf16.msra.mxu0 %v7798_v21  ;;  %5690 = vmatpush1.bf16.msra.mxu1 %v7801_v22  ;;  %v7899_v21 = vld [vmem:[%s11366_s1 + $0x864] ss:$16 sps:$4 sm:$0xff]   ;;  %v7902_v22 = vld [vmem:[%s11366_s1 + $0x86c] ss:$16 sps:$4 sm:$0xff]  }
  0xd0   :  { %5132 = vmatprep.subr.bf16.mxu0 %v7806_v23  ;;  %5691 = vmatprep.subr.bf16.mxu1 %v7809_v24  ;;  %v7897_v23 = vld [vmem:[%s11366_s1 + $0x860] ss:$16 sps:$4 sm:$0xff]   ;;  %v7900_v24 = vld [vmem:[%s11366_s1 + $0x868] ss:$16 sps:$4 sm:$0xff]  }
  0xd3   :  { %5133 = vmatpush1.bf16.msra.mxu0 %v7804_v25  ;;  %5692 = vmatpush1.bf16.msra.mxu1 %v7807_v26  ;;  %v7905_v25 = vld [vmem:[%s11366_s1 + $0x884] ss:$16 sps:$4 sm:$0xff]   ;;  %v7908_v26 = vld [vmem:[%s11366_s1 + $0x88c] ss:$16 sps:$4 sm:$0xff]  }
  0xd4   :  { %5134 = vmatprep.subr.bf16.mxu0 %v7812_v27  ;;  %5693 = vmatprep.subr.bf16.mxu1 %v7815_v28  ;;  %v7903_v27 = vld [vmem:[%s11366_s1 + $0x880] ss:$16 sps:$4 sm:$0xff]   ;;  %v7906_v28 = vld [vmem:[%s11366_s1 + $0x888] ss:$16 sps:$4 sm:$0xff]  }
  0xd7   :  { %5135 = vmatpush1.bf16.msra.mxu0 %v7810_v29  ;;  %5694 = vmatpush1.bf16.msra.mxu1 %v7813_v30  ;;  %v7911_v29 = vld [vmem:[%s11366_s1 + $0x8a4] ss:$16 sps:$4 sm:$0xff]   ;;  %v7914_v30 = vld [vmem:[%s11366_s1 + $0x8ac] ss:$16 sps:$4 sm:$0xff]  }
  0xd8   :  { %5136 = vmatprep.subr.bf16.mxu0 %v7818_v31  ;;  %5695 = vmatprep.subr.bf16.mxu1 %v7821_v32  ;;  %v7909_v31 = vld [vmem:[%s11366_s1 + $0x8a0] ss:$16 sps:$4 sm:$0xff]   ;;  %v7912_v32 = vld [vmem:[%s11366_s1 + $0x8a8] ss:$16 sps:$4 sm:$0xff]  }
  0xdb   :  { %5137 = vmatpush1.bf16.msra.mxu0 %v7816_v33  ;;  %5696 = vmatpush1.bf16.msra.mxu1 %v7819_v34  ;;  %v7917_v33 = vld [vmem:[%s11366_s1 + $0x8c4] ss:$16 sps:$4 sm:$0xff]   ;;  %v7920_v34 = vld [vmem:[%s11366_s1 + $0x8cc] ss:$16 sps:$4 sm:$0xff]  }
  0xdc   :  { %5138 = vmatprep.subr.bf16.mxu0 %v7824_v35  ;;  %5697 = vmatprep.subr.bf16.mxu1 %v7827_v36  ;;  %v7915_v35 = vld [vmem:[%s11366_s1 + $0x8c0] ss:$16 sps:$4 sm:$0xff]   ;;  %v7918_v36 = vld [vmem:[%s11366_s1 + $0x8c8] ss:$16 sps:$4 sm:$0xff]  }
  0xdf   :  { %5139 = vmatpush1.bf16.msra.mxu0 %v7822_v37  ;;  %5698 = vmatpush1.bf16.msra.mxu1 %v7825_v38  ;;  %v7923_v37 = vld [vmem:[%s11366_s1 + $0x8e4] ss:$16 sps:$4 sm:$0xff]   ;;  %v7926_v38 = vld [vmem:[%s11366_s1 + $0x8ec] ss:$16 sps:$4 sm:$0xff]  }
  0xe0   :  { %5140 = vmatprep.subr.bf16.mxu0 %v7830_v39  ;;  %5699 = vmatprep.subr.bf16.mxu1 %v7833_v40  ;;  %v7921_v39 = vld [vmem:[%s11366_s1 + $0x8e0] ss:$16 sps:$4 sm:$0xff]   ;;  %v7924_v40 = vld [vmem:[%s11366_s1 + $0x8e8] ss:$16 sps:$4 sm:$0xff]  }
  0xe3   :  { %5141 = vmatpush1.bf16.msra.mxu0 %v7828_v41  ;;  %5700 = vmatpush1.bf16.msra.mxu1 %v7831_v42  ;;  %v7929_v41 = vld [vmem:[%s11366_s1 + $0x904] ss:$16 sps:$4 sm:$0xff]   ;;  %v7932_v42 = vld [vmem:[%s11366_s1 + $0x90c] ss:$16 sps:$4 sm:$0xff]  }
  0xe4   :  { %5142 = vmatprep.subr.bf16.mxu0 %v7836_v43  ;;  %5701 = vmatprep.subr.bf16.mxu1 %v7839_v44  ;;  %v7927_v43 = vld [vmem:[%s11366_s1 + $0x900] ss:$16 sps:$4 sm:$0xff]   ;;  %v7930_v44 = vld [vmem:[%s11366_s1 + $0x908] ss:$16 sps:$4 sm:$0xff]  }
  0xe7   :  { %5143 = vmatpush1.bf16.msra.mxu0 %v7834_v45  ;;  %5702 = vmatpush1.bf16.msra.mxu1 %v7837_v46  ;;  %v7935_v45 = vld [vmem:[%s11366_s1 + $0x924] ss:$16 sps:$4 sm:$0xff]   ;;  %v7938_v46 = vld [vmem:[%s11366_s1 + $0x92c] ss:$16 sps:$4 sm:$0xff]  }
  0xe8   :  { %5144 = vmatprep.subr.bf16.mxu0 %v7842_v47  ;;  %5703 = vmatprep.subr.bf16.mxu1 %v7845_v48  ;;  %v7933_v47 = vld [vmem:[%s11366_s1 + $0x920] ss:$16 sps:$4 sm:$0xff]   ;;  %v7936_v48 = vld [vmem:[%s11366_s1 + $0x928] ss:$16 sps:$4 sm:$0xff]  }
  0xeb   :  { %5145 = vmatpush1.bf16.msra.mxu0 %v7840_v49  ;;  %5704 = vmatpush1.bf16.msra.mxu1 %v7843_v50  ;;  %v7941_v49 = vld [vmem:[%s11366_s1 + $0x944] ss:$16 sps:$4 sm:$0xff]   ;;  %v7944_v50 = vld [vmem:[%s11366_s1 + $0x94c] ss:$16 sps:$4 sm:$0xff]  }
  0xec   :  { %5146 = vmatprep.subr.bf16.mxu0 %v7848_v51  ;;  %5705 = vmatprep.subr.bf16.mxu1 %v7851_v52  ;;  %v7939_v51 = vld [vmem:[%s11366_s1 + $0x940] ss:$16 sps:$4 sm:$0xff]   ;;  %v7942_v52 = vld [vmem:[%s11366_s1 + $0x948] ss:$16 sps:$4 sm:$0xff]  }
  0xef   :  { %5147 = vmatpush1.bf16.msra.mxu0 %v7846_v53  ;;  %5706 = vmatpush1.bf16.msra.mxu1 %v7849_v54  ;;  %v7947_v53 = vld [vmem:[%s11366_s1 + $0x964] ss:$16 sps:$4 sm:$0xff]   ;;  %v7950_v54 = vld [vmem:[%s11366_s1 + $0x96c] ss:$16 sps:$4 sm:$0xff]  }
  0xf0   :  { %5148 = vmatprep.subr.bf16.mxu0 %v7854_v55  ;;  %5707 = vmatprep.subr.bf16.mxu1 %v7857_v56  ;;  %v7945_v55 = vld [vmem:[%s11366_s1 + $0x960] ss:$16 sps:$4 sm:$0xff]   ;;  %v7948_v56 = vld [vmem:[%s11366_s1 + $0x968] ss:$16 sps:$4 sm:$0xff]  }
  0xf3   :  { %5149 = vmatpush1.bf16.msra.mxu0 %v7852_v57  ;;  %5708 = vmatpush1.bf16.msra.mxu1 %v7855_v58  ;;  %v7953_v57 = vld [vmem:[%s11366_s1 + $0x984] ss:$16 sps:$4 sm:$0xff]   ;;  %v7956_v58 = vld [vmem:[%s11366_s1 + $0x98c] ss:$16 sps:$4 sm:$0xff]  }
  0xf4   :  { %5150 = vmatprep.subr.bf16.mxu0 %v7860_v59  ;;  %5709 = vmatprep.subr.bf16.mxu1 %v7863_v60  ;;  %v7951_v59 = vld [vmem:[%s11366_s1 + $0x980] ss:$16 sps:$4 sm:$0xff]   ;;  %v7954_v60 = vld [vmem:[%s11366_s1 + $0x988] ss:$16 sps:$4 sm:$0xff]  }
  0xf7   :  { %5151 = vmatpush1.bf16.msra.mxu0 %v7858_v61  ;;  %5710 = vmatpush1.bf16.msra.mxu1 %v7861_v62  ;;  %v7959_v61 = vld [vmem:[%s11366_s1 + $0x9a4] ss:$16 sps:$4 sm:$0xff]   ;;  %v7962_v62 = vld [vmem:[%s11366_s1 + $0x9ac] ss:$16 sps:$4 sm:$0xff]  }
  0xf8   :  { %5152 = vmatprep.subr.bf16.mxu0 %v7866_v63  ;;  %5711 = vmatprep.subr.bf16.mxu1 %v7869_v0  ;;  %v7957_v63 = vld [vmem:[%s11366_s1 + $0x9a0] ss:$16 sps:$4 sm:$0xff]   ;;  %v7960_v0 = vld [vmem:[%s11366_s1 + $0x9a8] ss:$16 sps:$4 sm:$0xff]  }
  0xfb   :  { %5153 = vmatpush1.bf16.msra.mxu0 %v7864_v1  ;;  %5712 = vmatpush1.bf16.msra.mxu1 %v7867_v2  ;;  %v7965_v1 = vld [vmem:[%s11366_s1 + $0x9c4] ss:$16 sps:$4 sm:$0xff]   ;;  %v7968_v2 = vld [vmem:[%s11366_s1 + $0x9cc] ss:$16 sps:$4 sm:$0xff]  }
  0xfc   :  { %5154 = vmatprep.subr.bf16.mxu0 %v7872_v3  ;;  %5713 = vmatprep.subr.bf16.mxu1 %v7875_v4  ;;  %v7963_v3 = vld [vmem:[%s11366_s1 + $0x9c0] ss:$16 sps:$4 sm:$0xff]   ;;  %v7966_v4 = vld [vmem:[%s11366_s1 + $0x9c8] ss:$16 sps:$4 sm:$0xff]  }
  0xff   :  { %5155 = vmatpush1.bf16.msra.mxu0 %v7870_v5  ;;  %5714 = vmatpush1.bf16.msra.mxu1 %v7873_v6  ;;  %v7971_v5 = vld [vmem:[%s11366_s1 + $0x9e4] ss:$16 sps:$4 sm:$0xff]   ;;  %v7974_v6 = vld [vmem:[%s11366_s1 + $0x9ec] ss:$16 sps:$4 sm:$0xff]  }
 0x100   :  { %5167 = vmatprep.subr.bf16.mxu0 %v7881_v7  ;;  %5726 = vmatprep.subr.bf16.mxu1 %v7884_v8  ;;  %v7969_v7 = vld [vmem:[%s11366_s1 + $0x9e0] ss:$16 sps:$4 sm:$0xff]   ;;  %v7972_v8 = vld [vmem:[%s11366_s1 + $0x9e8] ss:$16 sps:$4 sm:$0xff]  }
 0x102   :  { %5157 = vmatmul.mubr.bf16.vlgmr.msra.gmra.mrb[0].mxu0 %v7876_v9  ;;  %5716 = vmatmul.mubr.bf16.vlgmr.msra.gmra.mrb[0].mxu1 %v7876_v9  ;;  %v7975_v9 = vld [vmem:[%s11367_s0 + $0x20] ss:$100 sps:$4 sm:$0xff]  }
 0x103   :  { %5168 = vmatpush1.bf16.msra.mxu0 %v7879_v10  ;;  %5727 = vmatpush1.bf16.msra.mxu1 %v7882_v11  ;;  %v7980_v10 = vld [vmem:[%s11366_s1 + $0xa04] ss:$16 sps:$4 sm:$0xff]   ;;  %v7983_v11 = vld [vmem:[%s11366_s1 + $0xa0c] ss:$16 sps:$4 sm:$0xff]  }
 0x104   :  { %5169 = vmatprep.subr.bf16.mxu0 %v7887_v12  ;;  %5728 = vmatprep.subr.bf16.mxu1 %v7890_v13  ;;  %v7978_v12 = vld [vmem:[%s11366_s1 + $0xa00] ss:$16 sps:$4 sm:$0xff]   ;;  %v7981_v13 = vld [vmem:[%s11366_s1 + $0xa08] ss:$16 sps:$4 sm:$0xff]  }
 0x105   :  { %5199 = vmatprep.mubr.bf16.mxu0 %v7977_v14  ;;  %5758 = vmatprep.mubr.bf16.mxu1 %v7977_v14  ;;  %v7986_v14 = vld [vmem:[%s11366_s1 + $0xa24] ss:$16 sps:$4 sm:$0xff]  }
 0x107   :  { %5170 = vmatpush1.bf16.msra.mxu0 %v7885_v15  ;;  %5729 = vmatpush1.bf16.msra.mxu1 %v7888_v16  ;;  %v7989_v15 = vld [vmem:[%s11366_s1 + $0xa2c] ss:$16 sps:$4 sm:$0xff]  }
 0x108   :  { %5171 = vmatprep.subr.bf16.mxu0 %v7893_v17  ;;  %5730 = vmatprep.subr.bf16.mxu1 %v7896_v18  ;;  %v8076_v16 = vld [vmem:[%s11367_s0 + $0x2c] ss:$100 sps:$4 sm:$0xff]   ;;  %v7987_v18 = vld [vmem:[%s11366_s1 + $0xa28] ss:$16 sps:$4 sm:$0xff]  }
 0x109   :  { %v7984_v17 = vld [vmem:[%s11366_s1 + $0xa20] ss:$16 sps:$4 sm:$0xff]  }
 0x10b   :  { %5172 = vmatpush1.bf16.msra.mxu0 %v7891_v19  ;;  %5731 = vmatpush1.bf16.msra.mxu1 %v7894_v20  ;;  %v7992_v19 = vld [vmem:[%s11366_s1 + $0xa44] ss:$16 sps:$4 sm:$0xff]   ;;  %v7995_v20 = vld [vmem:[%s11366_s1 + $0xa4c] ss:$16 sps:$4 sm:$0xff]  }
 0x10c   :  { %5173 = vmatprep.subr.bf16.mxu0 %v7899_v21  ;;  %5732 = vmatprep.subr.bf16.mxu1 %v7902_v22  ;;  %v7990_v21 = vld [vmem:[%s11366_s1 + $0xa40] ss:$16 sps:$4 sm:$0xff]   ;;  %v7993_v22 = vld [vmem:[%s11366_s1 + $0xa48] ss:$16 sps:$4 sm:$0xff]  }
 0x10f   :  { %5174 = vmatpush1.bf16.msra.mxu0 %v7897_v23  ;;  %5733 = vmatpush1.bf16.msra.mxu1 %v7900_v24  ;;  %v7998_v23 = vld [vmem:[%s11366_s1 + $0xa64] ss:$16 sps:$4 sm:$0xff]   ;;  %v8001_v24 = vld [vmem:[%s11366_s1 + $0xa6c] ss:$16 sps:$4 sm:$0xff]  }
 0x110   :  { %5175 = vmatprep.subr.bf16.mxu0 %v7905_v25  ;;  %5734 = vmatprep.subr.bf16.mxu1 %v7908_v26  ;;  %v7996_v25 = vld [vmem:[%s11366_s1 + $0xa60] ss:$16 sps:$4 sm:$0xff]   ;;  %v7999_v26 = vld [vmem:[%s11366_s1 + $0xa68] ss:$16 sps:$4 sm:$0xff]  }
 0x113   :  { %5176 = vmatpush1.bf16.msra.mxu0 %v7903_v27  ;;  %5735 = vmatpush1.bf16.msra.mxu1 %v7906_v28  ;;  %v8004_v27 = vld [vmem:[%s11366_s1 + $0xa84] ss:$16 sps:$4 sm:$0xff]   ;;  %v8007_v28 = vld [vmem:[%s11366_s1 + $0xa8c] ss:$16 sps:$4 sm:$0xff]  }
 0x114   :  { %5177 = vmatprep.subr.bf16.mxu0 %v7911_v29  ;;  %5736 = vmatprep.subr.bf16.mxu1 %v7914_v30  ;;  %v8002_v29 = vld [vmem:[%s11366_s1 + $0xa80] ss:$16 sps:$4 sm:$0xff]   ;;  %v8005_v30 = vld [vmem:[%s11366_s1 + $0xa88] ss:$16 sps:$4 sm:$0xff]  }
 0x117   :  { %5178 = vmatpush1.bf16.msra.mxu0 %v7909_v31  ;;  %5737 = vmatpush1.bf16.msra.mxu1 %v7912_v32  ;;  %v8010_v31 = vld [vmem:[%s11366_s1 + $0xaa4] ss:$16 sps:$4 sm:$0xff]   ;;  %v8013_v32 = vld [vmem:[%s11366_s1 + $0xaac] ss:$16 sps:$4 sm:$0xff]  }
 0x118   :  { %5179 = vmatprep.subr.bf16.mxu0 %v7917_v33  ;;  %5738 = vmatprep.subr.bf16.mxu1 %v7920_v34  ;;  %v8008_v33 = vld [vmem:[%s11366_s1 + $0xaa0] ss:$16 sps:$4 sm:$0xff]   ;;  %v8011_v34 = vld [vmem:[%s11366_s1 + $0xaa8] ss:$16 sps:$4 sm:$0xff]  }
 0x11b   :  { %5180 = vmatpush1.bf16.msra.mxu0 %v7915_v35  ;;  %5739 = vmatpush1.bf16.msra.mxu1 %v7918_v36  ;;  %v8016_v35 = vld [vmem:[%s11366_s1 + $0xac4] ss:$16 sps:$4 sm:$0xff]   ;;  %v8019_v36 = vld [vmem:[%s11366_s1 + $0xacc] ss:$16 sps:$4 sm:$0xff]  }
 0x11c   :  { %5181 = vmatprep.subr.bf16.mxu0 %v7923_v37  ;;  %5740 = vmatprep.subr.bf16.mxu1 %v7926_v38  ;;  %v8014_v37 = vld [vmem:[%s11366_s1 + $0xac0] ss:$16 sps:$4 sm:$0xff]   ;;  %v8017_v38 = vld [vmem:[%s11366_s1 + $0xac8] ss:$16 sps:$4 sm:$0xff]  }
 0x11f   :  { %5182 = vmatpush1.bf16.msra.mxu0 %v7921_v39  ;;  %5741 = vmatpush1.bf16.msra.mxu1 %v7924_v40  ;;  %v8022_v39 = vld [vmem:[%s11366_s1 + $0xae4] ss:$16 sps:$4 sm:$0xff]   ;;  %v8025_v40 = vld [vmem:[%s11366_s1 + $0xaec] ss:$16 sps:$4 sm:$0xff]  }
 0x120   :  { %5183 = vmatprep.subr.bf16.mxu0 %v7929_v41  ;;  %5742 = vmatprep.subr.bf16.mxu1 %v7932_v42  ;;  %v8020_v41 = vld [vmem:[%s11366_s1 + $0xae0] ss:$16 sps:$4 sm:$0xff]   ;;  %v8023_v42 = vld [vmem:[%s11366_s1 + $0xae8] ss:$16 sps:$4 sm:$0xff]  }
 0x123   :  { %5184 = vmatpush1.bf16.msra.mxu0 %v7927_v43  ;;  %5743 = vmatpush1.bf16.msra.mxu1 %v7930_v44  ;;  %v8028_v43 = vld [vmem:[%s11366_s1 + $0xb04] ss:$16 sps:$4 sm:$0xff]   ;;  %v8031_v44 = vld [vmem:[%s11366_s1 + $0xb0c] ss:$16 sps:$4 sm:$0xff]  }
 0x124   :  { %5185 = vmatprep.subr.bf16.mxu0 %v7935_v45  ;;  %5744 = vmatprep.subr.bf16.mxu1 %v7938_v46  ;;  %v8026_v45 = vld [vmem:[%s11366_s1 + $0xb00] ss:$16 sps:$4 sm:$0xff]   ;;  %v8029_v46 = vld [vmem:[%s11366_s1 + $0xb08] ss:$16 sps:$4 sm:$0xff]  }
 0x127   :  { %5186 = vmatpush1.bf16.msra.mxu0 %v7933_v47  ;;  %5745 = vmatpush1.bf16.msra.mxu1 %v7936_v48  ;;  %v8034_v47 = vld [vmem:[%s11366_s1 + $0xb24] ss:$16 sps:$4 sm:$0xff]   ;;  %v8037_v48 = vld [vmem:[%s11366_s1 + $0xb2c] ss:$16 sps:$4 sm:$0xff]  }
 0x128   :  { %5187 = vmatprep.subr.bf16.mxu0 %v7941_v49  ;;  %5746 = vmatprep.subr.bf16.mxu1 %v7944_v50  ;;  %v8032_v49 = vld [vmem:[%s11366_s1 + $0xb20] ss:$16 sps:$4 sm:$0xff]   ;;  %v8035_v50 = vld [vmem:[%s11366_s1 + $0xb28] ss:$16 sps:$4 sm:$0xff]  }
 0x12b   :  { %5188 = vmatpush1.bf16.msra.mxu0 %v7939_v51  ;;  %5747 = vmatpush1.bf16.msra.mxu1 %v7942_v52  ;;  %v8040_v51 = vld [vmem:[%s11366_s1 + $0xb44] ss:$16 sps:$4 sm:$0xff]   ;;  %v8043_v52 = vld [vmem:[%s11366_s1 + $0xb4c] ss:$16 sps:$4 sm:$0xff]  }
 0x12c   :  { %5189 = vmatprep.subr.bf16.mxu0 %v7947_v53  ;;  %5748 = vmatprep.subr.bf16.mxu1 %v7950_v54  ;;  %v8038_v53 = vld [vmem:[%s11366_s1 + $0xb40] ss:$16 sps:$4 sm:$0xff]   ;;  %v8041_v54 = vld [vmem:[%s11366_s1 + $0xb48] ss:$16 sps:$4 sm:$0xff]  }
 0x12f   :  { %5190 = vmatpush1.bf16.msra.mxu0 %v7945_v55  ;;  %5749 = vmatpush1.bf16.msra.mxu1 %v7948_v56  ;;  %v8046_v55 = vld [vmem:[%s11366_s1 + $0xb64] ss:$16 sps:$4 sm:$0xff]   ;;  %v8049_v56 = vld [vmem:[%s11366_s1 + $0xb6c] ss:$16 sps:$4 sm:$0xff]  }
 0x130   :  { %5191 = vmatprep.subr.bf16.mxu0 %v7953_v57  ;;  %5750 = vmatprep.subr.bf16.mxu1 %v7956_v58  ;;  %v8044_v57 = vld [vmem:[%s11366_s1 + $0xb60] ss:$16 sps:$4 sm:$0xff]   ;;  %v8047_v58 = vld [vmem:[%s11366_s1 + $0xb68] ss:$16 sps:$4 sm:$0xff]  }
 0x133   :  { %5192 = vmatpush1.bf16.msra.mxu0 %v7951_v59  ;;  %5751 = vmatpush1.bf16.msra.mxu1 %v7954_v60  ;;  %v8052_v59 = vld [vmem:[%s11366_s1 + $0xb84] ss:$16 sps:$4 sm:$0xff]   ;;  %v8055_v60 = vld [vmem:[%s11366_s1 + $0xb8c] ss:$16 sps:$4 sm:$0xff]  }
 0x134   :  { %5193 = vmatprep.subr.bf16.mxu0 %v7959_v61  ;;  %5752 = vmatprep.subr.bf16.mxu1 %v7962_v62  ;;  %v8050_v61 = vld [vmem:[%s11366_s1 + $0xb80] ss:$16 sps:$4 sm:$0xff]   ;;  %v8053_v62 = vld [vmem:[%s11366_s1 + $0xb88] ss:$16 sps:$4 sm:$0xff]  }
 0x137   :  { %5194 = vmatpush1.bf16.msra.mxu0 %v7957_v63  ;;  %5753 = vmatpush1.bf16.msra.mxu1 %v7960_v0  ;;  %v8058_v63 = vld [vmem:[%s11366_s1 + $0xba4] ss:$16 sps:$4 sm:$0xff]   ;;  %v8061_v0 = vld [vmem:[%s11366_s1 + $0xbac] ss:$16 sps:$4 sm:$0xff]  }
 0x138   :  { %5195 = vmatprep.subr.bf16.mxu0 %v7965_v1  ;;  %5754 = vmatprep.subr.bf16.mxu1 %v7968_v2  ;;  %v8056_v1 = vld [vmem:[%s11366_s1 + $0xba0] ss:$16 sps:$4 sm:$0xff]   ;;  %v8059_v2 = vld [vmem:[%s11366_s1 + $0xba8] ss:$16 sps:$4 sm:$0xff]  }
 0x13b   :  { %5196 = vmatpush1.bf16.msra.mxu0 %v7963_v3  ;;  %5755 = vmatpush1.bf16.msra.mxu1 %v7966_v4  ;;  %v8064_v3 = vld [vmem:[%s11366_s1 + $0xbc4] ss:$16 sps:$4 sm:$0xff]   ;;  %v8067_v4 = vld [vmem:[%s11366_s1 + $0xbcc] ss:$16 sps:$4 sm:$0xff]  }
 0x13c   :  { %5197 = vmatprep.subr.bf16.mxu0 %v7971_v5  ;;  %5756 = vmatprep.subr.bf16.mxu1 %v7974_v6  ;;  %v8062_v5 = vld [vmem:[%s11366_s1 + $0xbc0] ss:$16 sps:$4 sm:$0xff]   ;;  %v8065_v6 = vld [vmem:[%s11366_s1 + $0xbc8] ss:$16 sps:$4 sm:$0xff]  }
 0x13f   :  { %5198 = vmatpush1.bf16.msra.mxu0 %v7969_v7  ;;  %5757 = vmatpush1.bf16.msra.mxu1 %v7972_v8  ;;  %v8070_v7 = vld [vmem:[%s11366_s1 + $0xbe4] ss:$16 sps:$4 sm:$0xff]   ;;  %v8073_v8 = vld [vmem:[%s11366_s1 + $0xbec] ss:$16 sps:$4 sm:$0xff]  }
 0x140   :  { %5210 = vmatprep.subr.bf16.mxu0 %v7980_v10  ;;  %5769 = vmatprep.subr.bf16.mxu1 %v7983_v11  ;;  %v8071_v10 = vld [vmem:[%s11366_s1 + $0xbe8] ss:$16 sps:$4 sm:$0xff]  }
 0x141   :  { %v8074_v11 = vld [vmem:[%s11367_s0 + $0x28] ss:$100 sps:$4 sm:$0xff]  }
 0x142   :  { %5200 = vmatmul.mubr.bf16.vlgmr.msra.gmra.mrb[0].mxu0 %v7975_v9  ;;  %5759 = vmatmul.mubr.bf16.vlgmr.msra.gmra.mrb[0].mxu1 %v7975_v9  ;;  %v8068_v9 = vld [vmem:[%s11366_s1 + $0xbe0] ss:$16 sps:$4 sm:$0xff]  }
 0x143   :  { %5211 = vmatpush1.bf16.msra.mxu0 %v7978_v12  ;;  %5770 = vmatpush1.bf16.msra.mxu1 %v7981_v13  ;;  %v8079_v12 = vld [vmem:[%s11366_s1 + $0xc04] ss:$16 sps:$4 sm:$0xff]   ;;  %v8082_v13 = vld [vmem:[%s11366_s1 + $0xc0c] ss:$16 sps:$4 sm:$0xff]  }
 0x144   :  { %5212 = vmatprep.subr.bf16.mxu0 %v7986_v14  ;;  %5771 = vmatprep.subr.bf16.mxu1 %v7989_v15  ;;  %v8077_v14 = vld [vmem:[%s11366_s1 + $0xc00] ss:$16 sps:$4 sm:$0xff]   ;;  %v8080_v15 = vld [vmem:[%s11366_s1 + $0xc08] ss:$16 sps:$4 sm:$0xff]  }
 0x145   :  { %5242 = vmatprep.mubr.bf16.mxu0 %v8076_v16  ;;  %5801 = vmatprep.mubr.bf16.mxu1 %v8076_v16  ;;  %v8085_v16 = vld [vmem:[%s11366_s1 + $0xc24] ss:$16 sps:$4 sm:$0xff]  }
 0x147   :  { %5213 = vmatpush1.bf16.msra.mxu0 %v7984_v17  ;;  %5772 = vmatpush1.bf16.msra.mxu1 %v7987_v18  ;;  %v8088_v17 = vld [vmem:[%s11366_s1 + $0xc2c] ss:$16 sps:$4 sm:$0xff]   ;;  %v8175_v18 = vld [vmem:[%s11367_s0 + $0x34] ss:$100 sps:$4 sm:$0xff]  }
 0x148   :  { %5214 = vmatprep.subr.bf16.mxu0 %v7992_v19  ;;  %5773 = vmatprep.subr.bf16.mxu1 %v7995_v20  ;;  %v8083_v19 = vld [vmem:[%s11366_s1 + $0xc20] ss:$16 sps:$4 sm:$0xff]   ;;  %v8086_v20 = vld [vmem:[%s11366_s1 + $0xc28] ss:$16 sps:$4 sm:$0xff]  }
 0x14b   :  { %5215 = vmatpush1.bf16.msra.mxu0 %v7990_v21  ;;  %5774 = vmatpush1.bf16.msra.mxu1 %v7993_v22  ;;  %v8091_v21 = vld [vmem:[%s11366_s1 + $0xc44] ss:$16 sps:$4 sm:$0xff]   ;;  %v8094_v22 = vld [vmem:[%s11366_s1 + $0xc4c] ss:$16 sps:$4 sm:$0xff]  }
 0x14c   :  { %5216 = vmatprep.subr.bf16.mxu0 %v7998_v23  ;;  %5775 = vmatprep.subr.bf16.mxu1 %v8001_v24  ;;  %v8089_v23 = vld [vmem:[%s11366_s1 + $0xc40] ss:$16 sps:$4 sm:$0xff]   ;;  %v8092_v24 = vld [vmem:[%s11366_s1 + $0xc48] ss:$16 sps:$4 sm:$0xff]  }
 0x14f   :  { %5217 = vmatpush1.bf16.msra.mxu0 %v7996_v25  ;;  %5776 = vmatpush1.bf16.msra.mxu1 %v7999_v26  ;;  %v8097_v25 = vld [vmem:[%s11366_s1 + $0xc64] ss:$16 sps:$4 sm:$0xff]   ;;  %v8100_v26 = vld [vmem:[%s11366_s1 + $0xc6c] ss:$16 sps:$4 sm:$0xff]  }
 0x150   :  { %5218 = vmatprep.subr.bf16.mxu0 %v8004_v27  ;;  %5777 = vmatprep.subr.bf16.mxu1 %v8007_v28  ;;  %v8095_v27 = vld [vmem:[%s11366_s1 + $0xc60] ss:$16 sps:$4 sm:$0xff]   ;;  %v8098_v28 = vld [vmem:[%s11366_s1 + $0xc68] ss:$16 sps:$4 sm:$0xff]  }
 0x153   :  { %5219 = vmatpush1.bf16.msra.mxu0 %v8002_v29  ;;  %5778 = vmatpush1.bf16.msra.mxu1 %v8005_v30  ;;  %v8103_v29 = vld [vmem:[%s11366_s1 + $0xc84] ss:$16 sps:$4 sm:$0xff]   ;;  %v8106_v30 = vld [vmem:[%s11366_s1 + $0xc8c] ss:$16 sps:$4 sm:$0xff]  }
 0x154   :  { %5220 = vmatprep.subr.bf16.mxu0 %v8010_v31  ;;  %5779 = vmatprep.subr.bf16.mxu1 %v8013_v32  ;;  %v8101_v31 = vld [vmem:[%s11366_s1 + $0xc80] ss:$16 sps:$4 sm:$0xff]   ;;  %v8104_v32 = vld [vmem:[%s11366_s1 + $0xc88] ss:$16 sps:$4 sm:$0xff]  }
 0x157   :  { %5221 = vmatpush1.bf16.msra.mxu0 %v8008_v33  ;;  %5780 = vmatpush1.bf16.msra.mxu1 %v8011_v34  ;;  %v8109_v33 = vld [vmem:[%s11366_s1 + $0xca4] ss:$16 sps:$4 sm:$0xff]   ;;  %v8112_v34 = vld [vmem:[%s11366_s1 + $0xcac] ss:$16 sps:$4 sm:$0xff]  }
 0x158   :  { %5222 = vmatprep.subr.bf16.mxu0 %v8016_v35  ;;  %5781 = vmatprep.subr.bf16.mxu1 %v8019_v36  ;;  %v8107_v35 = vld [vmem:[%s11366_s1 + $0xca0] ss:$16 sps:$4 sm:$0xff]   ;;  %v8110_v36 = vld [vmem:[%s11366_s1 + $0xca8] ss:$16 sps:$4 sm:$0xff]  }
 0x15b   :  { %5223 = vmatpush1.bf16.msra.mxu0 %v8014_v37  ;;  %5782 = vmatpush1.bf16.msra.mxu1 %v8017_v38  ;;  %v8115_v37 = vld [vmem:[%s11366_s1 + $0xcc4] ss:$16 sps:$4 sm:$0xff]   ;;  %v8118_v38 = vld [vmem:[%s11366_s1 + $0xccc] ss:$16 sps:$4 sm:$0xff]  }
 0x15c   :  { %5224 = vmatprep.subr.bf16.mxu0 %v8022_v39  ;;  %5783 = vmatprep.subr.bf16.mxu1 %v8025_v40  ;;  %v8113_v39 = vld [vmem:[%s11366_s1 + $0xcc0] ss:$16 sps:$4 sm:$0xff]   ;;  %v8116_v40 = vld [vmem:[%s11366_s1 + $0xcc8] ss:$16 sps:$4 sm:$0xff]  }
 0x15f   :  { %5225 = vmatpush1.bf16.msra.mxu0 %v8020_v41  ;;  %5784 = vmatpush1.bf16.msra.mxu1 %v8023_v42  ;;  %v8121_v41 = vld [vmem:[%s11366_s1 + $0xce4] ss:$16 sps:$4 sm:$0xff]   ;;  %v8124_v42 = vld [vmem:[%s11366_s1 + $0xcec] ss:$16 sps:$4 sm:$0xff]  }
 0x160   :  { %5226 = vmatprep.subr.bf16.mxu0 %v8028_v43  ;;  %5785 = vmatprep.subr.bf16.mxu1 %v8031_v44  ;;  %v8119_v43 = vld [vmem:[%s11366_s1 + $0xce0] ss:$16 sps:$4 sm:$0xff]   ;;  %v8122_v44 = vld [vmem:[%s11366_s1 + $0xce8] ss:$16 sps:$4 sm:$0xff]  }
 0x163   :  { %5227 = vmatpush1.bf16.msra.mxu0 %v8026_v45  ;;  %5786 = vmatpush1.bf16.msra.mxu1 %v8029_v46  ;;  %v8127_v45 = vld [vmem:[%s11366_s1 + $0xd04] ss:$16 sps:$4 sm:$0xff]   ;;  %v8130_v46 = vld [vmem:[%s11366_s1 + $0xd0c] ss:$16 sps:$4 sm:$0xff]  }
 0x164   :  { %5228 = vmatprep.subr.bf16.mxu0 %v8034_v47  ;;  %5787 = vmatprep.subr.bf16.mxu1 %v8037_v48  ;;  %v8125_v47 = vld [vmem:[%s11366_s1 + $0xd00] ss:$16 sps:$4 sm:$0xff]   ;;  %v8128_v48 = vld [vmem:[%s11366_s1 + $0xd08] ss:$16 sps:$4 sm:$0xff]  }
 0x167   :  { %5229 = vmatpush1.bf16.msra.mxu0 %v8032_v49  ;;  %5788 = vmatpush1.bf16.msra.mxu1 %v8035_v50  ;;  %v8133_v49 = vld [vmem:[%s11366_s1 + $0xd24] ss:$16 sps:$4 sm:$0xff]   ;;  %v8136_v50 = vld [vmem:[%s11366_s1 + $0xd2c] ss:$16 sps:$4 sm:$0xff]  }
 0x168   :  { %5230 = vmatprep.subr.bf16.mxu0 %v8040_v51  ;;  %5789 = vmatprep.subr.bf16.mxu1 %v8043_v52  ;;  %v8131_v51 = vld [vmem:[%s11366_s1 + $0xd20] ss:$16 sps:$4 sm:$0xff]   ;;  %v8134_v52 = vld [vmem:[%s11366_s1 + $0xd28] ss:$16 sps:$4 sm:$0xff]  }
 0x16b   :  { %5231 = vmatpush1.bf16.msra.mxu0 %v8038_v53  ;;  %5790 = vmatpush1.bf16.msra.mxu1 %v8041_v54  ;;  %v8139_v53 = vld [vmem:[%s11366_s1 + $0xd44] ss:$16 sps:$4 sm:$0xff]   ;;  %v8142_v54 = vld [vmem:[%s11366_s1 + $0xd4c] ss:$16 sps:$4 sm:$0xff]  }
 0x16c   :  { %5232 = vmatprep.subr.bf16.mxu0 %v8046_v55  ;;  %5791 = vmatprep.subr.bf16.mxu1 %v8049_v56  ;;  %v8137_v55 = vld [vmem:[%s11366_s1 + $0xd40] ss:$16 sps:$4 sm:$0xff]   ;;  %v8140_v56 = vld [vmem:[%s11366_s1 + $0xd48] ss:$16 sps:$4 sm:$0xff]  }
 0x16f   :  { %5233 = vmatpush1.bf16.msra.mxu0 %v8044_v57  ;;  %5792 = vmatpush1.bf16.msra.mxu1 %v8047_v58  ;;  %v8145_v57 = vld [vmem:[%s11366_s1 + $0xd64] ss:$16 sps:$4 sm:$0xff]   ;;  %v8148_v58 = vld [vmem:[%s11366_s1 + $0xd6c] ss:$16 sps:$4 sm:$0xff]  }
 0x170   :  { %5234 = vmatprep.subr.bf16.mxu0 %v8052_v59  ;;  %5793 = vmatprep.subr.bf16.mxu1 %v8055_v60  ;;  %v8143_v59 = vld [vmem:[%s11366_s1 + $0xd60] ss:$16 sps:$4 sm:$0xff]   ;;  %v8146_v60 = vld [vmem:[%s11366_s1 + $0xd68] ss:$16 sps:$4 sm:$0xff]  }
 0x173   :  { %5235 = vmatpush1.bf16.msra.mxu0 %v8050_v61  ;;  %5794 = vmatpush1.bf16.msra.mxu1 %v8053_v62  ;;  %v8151_v61 = vld [vmem:[%s11366_s1 + $0xd84] ss:$16 sps:$4 sm:$0xff]   ;;  %v8154_v62 = vld [vmem:[%s11366_s1 + $0xd8c] ss:$16 sps:$4 sm:$0xff]  }
 0x174   :  { %5236 = vmatprep.subr.bf16.mxu0 %v8058_v63  ;;  %5795 = vmatprep.subr.bf16.mxu1 %v8061_v0  ;;  %v8149_v63 = vld [vmem:[%s11366_s1 + $0xd80] ss:$16 sps:$4 sm:$0xff]   ;;  %v8152_v0 = vld [vmem:[%s11366_s1 + $0xd88] ss:$16 sps:$4 sm:$0xff]  }
 0x177   :  { %5237 = vmatpush1.bf16.msra.mxu0 %v8056_v1  ;;  %5796 = vmatpush1.bf16.msra.mxu1 %v8059_v2  ;;  %v8157_v1 = vld [vmem:[%s11366_s1 + $0xda4] ss:$16 sps:$4 sm:$0xff]   ;;  %v8160_v2 = vld [vmem:[%s11366_s1 + $0xdac] ss:$16 sps:$4 sm:$0xff]  }
 0x178   :  { %5238 = vmatprep.subr.bf16.mxu0 %v8064_v3  ;;  %5797 = vmatprep.subr.bf16.mxu1 %v8067_v4  ;;  %v8155_v3 = vld [vmem:[%s11366_s1 + $0xda0] ss:$16 sps:$4 sm:$0xff]   ;;  %v8158_v4 = vld [vmem:[%s11366_s1 + $0xda8] ss:$16 sps:$4 sm:$0xff]  }
 0x17b   :  { %5239 = vmatpush1.bf16.msra.mxu0 %v8062_v5  ;;  %5798 = vmatpush1.bf16.msra.mxu1 %v8065_v6  ;;  %v8163_v5 = vld [vmem:[%s11366_s1 + $0xdc4] ss:$16 sps:$4 sm:$0xff]   ;;  %v8166_v6 = vld [vmem:[%s11366_s1 + $0xdcc] ss:$16 sps:$4 sm:$0xff]  }
 0x17c   :  { %5240 = vmatprep.subr.bf16.mxu0 %v8070_v7  ;;  %5799 = vmatprep.subr.bf16.mxu1 %v8073_v8  ;;  %v8161_v7 = vld [vmem:[%s11366_s1 + $0xdc0] ss:$16 sps:$4 sm:$0xff]   ;;  %v8164_v8 = vld [vmem:[%s11366_s1 + $0xdc8] ss:$16 sps:$4 sm:$0xff]  }
 0x17f   :  { %5241 = vmatpush1.bf16.msra.mxu0 %v8068_v9  ;;  %5800 = vmatpush1.bf16.msra.mxu1 %v8071_v10  ;;  %v8169_v9 = vld [vmem:[%s11366_s1 + $0xde4] ss:$16 sps:$4 sm:$0xff]   ;;  %v8172_v10 = vld [vmem:[%s11366_s1 + $0xdec] ss:$16 sps:$4 sm:$0xff]  }
 0x180   :  { %5253 = vmatprep.subr.bf16.mxu0 %v8079_v12  ;;  %5812 = vmatprep.subr.bf16.mxu1 %v8082_v13  ;;  %v8170_v12 = vld [vmem:[%s11366_s1 + $0xde8] ss:$16 sps:$4 sm:$0xff]   ;;  %v8173_v13 = vld [vmem:[%s11367_s0 + $0x30] ss:$100 sps:$4 sm:$0xff]  }
 0x182   :  { %5243 = vmatmul.mubr.bf16.vlgmr.msra.gmra.mrb[0].mxu0 %v8074_v11  ;;  %5802 = vmatmul.mubr.bf16.vlgmr.msra.gmra.mrb[0].mxu1 %v8074_v11  ;;  %v8167_v11 = vld [vmem:[%s11366_s1 + $0xde0] ss:$16 sps:$4 sm:$0xff]  }
 0x183   :  { %5254 = vmatpush1.bf16.msra.mxu0 %v8077_v14  ;;  %5813 = vmatpush1.bf16.msra.mxu1 %v8080_v15  ;;  %v8178_v14 = vld [vmem:[%s11366_s1 + $0xe04] ss:$16 sps:$4 sm:$0xff]   ;;  %v8181_v15 = vld [vmem:[%s11366_s1 + $0xe0c] ss:$16 sps:$4 sm:$0xff]  }
 0x184   :  { %5255 = vmatprep.subr.bf16.mxu0 %v8085_v16  ;;  %5814 = vmatprep.subr.bf16.mxu1 %v8088_v17  ;;  %v8176_v16 = vld [vmem:[%s11366_s1 + $0xe00] ss:$16 sps:$4 sm:$0xff]   ;;  %v8179_v17 = vld [vmem:[%s11366_s1 + $0xe08] ss:$16 sps:$4 sm:$0xff]  }
 0x185   :  { %5285 = vmatprep.mubr.bf16.mxu0 %v8175_v18  ;;  %5844 = vmatprep.mubr.bf16.mxu1 %v8175_v18  ;;  %v8184_v18 = vld [vmem:[%s11366_s1 + $0xe24] ss:$16 sps:$4 sm:$0xff]  }
 0x187   :  { %5256 = vmatpush1.bf16.msra.mxu0 %v8083_v19  ;;  %5815 = vmatpush1.bf16.msra.mxu1 %v8086_v20  ;;  %v8187_v19 = vld [vmem:[%s11366_s1 + $0xe2c] ss:$16 sps:$4 sm:$0xff]  }
 0x188   :  { %5257 = vmatprep.subr.bf16.mxu0 %v8091_v21  ;;  %5816 = vmatprep.subr.bf16.mxu1 %v8094_v22  ;;  %v8274_v20 = vld [vmem:[%s11367_s0 + $0x3c] ss:$100 sps:$4 sm:$0xff]   ;;  %v8185_v22 = vld [vmem:[%s11366_s1 + $0xe28] ss:$16 sps:$4 sm:$0xff]  }
 0x189   :  { %v8182_v21 = vld [vmem:[%s11366_s1 + $0xe20] ss:$16 sps:$4 sm:$0xff]  }
 0x18b   :  { %5258 = vmatpush1.bf16.msra.mxu0 %v8089_v23  ;;  %5817 = vmatpush1.bf16.msra.mxu1 %v8092_v24  ;;  %v8190_v23 = vld [vmem:[%s11366_s1 + $0xe44] ss:$16 sps:$4 sm:$0xff]   ;;  %v8193_v24 = vld [vmem:[%s11366_s1 + $0xe4c] ss:$16 sps:$4 sm:$0xff]  }
 0x18c   :  { %5259 = vmatprep.subr.bf16.mxu0 %v8097_v25  ;;  %5818 = vmatprep.subr.bf16.mxu1 %v8100_v26  ;;  %v8188_v25 = vld [vmem:[%s11366_s1 + $0xe40] ss:$16 sps:$4 sm:$0xff]   ;;  %v8191_v26 = vld [vmem:[%s11366_s1 + $0xe48] ss:$16 sps:$4 sm:$0xff]  }
 0x18f   :  { %5260 = vmatpush1.bf16.msra.mxu0 %v8095_v27  ;;  %5819 = vmatpush1.bf16.msra.mxu1 %v8098_v28  ;;  %v8196_v27 = vld [vmem:[%s11366_s1 + $0xe64] ss:$16 sps:$4 sm:$0xff]   ;;  %v8199_v28 = vld [vmem:[%s11366_s1 + $0xe6c] ss:$16 sps:$4 sm:$0xff]  }
 0x190   :  { %5261 = vmatprep.subr.bf16.mxu0 %v8103_v29  ;;  %5820 = vmatprep.subr.bf16.mxu1 %v8106_v30  ;;  %v8194_v29 = vld [vmem:[%s11366_s1 + $0xe60] ss:$16 sps:$4 sm:$0xff]   ;;  %v8197_v30 = vld [vmem:[%s11366_s1 + $0xe68] ss:$16 sps:$4 sm:$0xff]  }
 0x193   :  { %5262 = vmatpush1.bf16.msra.mxu0 %v8101_v31  ;;  %5821 = vmatpush1.bf16.msra.mxu1 %v8104_v32  ;;  %v8202_v31 = vld [vmem:[%s11366_s1 + $0xe84] ss:$16 sps:$4 sm:$0xff]   ;;  %v8205_v32 = vld [vmem:[%s11366_s1 + $0xe8c] ss:$16 sps:$4 sm:$0xff]  }
 0x194   :  { %5263 = vmatprep.subr.bf16.mxu0 %v8109_v33  ;;  %5822 = vmatprep.subr.bf16.mxu1 %v8112_v34  ;;  %v8200_v33 = vld [vmem:[%s11366_s1 + $0xe80] ss:$16 sps:$4 sm:$0xff]   ;;  %v8203_v34 = vld [vmem:[%s11366_s1 + $0xe88] ss:$16 sps:$4 sm:$0xff]  }
 0x197   :  { %5264 = vmatpush1.bf16.msra.mxu0 %v8107_v35  ;;  %5823 = vmatpush1.bf16.msra.mxu1 %v8110_v36  ;;  %v8208_v35 = vld [vmem:[%s11366_s1 + $0xea4] ss:$16 sps:$4 sm:$0xff]   ;;  %v8211_v36 = vld [vmem:[%s11366_s1 + $0xeac] ss:$16 sps:$4 sm:$0xff]  }
 0x198   :  { %5265 = vmatprep.subr.bf16.mxu0 %v8115_v37  ;;  %5824 = vmatprep.subr.bf16.mxu1 %v8118_v38  ;;  %v8206_v37 = vld [vmem:[%s11366_s1 + $0xea0] ss:$16 sps:$4 sm:$0xff]   ;;  %v8209_v38 = vld [vmem:[%s11366_s1 + $0xea8] ss:$16 sps:$4 sm:$0xff]  }
 0x19b   :  { %5266 = vmatpush1.bf16.msra.mxu0 %v8113_v39  ;;  %5825 = vmatpush1.bf16.msra.mxu1 %v8116_v40  ;;  %v8214_v39 = vld [vmem:[%s11366_s1 + $0xec4] ss:$16 sps:$4 sm:$0xff]   ;;  %v8217_v40 = vld [vmem:[%s11366_s1 + $0xecc] ss:$16 sps:$4 sm:$0xff]  }
 0x19c   :  { %5267 = vmatprep.subr.bf16.mxu0 %v8121_v41  ;;  %5826 = vmatprep.subr.bf16.mxu1 %v8124_v42  ;;  %v8212_v41 = vld [vmem:[%s11366_s1 + $0xec0] ss:$16 sps:$4 sm:$0xff]   ;;  %v8215_v42 = vld [vmem:[%s11366_s1 + $0xec8] ss:$16 sps:$4 sm:$0xff]  }
 0x19f   :  { %5268 = vmatpush1.bf16.msra.mxu0 %v8119_v43  ;;  %5827 = vmatpush1.bf16.msra.mxu1 %v8122_v44  ;;  %v8220_v43 = vld [vmem:[%s11366_s1 + $0xee4] ss:$16 sps:$4 sm:$0xff]   ;;  %v8223_v44 = vld [vmem:[%s11366_s1 + $0xeec] ss:$16 sps:$4 sm:$0xff]  }
 0x1a0   :  { %5269 = vmatprep.subr.bf16.mxu0 %v8127_v45  ;;  %5828 = vmatprep.subr.bf16.mxu1 %v8130_v46  ;;  %v8218_v45 = vld [vmem:[%s11366_s1 + $0xee0] ss:$16 sps:$4 sm:$0xff]   ;;  %v8221_v46 = vld [vmem:[%s11366_s1 + $0xee8] ss:$16 sps:$4 sm:$0xff]  }
 0x1a3   :  { %5270 = vmatpush1.bf16.msra.mxu0 %v8125_v47  ;;  %5829 = vmatpush1.bf16.msra.mxu1 %v8128_v48  ;;  %v8226_v47 = vld [vmem:[%s11366_s1 + $0xf04] ss:$16 sps:$4 sm:$0xff]   ;;  %v8229_v48 = vld [vmem:[%s11366_s1 + $0xf0c] ss:$16 sps:$4 sm:$0xff]  }
 0x1a4   :  { %5271 = vmatprep.subr.bf16.mxu0 %v8133_v49  ;;  %5830 = vmatprep.subr.bf16.mxu1 %v8136_v50  ;;  %v8224_v49 = vld [vmem:[%s11366_s1 + $0xf00] ss:$16 sps:$4 sm:$0xff]   ;;  %v8227_v50 = vld [vmem:[%s11366_s1 + $0xf08] ss:$16 sps:$4 sm:$0xff]  }
 0x1a7   :  { %5272 = vmatpush1.bf16.msra.mxu0 %v8131_v51  ;;  %5831 = vmatpush1.bf16.msra.mxu1 %v8134_v52  ;;  %v8232_v51 = vld [vmem:[%s11366_s1 + $0xf24] ss:$16 sps:$4 sm:$0xff]   ;;  %v8235_v52 = vld [vmem:[%s11366_s1 + $0xf2c] ss:$16 sps:$4 sm:$0xff]  }
 0x1a8   :  { %5273 = vmatprep.subr.bf16.mxu0 %v8139_v53  ;;  %5832 = vmatprep.subr.bf16.mxu1 %v8142_v54  ;;  %v8230_v53 = vld [vmem:[%s11366_s1 + $0xf20] ss:$16 sps:$4 sm:$0xff]   ;;  %v8233_v54 = vld [vmem:[%s11366_s1 + $0xf28] ss:$16 sps:$4 sm:$0xff]  }
 0x1ab   :  { %5274 = vmatpush1.bf16.msra.mxu0 %v8137_v55  ;;  %5833 = vmatpush1.bf16.msra.mxu1 %v8140_v56  ;;  %v8238_v55 = vld [vmem:[%s11366_s1 + $0xf44] ss:$16 sps:$4 sm:$0xff]   ;;  %v8241_v56 = vld [vmem:[%s11366_s1 + $0xf4c] ss:$16 sps:$4 sm:$0xff]  }
 0x1ac   :  { %5275 = vmatprep.subr.bf16.mxu0 %v8145_v57  ;;  %5834 = vmatprep.subr.bf16.mxu1 %v8148_v58  ;;  %v8236_v57 = vld [vmem:[%s11366_s1 + $0xf40] ss:$16 sps:$4 sm:$0xff]   ;;  %v8239_v58 = vld [vmem:[%s11366_s1 + $0xf48] ss:$16 sps:$4 sm:$0xff]  }
 0x1af   :  { %5276 = vmatpush1.bf16.msra.mxu0 %v8143_v59  ;;  %5835 = vmatpush1.bf16.msra.mxu1 %v8146_v60  ;;  %v8244_v59 = vld [vmem:[%s11366_s1 + $0xf64] ss:$16 sps:$4 sm:$0xff]   ;;  %v8247_v60 = vld [vmem:[%s11366_s1 + $0xf6c] ss:$16 sps:$4 sm:$0xff]  }
 0x1b0   :  { %5277 = vmatprep.subr.bf16.mxu0 %v8151_v61  ;;  %5836 = vmatprep.subr.bf16.mxu1 %v8154_v62  ;;  %v8242_v61 = vld [vmem:[%s11366_s1 + $0xf60] ss:$16 sps:$4 sm:$0xff]   ;;  %v8245_v62 = vld [vmem:[%s11366_s1 + $0xf68] ss:$16 sps:$4 sm:$0xff]  }
 0x1b3   :  { %5278 = vmatpush1.bf16.msra.mxu0 %v8149_v63  ;;  %5837 = vmatpush1.bf16.msra.mxu1 %v8152_v0  ;;  %v8250_v63 = vld [vmem:[%s11366_s1 + $0xf84] ss:$16 sps:$4 sm:$0xff]   ;;  %v8253_v0 = vld [vmem:[%s11366_s1 + $0xf8c] ss:$16 sps:$4 sm:$0xff]  }
 0x1b4   :  { %5279 = vmatprep.subr.bf16.mxu0 %v8157_v1  ;;  %5838 = vmatprep.subr.bf16.mxu1 %v8160_v2  ;;  %v8248_v1 = vld [vmem:[%s11366_s1 + $0xf80] ss:$16 sps:$4 sm:$0xff]   ;;  %v8251_v2 = vld [vmem:[%s11366_s1 + $0xf88] ss:$16 sps:$4 sm:$0xff]  }
 0x1b7   :  { %5280 = vmatpush1.bf16.msra.mxu0 %v8155_v3  ;;  %5839 = vmatpush1.bf16.msra.mxu1 %v8158_v4  ;;  %v8256_v3 = vld [vmem:[%s11366_s1 + $0xfa4] ss:$16 sps:$4 sm:$0xff]   ;;  %v8259_v4 = vld [vmem:[%s11366_s1 + $0xfac] ss:$16 sps:$4 sm:$0xff]  }
 0x1b8   :  { %5281 = vmatprep.subr.bf16.mxu0 %v8163_v5  ;;  %5840 = vmatprep.subr.bf16.mxu1 %v8166_v6  ;;  %v8254_v5 = vld [vmem:[%s11366_s1 + $0xfa0] ss:$16 sps:$4 sm:$0xff]   ;;  %v8257_v6 = vld [vmem:[%s11366_s1 + $0xfa8] ss:$16 sps:$4 sm:$0xff]  }
 0x1bb   :  { %5282 = vmatpush1.bf16.msra.mxu0 %v8161_v7  ;;  %5841 = vmatpush1.bf16.msra.mxu1 %v8164_v8  ;;  %v8262_v7 = vld [vmem:[%s11366_s1 + $0xfc4] ss:$16 sps:$4 sm:$0xff]   ;;  %v8265_v8 = vld [vmem:[%s11366_s1 + $0xfcc] ss:$16 sps:$4 sm:$0xff]  }
 0x1bc   :  { %5283 = vmatprep.subr.bf16.mxu0 %v8169_v9  ;;  %5842 = vmatprep.subr.bf16.mxu1 %v8172_v10  ;;  %v8260_v9 = vld [vmem:[%s11366_s1 + $0xfc0] ss:$16 sps:$4 sm:$0xff]   ;;  %v8263_v10 = vld [vmem:[%s11366_s1 + $0xfc8] ss:$16 sps:$4 sm:$0xff]  }
 0x1bf   :  { %5284 = vmatpush1.bf16.msra.mxu0 %v8167_v11  ;;  %5843 = vmatpush1.bf16.msra.mxu1 %v8170_v12  ;;  %v8268_v11 = vld [vmem:[%s11366_s1 + $0xfe4] ss:$16 sps:$4 sm:$0xff]   ;;  %v8271_v12 = vld [vmem:[%s11366_s1 + $0xfec] ss:$16 sps:$4 sm:$0xff]  }
 0x1c0   :  { %5296 = vmatprep.subr.bf16.mxu0 %v8178_v14  ;;  %5855 = vmatprep.subr.bf16.mxu1 %v8181_v15  ;;  %v8269_v14 = vld [vmem:[%s11366_s1 + $0xfe8] ss:$16 sps:$4 sm:$0xff]   ;;  %v8277_v15 = vld [vmem:[%s11366_s1 + $0x1004] ss:$16 sps:$4 sm:$0xff]  }
 0x1c2   :  { %5286 = vmatmul.mubr.bf16.vlgmr.msra.gmra.mrb[0].mxu0 %v8173_v13  ;;  %5845 = vmatmul.mubr.bf16.vlgmr.msra.gmra.mrb[0].mxu1 %v8173_v13  ;;  %v8266_v13 = vld [vmem:[%s11366_s1 + $0xfe0] ss:$16 sps:$4 sm:$0xff]  }
 0x1c3   :  { %5297 = vmatpush1.bf16.msra.mxu0 %v8176_v16  ;;  %5856 = vmatpush1.bf16.msra.mxu1 %v8179_v17  ;;  %v8280_v16 = vld [vmem:[%s11366_s1 + $0x100c] ss:$16 sps:$4 sm:$0xff]  }
 0x1c4   :  { %5298 = vmatprep.subr.bf16.mxu0 %v8184_v18  ;;  %5857 = vmatprep.subr.bf16.mxu1 %v8187_v19  ;;  %v8272_v17 = vld [vmem:[%s11367_s0 + $0x38] ss:$100 sps:$4 sm:$0xff]   ;;  %v8275_v18 = vld [vmem:[%s11366_s1 + $0x1000] ss:$16 sps:$4 sm:$0xff]  }
 0x1c5   :  { %5328 = vmatprep.mubr.bf16.mxu0 %v8274_v20  ;;  %5887 = vmatprep.mubr.bf16.mxu1 %v8274_v20  ;;  %v8278_v19 = vld [vmem:[%s11366_s1 + $0x1008] ss:$16 sps:$4 sm:$0xff]   ;;  %v8283_v20 = vld [vmem:[%s11366_s1 + $0x1024] ss:$16 sps:$4 sm:$0xff]  }
 0x1c7   :  { %5299 = vmatpush1.bf16.msra.mxu0 %v8182_v21  ;;  %5858 = vmatpush1.bf16.msra.mxu1 %v8185_v22  ;;  %v8286_v21 = vld [vmem:[%s11366_s1 + $0x102c] ss:$16 sps:$4 sm:$0xff]   ;;  %v8373_v22 = vld [vmem:[%s11367_s0 + $0x44] ss:$100 sps:$4 sm:$0xff]  }
 0x1c8   :  { %5300 = vmatprep.subr.bf16.mxu0 %v8190_v23  ;;  %5859 = vmatprep.subr.bf16.mxu1 %v8193_v24  ;;  %v8281_v23 = vld [vmem:[%s11366_s1 + $0x1020] ss:$16 sps:$4 sm:$0xff]   ;;  %v8284_v24 = vld [vmem:[%s11366_s1 + $0x1028] ss:$16 sps:$4 sm:$0xff]  }
 0x1cb   :  { %5301 = vmatpush1.bf16.msra.mxu0 %v8188_v25  ;;  %5860 = vmatpush1.bf16.msra.mxu1 %v8191_v26  ;;  %v8289_v25 = vld [vmem:[%s11366_s1 + $0x1044] ss:$16 sps:$4 sm:$0xff]   ;;  %v8292_v26 = vld [vmem:[%s11366_s1 + $0x104c] ss:$16 sps:$4 sm:$0xff]  }
 0x1cc   :  { %5302 = vmatprep.subr.bf16.mxu0 %v8196_v27  ;;  %5861 = vmatprep.subr.bf16.mxu1 %v8199_v28  ;;  %v8287_v27 = vld [vmem:[%s11366_s1 + $0x1040] ss:$16 sps:$4 sm:$0xff]   ;;  %v8290_v28 = vld [vmem:[%s11366_s1 + $0x1048] ss:$16 sps:$4 sm:$0xff]  }
 0x1cf   :  { %5303 = vmatpush1.bf16.msra.mxu0 %v8194_v29  ;;  %5862 = vmatpush1.bf16.msra.mxu1 %v8197_v30  ;;  %v8295_v29 = vld [vmem:[%s11366_s1 + $0x1064] ss:$16 sps:$4 sm:$0xff]   ;;  %v8298_v30 = vld [vmem:[%s11366_s1 + $0x106c] ss:$16 sps:$4 sm:$0xff]  }
 0x1d0   :  { %5304 = vmatprep.subr.bf16.mxu0 %v8202_v31  ;;  %5863 = vmatprep.subr.bf16.mxu1 %v8205_v32  ;;  %v8293_v31 = vld [vmem:[%s11366_s1 + $0x1060] ss:$16 sps:$4 sm:$0xff]   ;;  %v8296_v32 = vld [vmem:[%s11366_s1 + $0x1068] ss:$16 sps:$4 sm:$0xff]  }
 0x1d3   :  { %5305 = vmatpush1.bf16.msra.mxu0 %v8200_v33  ;;  %5864 = vmatpush1.bf16.msra.mxu1 %v8203_v34  ;;  %v8301_v33 = vld [vmem:[%s11366_s1 + $0x1084] ss:$16 sps:$4 sm:$0xff]   ;;  %v8304_v34 = vld [vmem:[%s11366_s1 + $0x108c] ss:$16 sps:$4 sm:$0xff]  }
 0x1d4   :  { %5306 = vmatprep.subr.bf16.mxu0 %v8208_v35  ;;  %5865 = vmatprep.subr.bf16.mxu1 %v8211_v36  ;;  %v8299_v35 = vld [vmem:[%s11366_s1 + $0x1080] ss:$16 sps:$4 sm:$0xff]   ;;  %v8302_v36 = vld [vmem:[%s11366_s1 + $0x1088] ss:$16 sps:$4 sm:$0xff]  }
 0x1d7   :  { %5307 = vmatpush1.bf16.msra.mxu0 %v8206_v37  ;;  %5866 = vmatpush1.bf16.msra.mxu1 %v8209_v38  ;;  %v8307_v37 = vld [vmem:[%s11366_s1 + $0x10a4] ss:$16 sps:$4 sm:$0xff]   ;;  %v8310_v38 = vld [vmem:[%s11366_s1 + $0x10ac] ss:$16 sps:$4 sm:$0xff]  }
 0x1d8   :  { %5308 = vmatprep.subr.bf16.mxu0 %v8214_v39  ;;  %5867 = vmatprep.subr.bf16.mxu1 %v8217_v40  ;;  %v8305_v39 = vld [vmem:[%s11366_s1 + $0x10a0] ss:$16 sps:$4 sm:$0xff]   ;;  %v8308_v40 = vld [vmem:[%s11366_s1 + $0x10a8] ss:$16 sps:$4 sm:$0xff]  }
 0x1db   :  { %5309 = vmatpush1.bf16.msra.mxu0 %v8212_v41  ;;  %5868 = vmatpush1.bf16.msra.mxu1 %v8215_v42  ;;  %v8313_v41 = vld [vmem:[%s11366_s1 + $0x10c4] ss:$16 sps:$4 sm:$0xff]   ;;  %v8316_v42 = vld [vmem:[%s11366_s1 + $0x10cc] ss:$16 sps:$4 sm:$0xff]  }
 0x1dc   :  { %5310 = vmatprep.subr.bf16.mxu0 %v8220_v43  ;;  %5869 = vmatprep.subr.bf16.mxu1 %v8223_v44  ;;  %v8311_v43 = vld [vmem:[%s11366_s1 + $0x10c0] ss:$16 sps:$4 sm:$0xff]   ;;  %v8314_v44 = vld [vmem:[%s11366_s1 + $0x10c8] ss:$16 sps:$4 sm:$0xff]  }
 0x1df   :  { %5311 = vmatpush1.bf16.msra.mxu0 %v8218_v45  ;;  %5870 = vmatpush1.bf16.msra.mxu1 %v8221_v46  ;;  %v8319_v45 = vld [vmem:[%s11366_s1 + $0x10e4] ss:$16 sps:$4 sm:$0xff]   ;;  %v8322_v46 = vld [vmem:[%s11366_s1 + $0x10ec] ss:$16 sps:$4 sm:$0xff]  }
 0x1e0   :  { %5312 = vmatprep.subr.bf16.mxu0 %v8226_v47  ;;  %5871 = vmatprep.subr.bf16.mxu1 %v8229_v48  ;;  %v8317_v47 = vld [vmem:[%s11366_s1 + $0x10e0] ss:$16 sps:$4 sm:$0xff]   ;;  %v8320_v48 = vld [vmem:[%s11366_s1 + $0x10e8] ss:$16 sps:$4 sm:$0xff]  }
 0x1e3   :  { %5313 = vmatpush1.bf16.msra.mxu0 %v8224_v49  ;;  %5872 = vmatpush1.bf16.msra.mxu1 %v8227_v50  ;;  %v8325_v49 = vld [vmem:[%s11366_s1 + $0x1104] ss:$16 sps:$4 sm:$0xff]   ;;  %v8328_v50 = vld [vmem:[%s11366_s1 + $0x110c] ss:$16 sps:$4 sm:$0xff]  }
 0x1e4   :  { %5314 = vmatprep.subr.bf16.mxu0 %v8232_v51  ;;  %5873 = vmatprep.subr.bf16.mxu1 %v8235_v52  ;;  %v8323_v51 = vld [vmem:[%s11366_s1 + $0x1100] ss:$16 sps:$4 sm:$0xff]   ;;  %v8326_v52 = vld [vmem:[%s11366_s1 + $0x1108] ss:$16 sps:$4 sm:$0xff]  }
 0x1e7   :  { %5315 = vmatpush1.bf16.msra.mxu0 %v8230_v53  ;;  %5874 = vmatpush1.bf16.msra.mxu1 %v8233_v54  ;;  %v8331_v53 = vld [vmem:[%s11366_s1 + $0x1124] ss:$16 sps:$4 sm:$0xff]   ;;  %v8334_v54 = vld [vmem:[%s11366_s1 + $0x112c] ss:$16 sps:$4 sm:$0xff]  }
 0x1e8   :  { %5316 = vmatprep.subr.bf16.mxu0 %v8238_v55  ;;  %5875 = vmatprep.subr.bf16.mxu1 %v8241_v56  ;;  %v8329_v55 = vld [vmem:[%s11366_s1 + $0x1120] ss:$16 sps:$4 sm:$0xff]   ;;  %v8332_v56 = vld [vmem:[%s11366_s1 + $0x1128] ss:$16 sps:$4 sm:$0xff]  }
 0x1eb   :  { %5317 = vmatpush1.bf16.msra.mxu0 %v8236_v57  ;;  %5876 = vmatpush1.bf16.msra.mxu1 %v8239_v58  ;;  %v8337_v57 = vld [vmem:[%s11366_s1 + $0x1144] ss:$16 sps:$4 sm:$0xff]   ;;  %v8340_v58 = vld [vmem:[%s11366_s1 + $0x114c] ss:$16 sps:$4 sm:$0xff]  }
 0x1ec   :  { %5318 = vmatprep.subr.bf16.mxu0 %v8244_v59  ;;  %5877 = vmatprep.subr.bf16.mxu1 %v8247_v60  ;;  %v8335_v59 = vld [vmem:[%s11366_s1 + $0x1140] ss:$16 sps:$4 sm:$0xff]   ;;  %v8338_v60 = vld [vmem:[%s11366_s1 + $0x1148] ss:$16 sps:$4 sm:$0xff]  }
 0x1ef   :  { %5319 = vmatpush1.bf16.msra.mxu0 %v8242_v61  ;;  %5878 = vmatpush1.bf16.msra.mxu1 %v8245_v62  ;;  %v8343_v61 = vld [vmem:[%s11366_s1 + $0x1164] ss:$16 sps:$4 sm:$0xff]   ;;  %v8346_v62 = vld [vmem:[%s11366_s1 + $0x116c] ss:$16 sps:$4 sm:$0xff]  }
 0x1f0   :  { %5320 = vmatprep.subr.bf16.mxu0 %v8250_v63  ;;  %5879 = vmatprep.subr.bf16.mxu1 %v8253_v0  ;;  %v8341_v63 = vld [vmem:[%s11366_s1 + $0x1160] ss:$16 sps:$4 sm:$0xff]   ;;  %v8344_v0 = vld [vmem:[%s11366_s1 + $0x1168] ss:$16 sps:$4 sm:$0xff]  }
 0x1f3   :  { %5321 = vmatpush1.bf16.msra.mxu0 %v8248_v1  ;;  %5880 = vmatpush1.bf16.msra.mxu1 %v8251_v2  ;;  %v8349_v1 = vld [vmem:[%s11366_s1 + $0x1184] ss:$16 sps:$4 sm:$0xff]   ;;  %v8352_v2 = vld [vmem:[%s11366_s1 + $0x118c] ss:$16 sps:$4 sm:$0xff]  }
 0x1f4   :  { %5322 = vmatprep.subr.bf16.mxu0 %v8256_v3  ;;  %5881 = vmatprep.subr.bf16.mxu1 %v8259_v4  ;;  %v8347_v3 = vld [vmem:[%s11366_s1 + $0x1180] ss:$16 sps:$4 sm:$0xff]   ;;  %v8350_v4 = vld [vmem:[%s11366_s1 + $0x1188] ss:$16 sps:$4 sm:$0xff]  }
 0x1f7   :  { %5323 = vmatpush1.bf16.msra.mxu0 %v8254_v5  ;;  %5882 = vmatpush1.bf16.msra.mxu1 %v8257_v6  ;;  %v8355_v5 = vld [vmem:[%s11366_s1 + $0x11a4] ss:$16 sps:$4 sm:$0xff]   ;;  %v8358_v6 = vld [vmem:[%s11366_s1 + $0x11ac] ss:$16 sps:$4 sm:$0xff]  }
 0x1f8   :  { %5324 = vmatprep.subr.bf16.mxu0 %v8262_v7  ;;  %5883 = vmatprep.subr.bf16.mxu1 %v8265_v8  ;;  %v8353_v7 = vld [vmem:[%s11366_s1 + $0x11a0] ss:$16 sps:$4 sm:$0xff]   ;;  %v8356_v8 = vld [vmem:[%s11366_s1 + $0x11a8] ss:$16 sps:$4 sm:$0xff]  }
 0x1fb   :  { %5325 = vmatpush1.bf16.msra.mxu0 %v8260_v9  ;;  %5884 = vmatpush1.bf16.msra.mxu1 %v8263_v10  ;;  %v8361_v9 = vld [vmem:[%s11366_s1 + $0x11c4] ss:$16 sps:$4 sm:$0xff]   ;;  %v8364_v10 = vld [vmem:[%s11366_s1 + $0x11cc] ss:$16 sps:$4 sm:$0xff]  }
 0x1fc   :  { %5326 = vmatprep.subr.bf16.mxu0 %v8268_v11  ;;  %5885 = vmatprep.subr.bf16.mxu1 %v8271_v12  ;;  %v8359_v11 = vld [vmem:[%s11366_s1 + $0x11c0] ss:$16 sps:$4 sm:$0xff]   ;;  %v8362_v12 = vld [vmem:[%s11366_s1 + $0x11c8] ss:$16 sps:$4 sm:$0xff]  }
 0x1ff   :  { %5327 = vmatpush1.bf16.msra.mxu0 %v8266_v13  ;;  %5886 = vmatpush1.bf16.msra.mxu1 %v8269_v14  ;;  %v8367_v13 = vld [vmem:[%s11366_s1 + $0x11e4] ss:$16 sps:$4 sm:$0xff]   ;;  %v8370_v14 = vld [vmem:[%s11366_s1 + $0x11ec] ss:$16 sps:$4 sm:$0xff]  }
 0x200   :  { %5339 = vmatprep.subr.bf16.mxu0 %v8277_v15  ;;  %5898 = vmatprep.subr.bf16.mxu1 %v8280_v16  ;;  %v8365_v15 = vld [vmem:[%s11366_s1 + $0x11e0] ss:$16 sps:$4 sm:$0xff]   ;;  %v8368_v16 = vld [vmem:[%s11366_s1 + $0x11e8] ss:$16 sps:$4 sm:$0xff]  }
 0x202   :  { %5329 = vmatmul.mubr.bf16.vlgmr.msra.gmra.mrb[0].mxu0 %v8272_v17  ;;  %5888 = vmatmul.mubr.bf16.vlgmr.msra.gmra.mrb[0].mxu1 %v8272_v17  ;;  %v8376_v17 = vld [vmem:[%s11366_s1 + $0x1204] ss:$16 sps:$4 sm:$0xff]  }
 0x203   :  { %5340 = vmatpush1.bf16.msra.mxu0 %v8275_v18  ;;  %5899 = vmatpush1.bf16.msra.mxu1 %v8278_v19  ;;  %v8379_v18 = vld [vmem:[%s11366_s1 + $0x120c] ss:$16 sps:$4 sm:$0xff]   ;;  %v8371_v19 = vld [vmem:[%s11367_s0 + $0x40] ss:$100 sps:$4 sm:$0xff]  }
 0x204   :  { %5341 = vmatprep.subr.bf16.mxu0 %v8283_v20  ;;  %5900 = vmatprep.subr.bf16.mxu1 %v8286_v21  ;;  %v8374_v20 = vld [vmem:[%s11366_s1 + $0x1200] ss:$16 sps:$4 sm:$0xff]   ;;  %v8377_v21 = vld [vmem:[%s11366_s1 + $0x1208] ss:$16 sps:$4 sm:$0xff]  }
 0x205   :  { %5371 = vmatprep.mubr.bf16.mxu0 %v8373_v22  ;;  %5930 = vmatprep.mubr.bf16.mxu1 %v8373_v22  ;;  %v8382_v22 = vld [vmem:[%s11366_s1 + $0x1224] ss:$16 sps:$4 sm:$0xff]  }
 0x207   :  { %5342 = vmatpush1.bf16.msra.mxu0 %v8281_v23  ;;  %5901 = vmatpush1.bf16.msra.mxu1 %v8284_v24  ;;  %v8385_v23 = vld [vmem:[%s11366_s1 + $0x122c] ss:$16 sps:$4 sm:$0xff]  }
 0x208   :  { %5343 = vmatprep.subr.bf16.mxu0 %v8289_v25  ;;  %5902 = vmatprep.subr.bf16.mxu1 %v8292_v26  ;;  %v8472_v24 = vld [vmem:[%s11367_s0 + $0x4c] ss:$100 sps:$4 sm:$0xff]   ;;  %v8383_v26 = vld [vmem:[%s11366_s1 + $0x1228] ss:$16 sps:$4 sm:$0xff]  }
 0x209   :  { %v8380_v25 = vld [vmem:[%s11366_s1 + $0x1220] ss:$16 sps:$4 sm:$0xff]  }
 0x20b   :  { %5344 = vmatpush1.bf16.msra.mxu0 %v8287_v27  ;;  %5903 = vmatpush1.bf16.msra.mxu1 %v8290_v28  ;;  %v8388_v27 = vld [vmem:[%s11366_s1 + $0x1244] ss:$16 sps:$4 sm:$0xff]   ;;  %v8391_v28 = vld [vmem:[%s11366_s1 + $0x124c] ss:$16 sps:$4 sm:$0xff]  }
 0x20c   :  { %5345 = vmatprep.subr.bf16.mxu0 %v8295_v29  ;;  %5904 = vmatprep.subr.bf16.mxu1 %v8298_v30  ;;  %v8386_v29 = vld [vmem:[%s11366_s1 + $0x1240] ss:$16 sps:$4 sm:$0xff]   ;;  %v8389_v30 = vld [vmem:[%s11366_s1 + $0x1248] ss:$16 sps:$4 sm:$0xff]  }
 0x20f   :  { %5346 = vmatpush1.bf16.msra.mxu0 %v8293_v31  ;;  %5905 = vmatpush1.bf16.msra.mxu1 %v8296_v32  ;;  %v8394_v31 = vld [vmem:[%s11366_s1 + $0x1264] ss:$16 sps:$4 sm:$0xff]   ;;  %v8397_v32 = vld [vmem:[%s11366_s1 + $0x126c] ss:$16 sps:$4 sm:$0xff]  }
 0x210   :  { %5347 = vmatprep.subr.bf16.mxu0 %v8301_v33  ;;  %5906 = vmatprep.subr.bf16.mxu1 %v8304_v34  ;;  %v8392_v33 = vld [vmem:[%s11366_s1 + $0x1260] ss:$16 sps:$4 sm:$0xff]   ;;  %v8395_v34 = vld [vmem:[%s11366_s1 + $0x1268] ss:$16 sps:$4 sm:$0xff]  }
 0x213   :  { %5348 = vmatpush1.bf16.msra.mxu0 %v8299_v35  ;;  %5907 = vmatpush1.bf16.msra.mxu1 %v8302_v36  ;;  %v8400_v35 = vld [vmem:[%s11366_s1 + $0x1284] ss:$16 sps:$4 sm:$0xff]   ;;  %v8403_v36 = vld [vmem:[%s11366_s1 + $0x128c] ss:$16 sps:$4 sm:$0xff]  }
 0x214   :  { %5349 = vmatprep.subr.bf16.mxu0 %v8307_v37  ;;  %5908 = vmatprep.subr.bf16.mxu1 %v8310_v38  ;;  %v8398_v37 = vld [vmem:[%s11366_s1 + $0x1280] ss:$16 sps:$4 sm:$0xff]   ;;  %v8401_v38 = vld [vmem:[%s11366_s1 + $0x1288] ss:$16 sps:$4 sm:$0xff]  }
 0x217   :  { %5350 = vmatpush1.bf16.msra.mxu0 %v8305_v39  ;;  %5909 = vmatpush1.bf16.msra.mxu1 %v8308_v40  ;;  %v8406_v39 = vld [vmem:[%s11366_s1 + $0x12a4] ss:$16 sps:$4 sm:$0xff]   ;;  %v8409_v40 = vld [vmem:[%s11366_s1 + $0x12ac] ss:$16 sps:$4 sm:$0xff]  }
 0x218   :  { %5351 = vmatprep.subr.bf16.mxu0 %v8313_v41  ;;  %5910 = vmatprep.subr.bf16.mxu1 %v8316_v42  ;;  %v8404_v41 = vld [vmem:[%s11366_s1 + $0x12a0] ss:$16 sps:$4 sm:$0xff]   ;;  %v8407_v42 = vld [vmem:[%s11366_s1 + $0x12a8] ss:$16 sps:$4 sm:$0xff]  }
 0x21b   :  { %5352 = vmatpush1.bf16.msra.mxu0 %v8311_v43  ;;  %5911 = vmatpush1.bf16.msra.mxu1 %v8314_v44  ;;  %v8412_v43 = vld [vmem:[%s11366_s1 + $0x12c4] ss:$16 sps:$4 sm:$0xff]   ;;  %v8415_v44 = vld [vmem:[%s11366_s1 + $0x12cc] ss:$16 sps:$4 sm:$0xff]  }
 0x21c   :  { %5353 = vmatprep.subr.bf16.mxu0 %v8319_v45  ;;  %5912 = vmatprep.subr.bf16.mxu1 %v8322_v46  ;;  %v8410_v45 = vld [vmem:[%s11366_s1 + $0x12c0] ss:$16 sps:$4 sm:$0xff]   ;;  %v8413_v46 = vld [vmem:[%s11366_s1 + $0x12c8] ss:$16 sps:$4 sm:$0xff]  }
 0x21f   :  { %5354 = vmatpush1.bf16.msra.mxu0 %v8317_v47  ;;  %5913 = vmatpush1.bf16.msra.mxu1 %v8320_v48  ;;  %v8418_v47 = vld [vmem:[%s11366_s1 + $0x12e4] ss:$16 sps:$4 sm:$0xff]   ;;  %v8421_v48 = vld [vmem:[%s11366_s1 + $0x12ec] ss:$16 sps:$4 sm:$0xff]  }
 0x220   :  { %5355 = vmatprep.subr.bf16.mxu0 %v8325_v49  ;;  %5914 = vmatprep.subr.bf16.mxu1 %v8328_v50  ;;  %v8416_v49 = vld [vmem:[%s11366_s1 + $0x12e0] ss:$16 sps:$4 sm:$0xff]   ;;  %v8419_v50 = vld [vmem:[%s11366_s1 + $0x12e8] ss:$16 sps:$4 sm:$0xff]  }
 0x223   :  { %5356 = vmatpush1.bf16.msra.mxu0 %v8323_v51  ;;  %5915 = vmatpush1.bf16.msra.mxu1 %v8326_v52  ;;  %v8424_v51 = vld [vmem:[%s11366_s1 + $0x1304] ss:$16 sps:$4 sm:$0xff]   ;;  %v8427_v52 = vld [vmem:[%s11366_s1 + $0x130c] ss:$16 sps:$4 sm:$0xff]  }
 0x224   :  { %5357 = vmatprep.subr.bf16.mxu0 %v8331_v53  ;;  %5916 = vmatprep.subr.bf16.mxu1 %v8334_v54  ;;  %v8422_v53 = vld [vmem:[%s11366_s1 + $0x1300] ss:$16 sps:$4 sm:$0xff]   ;;  %v8425_v54 = vld [vmem:[%s11366_s1 + $0x1308] ss:$16 sps:$4 sm:$0xff]  }
 0x227   :  { %5358 = vmatpush1.bf16.msra.mxu0 %v8329_v55  ;;  %5917 = vmatpush1.bf16.msra.mxu1 %v8332_v56  ;;  %v8430_v55 = vld [vmem:[%s11366_s1 + $0x1324] ss:$16 sps:$4 sm:$0xff]   ;;  %v8433_v56 = vld [vmem:[%s11366_s1 + $0x132c] ss:$16 sps:$4 sm:$0xff]  }
 0x228   :  { %5359 = vmatprep.subr.bf16.mxu0 %v8337_v57  ;;  %5918 = vmatprep.subr.bf16.mxu1 %v8340_v58  ;;  %v8428_v57 = vld [vmem:[%s11366_s1 + $0x1320] ss:$16 sps:$4 sm:$0xff]   ;;  %v8431_v58 = vld [vmem:[%s11366_s1 + $0x1328] ss:$16 sps:$4 sm:$0xff]  }
 0x22b   :  { %5360 = vmatpush1.bf16.msra.mxu0 %v8335_v59  ;;  %5919 = vmatpush1.bf16.msra.mxu1 %v8338_v60  ;;  %v8436_v59 = vld [vmem:[%s11366_s1 + $0x1344] ss:$16 sps:$4 sm:$0xff]   ;;  %v8439_v60 = vld [vmem:[%s11366_s1 + $0x134c] ss:$16 sps:$4 sm:$0xff]  }
 0x22c   :  { %5361 = vmatprep.subr.bf16.mxu0 %v8343_v61  ;;  %5920 = vmatprep.subr.bf16.mxu1 %v8346_v62  ;;  %v8434_v61 = vld [vmem:[%s11366_s1 + $0x1340] ss:$16 sps:$4 sm:$0xff]   ;;  %v8437_v62 = vld [vmem:[%s11366_s1 + $0x1348] ss:$16 sps:$4 sm:$0xff]  }
 0x22f   :  { %5362 = vmatpush1.bf16.msra.mxu0 %v8341_v63  ;;  %5921 = vmatpush1.bf16.msra.mxu1 %v8344_v0  ;;  %v8442_v63 = vld [vmem:[%s11366_s1 + $0x1364] ss:$16 sps:$4 sm:$0xff]   ;;  %v8445_v0 = vld [vmem:[%s11366_s1 + $0x136c] ss:$16 sps:$4 sm:$0xff]  }
 0x230   :  { %5363 = vmatprep.subr.bf16.mxu0 %v8349_v1  ;;  %5922 = vmatprep.subr.bf16.mxu1 %v8352_v2  ;;  %v8440_v1 = vld [vmem:[%s11366_s1 + $0x1360] ss:$16 sps:$4 sm:$0xff]   ;;  %v8443_v2 = vld [vmem:[%s11366_s1 + $0x1368] ss:$16 sps:$4 sm:$0xff]  }
 0x233   :  { %5364 = vmatpush1.bf16.msra.mxu0 %v8347_v3  ;;  %5923 = vmatpush1.bf16.msra.mxu1 %v8350_v4  ;;  %v8448_v3 = vld [vmem:[%s11366_s1 + $0x1384] ss:$16 sps:$4 sm:$0xff]   ;;  %v8451_v4 = vld [vmem:[%s11366_s1 + $0x138c] ss:$16 sps:$4 sm:$0xff]  }
 0x234   :  { %5365 = vmatprep.subr.bf16.mxu0 %v8355_v5  ;;  %5924 = vmatprep.subr.bf16.mxu1 %v8358_v6  ;;  %v8446_v5 = vld [vmem:[%s11366_s1 + $0x1380] ss:$16 sps:$4 sm:$0xff]   ;;  %v8449_v6 = vld [vmem:[%s11366_s1 + $0x1388] ss:$16 sps:$4 sm:$0xff]  }
 0x237   :  { %5366 = vmatpush1.bf16.msra.mxu0 %v8353_v7  ;;  %5925 = vmatpush1.bf16.msra.mxu1 %v8356_v8  ;;  %v8454_v7 = vld [vmem:[%s11366_s1 + $0x13a4] ss:$16 sps:$4 sm:$0xff]   ;;  %v8457_v8 = vld [vmem:[%s11366_s1 + $0x13ac] ss:$16 sps:$4 sm:$0xff]  }
 0x238   :  { %5367 = vmatprep.subr.bf16.mxu0 %v8361_v9  ;;  %5926 = vmatprep.subr.bf16.mxu1 %v8364_v10  ;;  %v8452_v9 = vld [vmem:[%s11366_s1 + $0x13a0] ss:$16 sps:$4 sm:$0xff]   ;;  %v8455_v10 = vld [vmem:[%s11366_s1 + $0x13a8] ss:$16 sps:$4 sm:$0xff]  }
 0x23b   :  { %5368 = vmatpush1.bf16.msra.mxu0 %v8359_v11  ;;  %5927 = vmatpush1.bf16.msra.mxu1 %v8362_v12  ;;  %v8460_v11 = vld [vmem:[%s11366_s1 + $0x13c4] ss:$16 sps:$4 sm:$0xff]   ;;  %v8463_v12 = vld [vmem:[%s11366_s1 + $0x13cc] ss:$16 sps:$4 sm:$0xff]  }
 0x23c   :  { %5369 = vmatprep.subr.bf16.mxu0 %v8367_v13  ;;  %5928 = vmatprep.subr.bf16.mxu1 %v8370_v14  ;;  %v8458_v13 = vld [vmem:[%s11366_s1 + $0x13c0] ss:$16 sps:$4 sm:$0xff]   ;;  %v8461_v14 = vld [vmem:[%s11366_s1 + $0x13c8] ss:$16 sps:$4 sm:$0xff]  }
 0x23f   :  { %5370 = vmatpush1.bf16.msra.mxu0 %v8365_v15  ;;  %5929 = vmatpush1.bf16.msra.mxu1 %v8368_v16  ;;  %v8466_v15 = vld [vmem:[%s11366_s1 + $0x13e4] ss:$16 sps:$4 sm:$0xff]   ;;  %v8469_v16 = vld [vmem:[%s11366_s1 + $0x13ec] ss:$16 sps:$4 sm:$0xff]  }
 0x240   :  { %5382 = vmatprep.subr.bf16.mxu0 %v8376_v17  ;;  %5941 = vmatprep.subr.bf16.mxu1 %v8379_v18  ;;  %v8464_v17 = vld [vmem:[%s11366_s1 + $0x13e0] ss:$16 sps:$4 sm:$0xff]   ;;  %v8467_v18 = vld [vmem:[%s11366_s1 + $0x13e8] ss:$16 sps:$4 sm:$0xff]  }
 0x242   :  { %5372 = vmatmul.mubr.bf16.vlgmr.msra.gmra.mrb[0].mxu0 %v8371_v19  ;;  %5931 = vmatmul.mubr.bf16.vlgmr.msra.gmra.mrb[0].mxu1 %v8371_v19  ;;  %v8475_v19 = vld [vmem:[%s11366_s1 + $0x1404] ss:$16 sps:$4 sm:$0xff]  }
 0x243   :  { %5383 = vmatpush1.bf16.msra.mxu0 %v8374_v20  ;;  %5942 = vmatpush1.bf16.msra.mxu1 %v8377_v21  ;;  %v8478_v20 = vld [vmem:[%s11366_s1 + $0x140c] ss:$16 sps:$4 sm:$0xff]  }
 0x244   :  { %5384 = vmatprep.subr.bf16.mxu0 %v8382_v22  ;;  %5943 = vmatprep.subr.bf16.mxu1 %v8385_v23  ;;  %v8470_v21 = vld [vmem:[%s11367_s0 + $0x48] ss:$100 sps:$4 sm:$0xff]   ;;  %v8473_v22 = vld [vmem:[%s11366_s1 + $0x1400] ss:$16 sps:$4 sm:$0xff]  }
 0x245   :  { %5414 = vmatprep.mubr.bf16.mxu0 %v8472_v24  ;;  %5973 = vmatprep.mubr.bf16.mxu1 %v8472_v24  ;;  %v8476_v23 = vld [vmem:[%s11366_s1 + $0x1408] ss:$16 sps:$4 sm:$0xff]   ;;  %v8481_v24 = vld [vmem:[%s11366_s1 + $0x1424] ss:$16 sps:$4 sm:$0xff]  }
 0x247   :  { %5385 = vmatpush1.bf16.msra.mxu0 %v8380_v25  ;;  %5944 = vmatpush1.bf16.msra.mxu1 %v8383_v26  ;;  %v8484_v25 = vld [vmem:[%s11366_s1 + $0x142c] ss:$16 sps:$4 sm:$0xff]   ;;  %v8571_v26 = vld [vmem:[%s11367_s0 + $0x54] ss:$100 sps:$4 sm:$0xff]  }
 0x248   :  { %5386 = vmatprep.subr.bf16.mxu0 %v8388_v27  ;;  %5945 = vmatprep.subr.bf16.mxu1 %v8391_v28  ;;  %v8479_v27 = vld [vmem:[%s11366_s1 + $0x1420] ss:$16 sps:$4 sm:$0xff]   ;;  %v8482_v28 = vld [vmem:[%s11366_s1 + $0x1428] ss:$16 sps:$4 sm:$0xff]  }
 0x24b   :  { %5387 = vmatpush1.bf16.msra.mxu0 %v8386_v29  ;;  %5946 = vmatpush1.bf16.msra.mxu1 %v8389_v30  ;;  %v8487_v29 = vld [vmem:[%s11366_s1 + $0x1444] ss:$16 sps:$4 sm:$0xff]   ;;  %v8490_v30 = vld [vmem:[%s11366_s1 + $0x144c] ss:$16 sps:$4 sm:$0xff]  }
 0x24c   :  { %5388 = vmatprep.subr.bf16.mxu0 %v8394_v31  ;;  %5947 = vmatprep.subr.bf16.mxu1 %v8397_v32  ;;  %v8485_v31 = vld [vmem:[%s11366_s1 + $0x1440] ss:$16 sps:$4 sm:$0xff]   ;;  %v8488_v32 = vld [vmem:[%s11366_s1 + $0x1448] ss:$16 sps:$4 sm:$0xff]  }
 0x24f   :  { %5389 = vmatpush1.bf16.msra.mxu0 %v8392_v33  ;;  %5948 = vmatpush1.bf16.msra.mxu1 %v8395_v34  ;;  %v8493_v33 = vld [vmem:[%s11366_s1 + $0x1464] ss:$16 sps:$4 sm:$0xff]   ;;  %v8496_v34 = vld [vmem:[%s11366_s1 + $0x146c] ss:$16 sps:$4 sm:$0xff]  }
 0x250   :  { %5390 = vmatprep.subr.bf16.mxu0 %v8400_v35  ;;  %5949 = vmatprep.subr.bf16.mxu1 %v8403_v36  ;;  %v8491_v35 = vld [vmem:[%s11366_s1 + $0x1460] ss:$16 sps:$4 sm:$0xff]   ;;  %v8494_v36 = vld [vmem:[%s11366_s1 + $0x1468] ss:$16 sps:$4 sm:$0xff]  }
 0x253   :  { %5391 = vmatpush1.bf16.msra.mxu0 %v8398_v37  ;;  %5950 = vmatpush1.bf16.msra.mxu1 %v8401_v38  ;;  %v8499_v37 = vld [vmem:[%s11366_s1 + $0x1484] ss:$16 sps:$4 sm:$0xff]   ;;  %v8502_v38 = vld [vmem:[%s11366_s1 + $0x148c] ss:$16 sps:$4 sm:$0xff]  }
 0x254   :  { %5392 = vmatprep.subr.bf16.mxu0 %v8406_v39  ;;  %5951 = vmatprep.subr.bf16.mxu1 %v8409_v40  ;;  %v8497_v39 = vld [vmem:[%s11366_s1 + $0x1480] ss:$16 sps:$4 sm:$0xff]   ;;  %v8500_v40 = vld [vmem:[%s11366_s1 + $0x1488] ss:$16 sps:$4 sm:$0xff]  }
 0x257   :  { %5393 = vmatpush1.bf16.msra.mxu0 %v8404_v41  ;;  %5952 = vmatpush1.bf16.msra.mxu1 %v8407_v42  ;;  %v8505_v41 = vld [vmem:[%s11366_s1 + $0x14a4] ss:$16 sps:$4 sm:$0xff]   ;;  %v8508_v42 = vld [vmem:[%s11366_s1 + $0x14ac] ss:$16 sps:$4 sm:$0xff]  }
 0x258   :  { %5394 = vmatprep.subr.bf16.mxu0 %v8412_v43  ;;  %5953 = vmatprep.subr.bf16.mxu1 %v8415_v44  ;;  %v8503_v43 = vld [vmem:[%s11366_s1 + $0x14a0] ss:$16 sps:$4 sm:$0xff]   ;;  %v8506_v44 = vld [vmem:[%s11366_s1 + $0x14a8] ss:$16 sps:$4 sm:$0xff]  }
 0x25b   :  { %5395 = vmatpush1.bf16.msra.mxu0 %v8410_v45  ;;  %5954 = vmatpush1.bf16.msra.mxu1 %v8413_v46  ;;  %v8511_v45 = vld [vmem:[%s11366_s1 + $0x14c4] ss:$16 sps:$4 sm:$0xff]   ;;  %v8514_v46 = vld [vmem:[%s11366_s1 + $0x14cc] ss:$16 sps:$4 sm:$0xff]  }
 0x25c   :  { %5396 = vmatprep.subr.bf16.mxu0 %v8418_v47  ;;  %5955 = vmatprep.subr.bf16.mxu1 %v8421_v48  ;;  %v8509_v47 = vld [vmem:[%s11366_s1 + $0x14c0] ss:$16 sps:$4 sm:$0xff]   ;;  %v8512_v48 = vld [vmem:[%s11366_s1 + $0x14c8] ss:$16 sps:$4 sm:$0xff]  }
 0x25f   :  { %5397 = vmatpush1.bf16.msra.mxu0 %v8416_v49  ;;  %5956 = vmatpush1.bf16.msra.mxu1 %v8419_v50  ;;  %v8517_v49 = vld [vmem:[%s11366_s1 + $0x14e4] ss:$16 sps:$4 sm:$0xff]   ;;  %v8520_v50 = vld [vmem:[%s11366_s1 + $0x14ec] ss:$16 sps:$4 sm:$0xff]  }
 0x260   :  { %5398 = vmatprep.subr.bf16.mxu0 %v8424_v51  ;;  %5957 = vmatprep.subr.bf16.mxu1 %v8427_v52  ;;  %v8515_v51 = vld [vmem:[%s11366_s1 + $0x14e0] ss:$16 sps:$4 sm:$0xff]   ;;  %v8518_v52 = vld [vmem:[%s11366_s1 + $0x14e8] ss:$16 sps:$4 sm:$0xff]  }
 0x263   :  { %5399 = vmatpush1.bf16.msra.mxu0 %v8422_v53  ;;  %5958 = vmatpush1.bf16.msra.mxu1 %v8425_v54  ;;  %v8523_v53 = vld [vmem:[%s11366_s1 + $0x1504] ss:$16 sps:$4 sm:$0xff]   ;;  %v8526_v54 = vld [vmem:[%s11366_s1 + $0x150c] ss:$16 sps:$4 sm:$0xff]  }
 0x264   :  { %5400 = vmatprep.subr.bf16.mxu0 %v8430_v55  ;;  %5959 = vmatprep.subr.bf16.mxu1 %v8433_v56  ;;  %v8521_v55 = vld [vmem:[%s11366_s1 + $0x1500] ss:$16 sps:$4 sm:$0xff]   ;;  %v8524_v56 = vld [vmem:[%s11366_s1 + $0x1508] ss:$16 sps:$4 sm:$0xff]  }
 0x267   :  { %5401 = vmatpush1.bf16.msra.mxu0 %v8428_v57  ;;  %5960 = vmatpush1.bf16.msra.mxu1 %v8431_v58  ;;  %v8529_v57 = vld [vmem:[%s11366_s1 + $0x1524] ss:$16 sps:$4 sm:$0xff]   ;;  %v8532_v58 = vld [vmem:[%s11366_s1 + $0x152c] ss:$16 sps:$4 sm:$0xff]  }
 0x268   :  { %5402 = vmatprep.subr.bf16.mxu0 %v8436_v59  ;;  %5961 = vmatprep.subr.bf16.mxu1 %v8439_v60  ;;  %v8527_v59 = vld [vmem:[%s11366_s1 + $0x1520] ss:$16 sps:$4 sm:$0xff]   ;;  %v8530_v60 = vld [vmem:[%s11366_s1 + $0x1528] ss:$16 sps:$4 sm:$0xff]  }
 0x26b   :  { %5403 = vmatpush1.bf16.msra.mxu0 %v8434_v61  ;;  %5962 = vmatpush1.bf16.msra.mxu1 %v8437_v62  ;;  %v8535_v61 = vld [vmem:[%s11366_s1 + $0x1544] ss:$16 sps:$4 sm:$0xff]   ;;  %v8538_v62 = vld [vmem:[%s11366_s1 + $0x154c] ss:$16 sps:$4 sm:$0xff]  }
 0x26c   :  { %5404 = vmatprep.subr.bf16.mxu0 %v8442_v63  ;;  %5963 = vmatprep.subr.bf16.mxu1 %v8445_v0  ;;  %v8533_v63 = vld [vmem:[%s11366_s1 + $0x1540] ss:$16 sps:$4 sm:$0xff]   ;;  %v8536_v0 = vld [vmem:[%s11366_s1 + $0x1548] ss:$16 sps:$4 sm:$0xff]  }
 0x26f   :  { %5405 = vmatpush1.bf16.msra.mxu0 %v8440_v1  ;;  %5964 = vmatpush1.bf16.msra.mxu1 %v8443_v2  ;;  %v8541_v1 = vld [vmem:[%s11366_s1 + $0x1564] ss:$16 sps:$4 sm:$0xff]   ;;  %v8544_v2 = vld [vmem:[%s11366_s1 + $0x156c] ss:$16 sps:$4 sm:$0xff]  }
 0x270   :  { %5406 = vmatprep.subr.bf16.mxu0 %v8448_v3  ;;  %5965 = vmatprep.subr.bf16.mxu1 %v8451_v4  ;;  %v8539_v3 = vld [vmem:[%s11366_s1 + $0x1560] ss:$16 sps:$4 sm:$0xff]   ;;  %v8542_v4 = vld [vmem:[%s11366_s1 + $0x1568] ss:$16 sps:$4 sm:$0xff]  }
 0x273   :  { %5407 = vmatpush1.bf16.msra.mxu0 %v8446_v5  ;;  %5966 = vmatpush1.bf16.msra.mxu1 %v8449_v6  ;;  %v8547_v5 = vld [vmem:[%s11366_s1 + $0x1584] ss:$16 sps:$4 sm:$0xff]   ;;  %v8550_v6 = vld [vmem:[%s11366_s1 + $0x158c] ss:$16 sps:$4 sm:$0xff]  }
 0x274   :  { %5408 = vmatprep.subr.bf16.mxu0 %v8454_v7  ;;  %5967 = vmatprep.subr.bf16.mxu1 %v8457_v8  ;;  %v8545_v7 = vld [vmem:[%s11366_s1 + $0x1580] ss:$16 sps:$4 sm:$0xff]   ;;  %v8548_v8 = vld [vmem:[%s11366_s1 + $0x1588] ss:$16 sps:$4 sm:$0xff]  }
 0x277   :  { %5409 = vmatpush1.bf16.msra.mxu0 %v8452_v9  ;;  %5968 = vmatpush1.bf16.msra.mxu1 %v8455_v10  ;;  %v8553_v9 = vld [vmem:[%s11366_s1 + $0x15a4] ss:$16 sps:$4 sm:$0xff]   ;;  %v8556_v10 = vld [vmem:[%s11366_s1 + $0x15ac] ss:$16 sps:$4 sm:$0xff]  }
 0x278   :  { %5410 = vmatprep.subr.bf16.mxu0 %v8460_v11  ;;  %5969 = vmatprep.subr.bf16.mxu1 %v8463_v12  ;;  %v8551_v11 = vld [vmem:[%s11366_s1 + $0x15a0] ss:$16 sps:$4 sm:$0xff]   ;;  %v8554_v12 = vld [vmem:[%s11366_s1 + $0x15a8] ss:$16 sps:$4 sm:$0xff]  }
 0x27b   :  { %5411 = vmatpush1.bf16.msra.mxu0 %v8458_v13  ;;  %5970 = vmatpush1.bf16.msra.mxu1 %v8461_v14  ;;  %v8559_v13 = vld [vmem:[%s11366_s1 + $0x15c4] ss:$16 sps:$4 sm:$0xff]   ;;  %v8562_v14 = vld [vmem:[%s11366_s1 + $0x15cc] ss:$16 sps:$4 sm:$0xff]  }
 0x27c   :  { %5412 = vmatprep.subr.bf16.mxu0 %v8466_v15  ;;  %5971 = vmatprep.subr.bf16.mxu1 %v8469_v16  ;;  %v8557_v15 = vld [vmem:[%s11366_s1 + $0x15c0] ss:$16 sps:$4 sm:$0xff]   ;;  %v8560_v16 = vld [vmem:[%s11366_s1 + $0x15c8] ss:$16 sps:$4 sm:$0xff]  }
 0x27f   :  { %5413 = vmatpush1.bf16.msra.mxu0 %v8464_v17  ;;  %5972 = vmatpush1.bf16.msra.mxu1 %v8467_v18  ;;  %v8565_v17 = vld [vmem:[%s11366_s1 + $0x15e4] ss:$16 sps:$4 sm:$0xff]   ;;  %v8568_v18 = vld [vmem:[%s11366_s1 + $0x15ec] ss:$16 sps:$4 sm:$0xff]  }
 0x280   :  { %5425 = vmatprep.subr.bf16.mxu0 %v8475_v19  ;;  %5984 = vmatprep.subr.bf16.mxu1 %v8478_v20  ;;  %v8563_v19 = vld [vmem:[%s11366_s1 + $0x15e0] ss:$16 sps:$4 sm:$0xff]   ;;  %v8566_v20 = vld [vmem:[%s11366_s1 + $0x15e8] ss:$16 sps:$4 sm:$0xff]  }
 0x282   :  { %5415 = vmatmul.mubr.bf16.vlgmr.msra.gmra.mrb[0].mxu0 %v8470_v21  ;;  %5974 = vmatmul.mubr.bf16.vlgmr.msra.gmra.mrb[0].mxu1 %v8470_v21  ;;  %v8574_v21 = vld [vmem:[%s11366_s1 + $0x1604] ss:$16 sps:$4 sm:$0xff]  }
 0x283   :  { %5426 = vmatpush1.bf16.msra.mxu0 %v8473_v22  ;;  %5985 = vmatpush1.bf16.msra.mxu1 %v8476_v23  ;;  %v8577_v22 = vld [vmem:[%s11366_s1 + $0x160c] ss:$16 sps:$4 sm:$0xff]   ;;  %v8569_v23 = vld [vmem:[%s11367_s0 + $0x50] ss:$100 sps:$4 sm:$0xff]  }
 0x284   :  { %5427 = vmatprep.subr.bf16.mxu0 %v8481_v24  ;;  %5986 = vmatprep.subr.bf16.mxu1 %v8484_v25  ;;  %v8572_v24 = vld [vmem:[%s11366_s1 + $0x1600] ss:$16 sps:$4 sm:$0xff]   ;;  %v8575_v25 = vld [vmem:[%s11366_s1 + $0x1608] ss:$16 sps:$4 sm:$0xff]  }
 0x285   :  { %5457 = vmatprep.mubr.bf16.mxu0 %v8571_v26  ;;  %6016 = vmatprep.mubr.bf16.mxu1 %v8571_v26  ;;  %v8580_v26 = vld [vmem:[%s11366_s1 + $0x1624] ss:$16 sps:$4 sm:$0xff]  }
 0x287   :  { %5428 = vmatpush1.bf16.msra.mxu0 %v8479_v27  ;;  %5987 = vmatpush1.bf16.msra.mxu1 %v8482_v28  ;;  %v8583_v27 = vld [vmem:[%s11366_s1 + $0x162c] ss:$16 sps:$4 sm:$0xff]  }
 0x288   :  { %5429 = vmatprep.subr.bf16.mxu0 %v8487_v29  ;;  %5988 = vmatprep.subr.bf16.mxu1 %v8490_v30  ;;  %v8670_v28 = vld [vmem:[%s11367_s0 + $0x5c] ss:$100 sps:$4 sm:$0xff]   ;;  %v8581_v30 = vld [vmem:[%s11366_s1 + $0x1628] ss:$16 sps:$4 sm:$0xff]  }
 0x289   :  { %v8578_v29 = vld [vmem:[%s11366_s1 + $0x1620] ss:$16 sps:$4 sm:$0xff]  }
 0x28b   :  { %5430 = vmatpush1.bf16.msra.mxu0 %v8485_v31  ;;  %5989 = vmatpush1.bf16.msra.mxu1 %v8488_v32  ;;  %v8586_v31 = vld [vmem:[%s11366_s1 + $0x1644] ss:$16 sps:$4 sm:$0xff]   ;;  %v8589_v32 = vld [vmem:[%s11366_s1 + $0x164c] ss:$16 sps:$4 sm:$0xff]  }
 0x28c   :  { %5431 = vmatprep.subr.bf16.mxu0 %v8493_v33  ;;  %5990 = vmatprep.subr.bf16.mxu1 %v8496_v34  ;;  %v8584_v33 = vld [vmem:[%s11366_s1 + $0x1640] ss:$16 sps:$4 sm:$0xff]   ;;  %v8587_v34 = vld [vmem:[%s11366_s1 + $0x1648] ss:$16 sps:$4 sm:$0xff]  }
 0x28f   :  { %5432 = vmatpush1.bf16.msra.mxu0 %v8491_v35  ;;  %5991 = vmatpush1.bf16.msra.mxu1 %v8494_v36  ;;  %v8592_v35 = vld [vmem:[%s11366_s1 + $0x1664] ss:$16 sps:$4 sm:$0xff]   ;;  %v8595_v36 = vld [vmem:[%s11366_s1 + $0x166c] ss:$16 sps:$4 sm:$0xff]  }
 0x290   :  { %5433 = vmatprep.subr.bf16.mxu0 %v8499_v37  ;;  %5992 = vmatprep.subr.bf16.mxu1 %v8502_v38  ;;  %v8590_v37 = vld [vmem:[%s11366_s1 + $0x1660] ss:$16 sps:$4 sm:$0xff]   ;;  %v8593_v38 = vld [vmem:[%s11366_s1 + $0x1668] ss:$16 sps:$4 sm:$0xff]  }
 0x293   :  { %5434 = vmatpush1.bf16.msra.mxu0 %v8497_v39  ;;  %5993 = vmatpush1.bf16.msra.mxu1 %v8500_v40  ;;  %v8598_v39 = vld [vmem:[%s11366_s1 + $0x1684] ss:$16 sps:$4 sm:$0xff]   ;;  %v8601_v40 = vld [vmem:[%s11366_s1 + $0x168c] ss:$16 sps:$4 sm:$0xff]  }
 0x294   :  { %5435 = vmatprep.subr.bf16.mxu0 %v8505_v41  ;;  %5994 = vmatprep.subr.bf16.mxu1 %v8508_v42  ;;  %v8596_v41 = vld [vmem:[%s11366_s1 + $0x1680] ss:$16 sps:$4 sm:$0xff]   ;;  %v8599_v42 = vld [vmem:[%s11366_s1 + $0x1688] ss:$16 sps:$4 sm:$0xff]  }
 0x297   :  { %5436 = vmatpush1.bf16.msra.mxu0 %v8503_v43  ;;  %5995 = vmatpush1.bf16.msra.mxu1 %v8506_v44  ;;  %v8604_v43 = vld [vmem:[%s11366_s1 + $0x16a4] ss:$16 sps:$4 sm:$0xff]   ;;  %v8607_v44 = vld [vmem:[%s11366_s1 + $0x16ac] ss:$16 sps:$4 sm:$0xff]  }
 0x298   :  { %5437 = vmatprep.subr.bf16.mxu0 %v8511_v45  ;;  %5996 = vmatprep.subr.bf16.mxu1 %v8514_v46  ;;  %v8602_v45 = vld [vmem:[%s11366_s1 + $0x16a0] ss:$16 sps:$4 sm:$0xff]   ;;  %v8605_v46 = vld [vmem:[%s11366_s1 + $0x16a8] ss:$16 sps:$4 sm:$0xff]  }
 0x29b   :  { %5438 = vmatpush1.bf16.msra.mxu0 %v8509_v47  ;;  %5997 = vmatpush1.bf16.msra.mxu1 %v8512_v48  ;;  %v8610_v47 = vld [vmem:[%s11366_s1 + $0x16c4] ss:$16 sps:$4 sm:$0xff]   ;;  %v8613_v48 = vld [vmem:[%s11366_s1 + $0x16cc] ss:$16 sps:$4 sm:$0xff]  }
 0x29c   :  { %5439 = vmatprep.subr.bf16.mxu0 %v8517_v49  ;;  %5998 = vmatprep.subr.bf16.mxu1 %v8520_v50  ;;  %v8608_v49 = vld [vmem:[%s11366_s1 + $0x16c0] ss:$16 sps:$4 sm:$0xff]   ;;  %v8611_v50 = vld [vmem:[%s11366_s1 + $0x16c8] ss:$16 sps:$4 sm:$0xff]  }
 0x29f   :  { %5440 = vmatpush1.bf16.msra.mxu0 %v8515_v51  ;;  %5999 = vmatpush1.bf16.msra.mxu1 %v8518_v52  ;;  %v8616_v51 = vld [vmem:[%s11366_s1 + $0x16e4] ss:$16 sps:$4 sm:$0xff]   ;;  %v8619_v52 = vld [vmem:[%s11366_s1 + $0x16ec] ss:$16 sps:$4 sm:$0xff]  }
 0x2a0   :  { %5441 = vmatprep.subr.bf16.mxu0 %v8523_v53  ;;  %6000 = vmatprep.subr.bf16.mxu1 %v8526_v54  ;;  %v8614_v53 = vld [vmem:[%s11366_s1 + $0x16e0] ss:$16 sps:$4 sm:$0xff]   ;;  %v8617_v54 = vld [vmem:[%s11366_s1 + $0x16e8] ss:$16 sps:$4 sm:$0xff]  }
 0x2a3   :  { %5442 = vmatpush1.bf16.msra.mxu0 %v8521_v55  ;;  %6001 = vmatpush1.bf16.msra.mxu1 %v8524_v56  ;;  %v8622_v55 = vld [vmem:[%s11366_s1 + $0x1704] ss:$16 sps:$4 sm:$0xff]   ;;  %v8625_v56 = vld [vmem:[%s11366_s1 + $0x170c] ss:$16 sps:$4 sm:$0xff]  }
 0x2a4   :  { %5443 = vmatprep.subr.bf16.mxu0 %v8529_v57  ;;  %6002 = vmatprep.subr.bf16.mxu1 %v8532_v58  ;;  %v8620_v57 = vld [vmem:[%s11366_s1 + $0x1700] ss:$16 sps:$4 sm:$0xff]   ;;  %v8623_v58 = vld [vmem:[%s11366_s1 + $0x1708] ss:$16 sps:$4 sm:$0xff]  }
 0x2a7   :  { %5444 = vmatpush1.bf16.msra.mxu0 %v8527_v59  ;;  %6003 = vmatpush1.bf16.msra.mxu1 %v8530_v60  ;;  %v8628_v59 = vld [vmem:[%s11366_s1 + $0x1724] ss:$16 sps:$4 sm:$0xff]   ;;  %v8631_v60 = vld [vmem:[%s11366_s1 + $0x172c] ss:$16 sps:$4 sm:$0xff]  }
 0x2a8   :  { %5445 = vmatprep.subr.bf16.mxu0 %v8535_v61  ;;  %6004 = vmatprep.subr.bf16.mxu1 %v8538_v62  ;;  %v8626_v61 = vld [vmem:[%s11366_s1 + $0x1720] ss:$16 sps:$4 sm:$0xff]   ;;  %v8629_v62 = vld [vmem:[%s11366_s1 + $0x1728] ss:$16 sps:$4 sm:$0xff]  }
 0x2ab   :  { %5446 = vmatpush1.bf16.msra.mxu0 %v8533_v63  ;;  %6005 = vmatpush1.bf16.msra.mxu1 %v8536_v0  ;;  %v8634_v63 = vld [vmem:[%s11366_s1 + $0x1744] ss:$16 sps:$4 sm:$0xff]   ;;  %v8637_v0 = vld [vmem:[%s11366_s1 + $0x174c] ss:$16 sps:$4 sm:$0xff]  }
 0x2ac   :  { %5447 = vmatprep.subr.bf16.mxu0 %v8541_v1  ;;  %6006 = vmatprep.subr.bf16.mxu1 %v8544_v2  ;;  %v8632_v1 = vld [vmem:[%s11366_s1 + $0x1740] ss:$16 sps:$4 sm:$0xff]   ;;  %v8635_v2 = vld [vmem:[%s11366_s1 + $0x1748] ss:$16 sps:$4 sm:$0xff]  }
 0x2af   :  { %5448 = vmatpush1.bf16.msra.mxu0 %v8539_v3  ;;  %6007 = vmatpush1.bf16.msra.mxu1 %v8542_v4  ;;  %v8640_v3 = vld [vmem:[%s11366_s1 + $0x1764] ss:$16 sps:$4 sm:$0xff]   ;;  %v8643_v4 = vld [vmem:[%s11366_s1 + $0x176c] ss:$16 sps:$4 sm:$0xff]  }
 0x2b0   :  { %5449 = vmatprep.subr.bf16.mxu0 %v8547_v5  ;;  %6008 = vmatprep.subr.bf16.mxu1 %v8550_v6  ;;  %v8638_v5 = vld [vmem:[%s11366_s1 + $0x1760] ss:$16 sps:$4 sm:$0xff]   ;;  %v8641_v6 = vld [vmem:[%s11366_s1 + $0x1768] ss:$16 sps:$4 sm:$0xff]  }
 0x2b3   :  { %5450 = vmatpush1.bf16.msra.mxu0 %v8545_v7  ;;  %6009 = vmatpush1.bf16.msra.mxu1 %v8548_v8  ;;  %v8646_v7 = vld [vmem:[%s11366_s1 + $0x1784] ss:$16 sps:$4 sm:$0xff]   ;;  %v8649_v8 = vld [vmem:[%s11366_s1 + $0x178c] ss:$16 sps:$4 sm:$0xff]  }
 0x2b4   :  { %5451 = vmatprep.subr.bf16.mxu0 %v8553_v9  ;;  %6010 = vmatprep.subr.bf16.mxu1 %v8556_v10  ;;  %v8644_v9 = vld [vmem:[%s11366_s1 + $0x1780] ss:$16 sps:$4 sm:$0xff]   ;;  %v8647_v10 = vld [vmem:[%s11366_s1 + $0x1788] ss:$16 sps:$4 sm:$0xff]  }
 0x2b7   :  { %5452 = vmatpush1.bf16.msra.mxu0 %v8551_v11  ;;  %6011 = vmatpush1.bf16.msra.mxu1 %v8554_v12  ;;  %v8652_v11 = vld [vmem:[%s11366_s1 + $0x17a4] ss:$16 sps:$4 sm:$0xff]   ;;  %v8655_v12 = vld [vmem:[%s11366_s1 + $0x17ac] ss:$16 sps:$4 sm:$0xff]  }
 0x2b8   :  { %5453 = vmatprep.subr.bf16.mxu0 %v8559_v13  ;;  %6012 = vmatprep.subr.bf16.mxu1 %v8562_v14  ;;  %v8650_v13 = vld [vmem:[%s11366_s1 + $0x17a0] ss:$16 sps:$4 sm:$0xff]   ;;  %v8653_v14 = vld [vmem:[%s11366_s1 + $0x17a8] ss:$16 sps:$4 sm:$0xff]  }
 0x2bb   :  { %5454 = vmatpush1.bf16.msra.mxu0 %v8557_v15  ;;  %6013 = vmatpush1.bf16.msra.mxu1 %v8560_v16  ;;  %v8658_v15 = vld [vmem:[%s11366_s1 + $0x17c4] ss:$16 sps:$4 sm:$0xff]   ;;  %v8661_v16 = vld [vmem:[%s11366_s1 + $0x17cc] ss:$16 sps:$4 sm:$0xff]  }
 0x2bc   :  { %5455 = vmatprep.subr.bf16.mxu0 %v8565_v17  ;;  %6014 = vmatprep.subr.bf16.mxu1 %v8568_v18  ;;  %v8656_v17 = vld [vmem:[%s11366_s1 + $0x17c0] ss:$16 sps:$4 sm:$0xff]   ;;  %v8659_v18 = vld [vmem:[%s11366_s1 + $0x17c8] ss:$16 sps:$4 sm:$0xff]  }
 0x2bf   :  { %5456 = vmatpush1.bf16.msra.mxu0 %v8563_v19  ;;  %6015 = vmatpush1.bf16.msra.mxu1 %v8566_v20  ;;  %v8664_v19 = vld [vmem:[%s11366_s1 + $0x17e4] ss:$16 sps:$4 sm:$0xff]   ;;  %v8667_v20 = vld [vmem:[%s11366_s1 + $0x17ec] ss:$16 sps:$4 sm:$0xff]  }
 0x2c0   :  { %5468 = vmatprep.subr.bf16.mxu0 %v8574_v21  ;;  %6027 = vmatprep.subr.bf16.mxu1 %v8577_v22  ;;  %v8662_v21 = vld [vmem:[%s11366_s1 + $0x17e0] ss:$16 sps:$4 sm:$0xff]   ;;  %v8665_v22 = vld [vmem:[%s11366_s1 + $0x17e8] ss:$16 sps:$4 sm:$0xff]  }
 0x2c2   :  { %5458 = vmatmul.mubr.bf16.vlgmr.msra.gmra.mrb[0].mxu0 %v8569_v23  ;;  %6017 = vmatmul.mubr.bf16.vlgmr.msra.gmra.mrb[0].mxu1 %v8569_v23  ;;  %v8673_v23 = vld [vmem:[%s11366_s1 + $0x1804] ss:$16 sps:$4 sm:$0xff]  }
 0x2c3   :  { %5469 = vmatpush1.bf16.msra.mxu0 %v8572_v24  ;;  %6028 = vmatpush1.bf16.msra.mxu1 %v8575_v25  ;;  %v8676_v24 = vld [vmem:[%s11366_s1 + $0x180c] ss:$16 sps:$4 sm:$0xff]  }
 0x2c4   :  { %5470 = vmatprep.subr.bf16.mxu0 %v8580_v26  ;;  %6029 = vmatprep.subr.bf16.mxu1 %v8583_v27  ;;  %v8668_v25 = vld [vmem:[%s11367_s0 + $0x58] ss:$100 sps:$4 sm:$0xff]   ;;  %v8671_v26 = vld [vmem:[%s11366_s1 + $0x1800] ss:$16 sps:$4 sm:$0xff]  }
 0x2c5   :  { %5500 = vmatprep.mubr.bf16.mxu0 %v8670_v28  ;;  %6059 = vmatprep.mubr.bf16.mxu1 %v8670_v28  ;;  %v8674_v27 = vld [vmem:[%s11366_s1 + $0x1808] ss:$16 sps:$4 sm:$0xff]   ;;  %v8679_v28 = vld [vmem:[%s11366_s1 + $0x1824] ss:$16 sps:$4 sm:$0xff]  }
 0x2c7   :  { %5471 = vmatpush1.bf16.msra.mxu0 %v8578_v29  ;;  %6030 = vmatpush1.bf16.msra.mxu1 %v8581_v30  ;;  %v8682_v29 = vld [vmem:[%s11366_s1 + $0x182c] ss:$16 sps:$4 sm:$0xff]   ;;  %v8677_v30 = vld [vmem:[%s11366_s1 + $0x1820] ss:$16 sps:$4 sm:$0xff]  }
 0x2c8   :  { %5472 = vmatprep.subr.bf16.mxu0 %v8586_v31  ;;  %6031 = vmatprep.subr.bf16.mxu1 %v8589_v32  ;;  %v8680_v31 = vld [vmem:[%s11366_s1 + $0x1828] ss:$16 sps:$4 sm:$0xff]   ;;  %v8685_v32 = vld [vmem:[%s11366_s1 + $0x1844] ss:$16 sps:$4 sm:$0xff]  }
 0x2cb   :  { %5473 = vmatpush1.bf16.msra.mxu0 %v8584_v33  ;;  %6032 = vmatpush1.bf16.msra.mxu1 %v8587_v34  ;;  %v8688_v33 = vld [vmem:[%s11366_s1 + $0x184c] ss:$16 sps:$4 sm:$0xff]   ;;  %v8752_v34 = vmov 0  }
 0x2cc   :  { %5474 = vmatprep.subr.bf16.mxu0 %v8592_v35  ;;  %6033 = vmatprep.subr.bf16.mxu1 %v8595_v36  ;;  %v8683_v35 = vld [vmem:[%s11366_s1 + $0x1840] ss:$16 sps:$4 sm:$0xff]   ;;  %v8686_v36 = vld [vmem:[%s11366_s1 + $0x1848] ss:$16 sps:$4 sm:$0xff]  }
 0x2cf   :  { %5475 = vmatpush1.bf16.msra.mxu0 %v8590_v37  ;;  %6034 = vmatpush1.bf16.msra.mxu1 %v8593_v38  ;;  %v8691_v37 = vld [vmem:[%s11366_s1 + $0x1864] ss:$16 sps:$4 sm:$0xff]   ;;  %v8694_v38 = vld [vmem:[%s11366_s1 + $0x186c] ss:$16 sps:$4 sm:$0xff]  }
 0x2d0   :  { %5476 = vmatprep.subr.bf16.mxu0 %v8598_v39  ;;  %6035 = vmatprep.subr.bf16.mxu1 %v8601_v40  ;;  %v8689_v39 = vld [vmem:[%s11366_s1 + $0x1860] ss:$16 sps:$4 sm:$0xff]   ;;  %v8692_v40 = vld [vmem:[%s11366_s1 + $0x1868] ss:$16 sps:$4 sm:$0xff]  }
 0x2d3   :  { %5477 = vmatpush1.bf16.msra.mxu0 %v8596_v41  ;;  %6036 = vmatpush1.bf16.msra.mxu1 %v8599_v42  ;;  %v8697_v41 = vld [vmem:[%s11366_s1 + $0x1884] ss:$16 sps:$4 sm:$0xff]   ;;  %v8700_v42 = vld [vmem:[%s11366_s1 + $0x188c] ss:$16 sps:$4 sm:$0xff]  }
 0x2d4   :  { %5478 = vmatprep.subr.bf16.mxu0 %v8604_v43  ;;  %6037 = vmatprep.subr.bf16.mxu1 %v8607_v44  ;;  %v8695_v43 = vld [vmem:[%s11366_s1 + $0x1880] ss:$16 sps:$4 sm:$0xff]   ;;  %v8698_v44 = vld [vmem:[%s11366_s1 + $0x1888] ss:$16 sps:$4 sm:$0xff]  }
 0x2d7   :  { %5479 = vmatpush1.bf16.msra.mxu0 %v8602_v45  ;;  %6038 = vmatpush1.bf16.msra.mxu1 %v8605_v46  ;;  %v8703_v45 = vld [vmem:[%s11366_s1 + $0x18a4] ss:$16 sps:$4 sm:$0xff]   ;;  %v8706_v46 = vld [vmem:[%s11366_s1 + $0x18ac] ss:$16 sps:$4 sm:$0xff]  }
 0x2d8   :  { %5480 = vmatprep.subr.bf16.mxu0 %v8610_v47  ;;  %6039 = vmatprep.subr.bf16.mxu1 %v8613_v48  ;;  %v8701_v47 = vld [vmem:[%s11366_s1 + $0x18a0] ss:$16 sps:$4 sm:$0xff]   ;;  %v8704_v48 = vld [vmem:[%s11366_s1 + $0x18a8] ss:$16 sps:$4 sm:$0xff]  }
 0x2db   :  { %5481 = vmatpush1.bf16.msra.mxu0 %v8608_v49  ;;  %6040 = vmatpush1.bf16.msra.mxu1 %v8611_v50  ;;  %v8709_v49 = vld [vmem:[%s11366_s1 + $0x18c4] ss:$16 sps:$4 sm:$0xff]   ;;  %v8712_v50 = vld [vmem:[%s11366_s1 + $0x18cc] ss:$16 sps:$4 sm:$0xff]  }
 0x2dc   :  { %5482 = vmatprep.subr.bf16.mxu0 %v8616_v51  ;;  %6041 = vmatprep.subr.bf16.mxu1 %v8619_v52  ;;  %v8707_v51 = vld [vmem:[%s11366_s1 + $0x18c0] ss:$16 sps:$4 sm:$0xff]   ;;  %v8710_v52 = vld [vmem:[%s11366_s1 + $0x18c8] ss:$16 sps:$4 sm:$0xff]  }
 0x2df   :  { %5483 = vmatpush1.bf16.msra.mxu0 %v8614_v53  ;;  %6042 = vmatpush1.bf16.msra.mxu1 %v8617_v54  ;;  %v8715_v53 = vld [vmem:[%s11366_s1 + $0x18e4] ss:$16 sps:$4 sm:$0xff]   ;;  %v8718_v54 = vld [vmem:[%s11366_s1 + $0x18ec] ss:$16 sps:$4 sm:$0xff]  }
 0x2e0   :  { %5484 = vmatprep.subr.bf16.mxu0 %v8622_v55  ;;  %6043 = vmatprep.subr.bf16.mxu1 %v8625_v56  ;;  %v8713_v55 = vld [vmem:[%s11366_s1 + $0x18e0] ss:$16 sps:$4 sm:$0xff]   ;;  %v8716_v56 = vld [vmem:[%s11366_s1 + $0x18e8] ss:$16 sps:$4 sm:$0xff]  }
 0x2e3   :  { %5485 = vmatpush1.bf16.msra.mxu0 %v8620_v57  ;;  %6044 = vmatpush1.bf16.msra.mxu1 %v8623_v58  ;;  %v8720_v57 = vld [vmem:[%s11368_s3 + $0x40] sm:$0xff]  }
 0x2e4   :  { %5486 = vmatprep.subr.bf16.mxu0 %v8628_v59  ;;  %6045 = vmatprep.subr.bf16.mxu1 %v8631_v60  ;;  %v8721_v58 = vld [vmem:[%s11368_s3 + $0xc0] sm:$0xff]  }
 0x2e5   :  { %v8719_v59 = vld [vmem:[%s11367_s0 + $0x60] ss:$100 sps:$4 sm:$0xff]  }
 0x2e6   :  { %v8722_v60 = vld [vmem:[%s11368_s3] sm:$0xff]  }
 0x2e7   :  { %5487 = vmatpush1.bf16.msra.mxu0 %v8626_v61  ;;  %6046 = vmatpush1.bf16.msra.mxu1 %v8629_v62  ;;  %v8723_v61 = vld [vmem:[%s11368_s3 + $0x80] sm:$0xff]   ;;  %v8724_v62 = vld [vmem:[%s11368_s3 + $0x48] sm:$0xff]  }
 0x2e8   :  { %5488 = vmatprep.subr.bf16.mxu0 %v8634_v63  ;;  %6047 = vmatprep.subr.bf16.mxu1 %v8637_v0  ;;  %v8725_v63 = vld [vmem:[%s11368_s3 + $0xc8] sm:$0xff]  }
 0x2e9   :  { %v8726_v0 = vld [vmem:[%s11368_s3 + $0x8] sm:$0xff]  }
 0x2eb   :  { %5489 = vmatpush1.bf16.msra.mxu0 %v8632_v1  ;;  %6048 = vmatpush1.bf16.msra.mxu1 %v8635_v2  ;;  %v8727_v1 = vld [vmem:[%s11368_s3 + $0x88] sm:$0xff]   ;;  %v8728_v2 = vld [vmem:[%s11368_s3 + $0x50] sm:$0xff]  }
 0x2ec   :  { %5490 = vmatprep.subr.bf16.mxu0 %v8640_v3  ;;  %6049 = vmatprep.subr.bf16.mxu1 %v8643_v4  ;;  %v8729_v3 = vld [vmem:[%s11368_s3 + $0xd0] sm:$0xff]  }
 0x2ed   :  { %v8730_v4 = vld [vmem:[%s11368_s3 + $0x10] sm:$0xff]  }
 0x2ef   :  { %5491 = vmatpush1.bf16.msra.mxu0 %v8638_v5  ;;  %6050 = vmatpush1.bf16.msra.mxu1 %v8641_v6  ;;  %v8731_v5 = vld [vmem:[%s11368_s3 + $0x90] sm:$0xff]   ;;  %v8732_v6 = vld [vmem:[%s11368_s3 + $0x58] sm:$0xff]  }
 0x2f0   :  { %5492 = vmatprep.subr.bf16.mxu0 %v8646_v7  ;;  %6051 = vmatprep.subr.bf16.mxu1 %v8649_v8  ;;  %v8733_v7 = vld [vmem:[%s11368_s3 + $0xd8] sm:$0xff]  }
 0x2f1   :  { %v8734_v8 = vld [vmem:[%s11368_s3 + $0x18] sm:$0xff]  }
 0x2f3   :  { %5493 = vmatpush1.bf16.msra.mxu0 %v8644_v9  ;;  %6052 = vmatpush1.bf16.msra.mxu1 %v8647_v10  ;;  %v8735_v9 = vld [vmem:[%s11368_s3 + $0x98] sm:$0xff]   ;;  %v8736_v10 = vld [vmem:[%s11368_s3 + $0x60] sm:$0xff]  }
 0x2f4   :  { %5494 = vmatprep.subr.bf16.mxu0 %v8652_v11  ;;  %6053 = vmatprep.subr.bf16.mxu1 %v8655_v12  ;;  %v8737_v11 = vld [vmem:[%s11368_s3 + $0xe0] sm:$0xff]  }
 0x2f5   :  { %v8738_v12 = vld [vmem:[%s11368_s3 + $0x20] sm:$0xff]  }
 0x2f7   :  { %5495 = vmatpush1.bf16.msra.mxu0 %v8650_v13  ;;  %6054 = vmatpush1.bf16.msra.mxu1 %v8653_v14  ;;  %v8739_v13 = vld [vmem:[%s11368_s3 + $0xa0] sm:$0xff]   ;;  %v8740_v14 = vld [vmem:[%s11368_s3 + $0x68] sm:$0xff]  }
 0x2f8   :  { %5496 = vmatprep.subr.bf16.mxu0 %v8658_v15  ;;  %6055 = vmatprep.subr.bf16.mxu1 %v8661_v16  ;;  %v8741_v15 = vld [vmem:[%s11368_s3 + $0xe8] sm:$0xff]  }
 0x2f9   :  { %v8742_v16 = vld [vmem:[%s11368_s3 + $0x28] sm:$0xff]  }
 0x2fb   :  { %5497 = vmatpush1.bf16.msra.mxu0 %v8656_v17  ;;  %6056 = vmatpush1.bf16.msra.mxu1 %v8659_v18  ;;  %v8743_v17 = vld [vmem:[%s11368_s3 + $0xa8] sm:$0xff]   ;;  %v8744_v18 = vld [vmem:[%s11368_s3 + $0x70] sm:$0xff]  }
 0x2fc   :  { %5498 = vmatprep.subr.bf16.mxu0 %v8664_v19  ;;  %6057 = vmatprep.subr.bf16.mxu1 %v8667_v20  ;;  %v8745_v19 = vld [vmem:[%s11368_s3 + $0xf0] sm:$0xff]  }
 0x2fd   :  { %v8746_v20 = vld [vmem:[%s11368_s3 + $0x30] sm:$0xff]  }
 0x2ff   :  { %5499 = vmatpush1.bf16.msra.mxu0 %v8662_v21  ;;  %6058 = vmatpush1.bf16.msra.mxu1 %v8665_v22  ;;  %v8747_v21 = vld [vmem:[%s11368_s3 + $0xb0] sm:$0xff]   ;;  %v8748_v22 = vld [vmem:[%s11368_s3 + $0x78] sm:$0xff]  }
 0x300   :  { %5511 = vmatprep.subr.bf16.mxu0 %v8673_v23  ;;  %6070 = vmatprep.subr.bf16.mxu1 %v8676_v24  ;;  %v8749_v23 = vld [vmem:[%s11368_s3 + $0xf8] sm:$0xff]  }
 0x301   :  { %v8750_v24 = vld [vmem:[%s11368_s3 + $0x38] sm:$0xff]  }
 0x302   :  { %5501 = vmatmul.mubr.bf16.vlgmr.msra.gmra.mrb[0].mxu0 %v8668_v25  ;;  %6060 = vmatmul.mubr.bf16.vlgmr.msra.gmra.mrb[0].mxu1 %v8668_v25  ;;  %v8751_v25 = vld [vmem:[%s11368_s3 + $0xb8] sm:$0xff]  }
 0x303   :  { %5512 = vmatpush1.bf16.msra.mxu0 %v8671_v26  ;;  %6071 = vmatpush1.bf16.msra.mxu1 %v8674_v27  ;;  %v849_v26 = vlaneseq }
 0x304   :  { %5513 = vmatprep.subr.bf16.mxu0 %v8679_v28  ;;  %6072 = vmatprep.subr.bf16.mxu1 %v8682_v29 }
 0x305   :  { %5543 = vmatprep.mubr.bf16.mxu0 %v8752_v34  ;;  %6102 = vmatprep.mubr.bf16.mxu1 %v8752_v34  ;;  %v850_v27 = vshrl.u32 %v849_v26, 7 }
 0x307   :  { %5514 = vmatpush1.bf16.msra.mxu0 %v8677_v30  ;;  %6073 = vmatpush1.bf16.msra.mxu1 %v8680_v31  ;;  %v851_v28 = vsub.s32 0, %v850_v27  ;;  %v859_v29 = vsub.s32 2, %v850_v27  ;;  %v847_v30 = vld [vmem:[%s11369_s2] sm:$0xf]  ;;  %v855_v31 = vsub.s32 1, %v850_v27 }
 0x308   :  { %5515 = vmatprep.subr.bf16.mxu0 %v8685_v32  ;;  %6074 = vmatprep.subr.bf16.mxu1 %v8688_v33  ;;  %v863_v32 = vsub.s32 3, %v850_v27 }
 0x309   :  { %v852_v33 = vrot.slane %v847_v30, %v851_v28  ;;  %v860_v34 = vrot.slane %v847_v30, %v859_v29 }
 0x30b   :  { %5516 = vmatpush1.bf16.msra.mxu0 %v8683_v35  ;;  %6075 = vmatpush1.bf16.msra.mxu1 %v8686_v36  ;;  %v856_v35 = vrot.slane %v847_v30, %v855_v31  ;;  %v864_v36 = vrot.slane %v847_v30, %v863_v32 }
 0x30c   :  { %5517 = vmatprep.subr.bf16.mxu0 %v8691_v37  ;;  %6076 = vmatprep.subr.bf16.mxu1 %v8694_v38 }
 0x30f   :  { %5518 = vmatpush1.bf16.msra.mxu0 %v8689_v39  ;;  %6077 = vmatpush1.bf16.msra.mxu1 %v8692_v40 }
 0x310   :  { %5519 = vmatprep.subr.bf16.mxu0 %v8697_v41  ;;  %6078 = vmatprep.subr.bf16.mxu1 %v8700_v42 }
 0x313   :  { %5520 = vmatpush1.bf16.msra.mxu0 %v8695_v43  ;;  %6079 = vmatpush1.bf16.msra.mxu1 %v8698_v44 }
 0x314   :  { %5521 = vmatprep.subr.bf16.mxu0 %v8703_v45  ;;  %6080 = vmatprep.subr.bf16.mxu1 %v8706_v46 }
 0x317   :  { %5522 = vmatpush1.bf16.msra.mxu0 %v8701_v47  ;;  %6081 = vmatpush1.bf16.msra.mxu1 %v8704_v48 }
 0x318   :  { %5523 = vmatprep.subr.bf16.mxu0 %v8709_v49  ;;  %6082 = vmatprep.subr.bf16.mxu1 %v8712_v50 }
 0x31b   :  { %5524 = vmatpush1.bf16.msra.mxu0 %v8707_v51  ;;  %6083 = vmatpush1.bf16.msra.mxu1 %v8710_v52 }
 0x31c   :  { %5525 = vmatprep.subr.bf16.mxu0 %v8715_v53  ;;  %6084 = vmatprep.subr.bf16.mxu1 %v8718_v54 }
 0x31f   :  { %5526 = vmatpush1.bf16.msra.mxu0 %v8713_v55  ;;  %6085 = vmatpush1.bf16.msra.mxu1 %v8716_v56 }
 0x320   :  { %7334 = vmatprep.subr.bf16.mxu0 %v8720_v57  ;;  %7356 = vmatprep.subr.bf16.mxu1 %v8721_v58 }
 0x322   :  { %5544 = vmatmul.mubr.bf16.vlgmr.msra.gmra.mrb[0].mxu0 %v8719_v59  ;;  %6103 = vmatmul.mubr.bf16.vlgmr.msra.gmra.mrb[0].mxu1 %v8719_v59 }
 0x323   :  { %7335 = vmatpush3.bf16.msra.mxu0 %v8722_v60  ;;  %7357 = vmatpush3.bf16.msra.mxu1 %v8723_v61 }
 0x324   :  { %7336 = vmatprep.subr.bf16.mxu0 %v8724_v62  ;;  %7358 = vmatprep.subr.bf16.mxu1 %v8725_v63 }
 0x327   :  { %7337 = vmatpush3.bf16.msra.mxu0 %v8726_v0  ;;  %7359 = vmatpush3.bf16.msra.mxu1 %v8727_v1 }
 0x328   :  { %7338 = vmatprep.subr.bf16.mxu0 %v8728_v2  ;;  %7360 = vmatprep.subr.bf16.mxu1 %v8729_v3  ;;  %v7301_v3 = vld [vmem:[%s11370_s4] ss:$0 sm:$0xff] }
 0x32b   :  { %7339 = vmatpush3.bf16.msra.mxu0 %v8730_v4  ;;  %7361 = vmatpush3.bf16.msra.mxu1 %v8731_v5 }
 0x32c   :  { %7340 = vmatprep.subr.bf16.mxu0 %v8732_v6  ;;  %7362 = vmatprep.subr.bf16.mxu1 %v8733_v7 }
 0x32f   :  { %7341 = vmatpush3.bf16.msra.mxu0 %v8734_v8  ;;  %7363 = vmatpush3.bf16.msra.mxu1 %v8735_v9 }
 0x330   :  { %7342 = vmatprep.subr.bf16.mxu0 %v8736_v10  ;;  %7364 = vmatprep.subr.bf16.mxu1 %v8737_v11 }
 0x333   :  { %7343 = vmatpush3.bf16.msra.mxu0 %v8738_v12  ;;  %7365 = vmatpush3.bf16.msra.mxu1 %v8739_v13 }
 0x334   :  { %7344 = vmatprep.subr.bf16.mxu0 %v8740_v14  ;;  %7366 = vmatprep.subr.bf16.mxu1 %v8741_v15 }
 0x337   :  { %7345 = vmatpush3.bf16.msra.mxu0 %v8742_v16  ;;  %7367 = vmatpush3.bf16.msra.mxu1 %v8743_v17 }
 0x338   :  { %7346 = vmatprep.subr.bf16.mxu0 %v8744_v18  ;;  %7368 = vmatprep.subr.bf16.mxu1 %v8745_v19 }
 0x33b   :  { %7347 = vmatpush3.bf16.msra.mxu0 %v8746_v20  ;;  %7369 = vmatpush3.bf16.msra.mxu1 %v8747_v21 }
 0x33c   :  { %7348 = vmatprep.subr.bf16.mxu0 %v8748_v22  ;;  %7370 = vmatprep.subr.bf16.mxu1 %v8749_v23 }
 0x33f   :  { %7349 = vmatpush3.bf16.msra.mxu0 %v8750_v24  ;;  %7371 = vmatpush3.bf16.msra.mxu1 %v8751_v25 }
 0x3f5   :  { %v5545_v37 = vpop.f32.mrb[0].mxu0  ;;  %v6104_v38 = vpop.f32.mrb[0].mxu1 }
 0x3f6   :  { %v7378_v39 = vadd.f32 %v5545_v37, %v852_v33  ;;  %v7382_v40 = vadd.f32 %v6104_v38, %v860_v34  ;;  %v5547_v41 = vpop.f32.mrb[1].mxu0  ;;  %v6106_v42 = vpop.f32.mrb[1].mxu1 }
 0x3f7   :  { %v7379_v43 = vadd.f32 %v5547_v41, %v856_v35  ;;  %v7383_v44 = vadd.f32 %v6106_v42, %v864_v36  ;;  %v5549_v45 = vpop.f32.mrb[2].mxu0  ;;  %v6108_v46 = vpop.f32.mrb[2].mxu1 }
 0x3f8   :  { %v7380_v47 = vadd.f32 %v5549_v45, %v852_v33  ;;  %v7384_v48 = vadd.f32 %v6108_v46, %v860_v34  ;;  %v5551_v49 = vpop.f32.mrb[3].mxu0  ;;  %v6110_v50 = vpop.f32.mrb[3].mxu1  ;;  %v6113_v53 = vmax.f32 %v7378_v39, 0.0  ;;  %v6115_v54 = vmax.f32 %v7382_v40, 0.0 }
 0x3f9   :  { %v7381_v51 = vadd.f32 %v5551_v49, %v856_v35  ;;  %v7385_v52 = vadd.f32 %v6110_v50, %v864_v36  ;;  %v6114_v57 = vmax.f32 %v7379_v43, 0.0  ;;  %v6116_v58 = vmax.f32 %v7383_v44, 0.0 }
 0x3fa   :  { %v6117_v55 = vmax.f32 %v7380_v47, 0.0  ;;  %v6119_v56 = vmax.f32 %v7384_v48, 0.0 }
 0x3fb   :  { %v6118_v59 = vmax.f32 %v7381_v51, 0.0  ;;  %v6120_v60 = vmax.f32 %v7385_v52, 0.0 }
 0x3fc   :  { %v6121_v61 = vpack.c.bf16 %v6117_v55, %v6113_v53  ;;  %v6123_v62 = vpack.c.bf16 %v6119_v56, %v6115_v54 }
 0x3fd   :  { %v6122_v63 = vpack.c.bf16 %v6118_v59, %v6114_v57  ;;  %v6124_v0 = vpack.c.bf16 %v6120_v60, %v6116_v58 }
 0x3ff   :  { %6420 = vmatprep.mubr.bf16.mxu0 %v6122_v63  ;;  %6461 = vmatprep.mubr.bf16.mxu1 %v6124_v0 }
 0x400   :  { %6421 = vmatmul.mubr.bf16.vlgmr.msra.gmra.mrb[4].mxu0 %v6121_v61  ;;  %6462 = vmatmul.mubr.bf16.vlgmr.msra.gmra.mrb[4].mxu1 %v6123_v62 }
 0x4d3   :  { %v7350_v1 = vpop.f32.mrb[4].mxu0  ;;  %v7372_v2 = vpop.f32.mrb[4].mxu1 }
 0x4d4   :  { %v7351_v4 = vpop.f32.mrb[5].mxu0  ;;  %v7373_v5 = vpop.f32.mrb[5].mxu1 }
 0x4d5   :  { %v7352_v6 = vadd.f32 %v7351_v4, %v7350_v1  ;;  %v7374_v7 = vadd.f32 %v7373_v5, %v7372_v2  ;;  %v7353_v8 = vpop.f32.mrb[6].mxu0  ;;  %v7375_v9 = vpop.f32.mrb[6].mxu1 }
 0x4d6   :  { %v7354_v10 = vpop.f32.mrb[7].mxu0  ;;  %v7376_v11 = vpop.f32.mrb[7].mxu1 }
 0x4d7   :  { %v6423_v12 = vadd.f32 %v7352_v6, %v7301_v3  ;;  %v7355_v13 = vadd.f32 %v7354_v10, %v7353_v8  ;;  %v7377_v14 = vadd.f32 %v7376_v11, %v7375_v9 }
 0x4d9   :  { %v6464_v15 = vadd.f32 %v7374_v7, %v6423_v12  ;;  %v6426_v16 = vadd.f32 %v7355_v13, %v7301_v3 }
 0x4db   :  { %6470 = vst [vmem:[%s11371_s5] sm:$0xff] %v6464_v15  ;;  %v6467_v17 = vadd.f32 %v7377_v14, %v6426_v16 }
 0x4dd   :  { %6471 = vst [vmem:[%s11371_s5 + $0x8] sm:$0xff] %v6467_v17 }

</bundles_post_ra>
